<compile_context>
chip_gen: v6e
topology: v6e:2x2x1
jax: 0.10.0
libtpu: 0.0.40
codegen_flags: <defaults>
</compile_context>

<pallas_src>
import math

import jax
import jax.numpy as jnp
from jax import lax
from jax.experimental import pallas as pl
from jax.experimental.pallas import tpu as pltpu

# Scaled-down hyper-parameters (the torch module hard-codes embedding_dim=512,
# hidden_dim=512, attention_dim=256, max_seq_len=500, num_layers=2; we keep the
# structure but shrink the sizes for a small runnable demo).
VOCAB = 32          # vocab.get_size()  (= embedding rows = num_classes)
EMB = 32            # embedding_dim
HID = 32            # hidden_dim (per direction)
ATT = 16            # attention_dim (only used by the verification reference)
SEG_LEN = 8         # Seq2Seq.segment_length (ctor arg `max_length`)
MAX_SEQ_LEN = 8     # encoder max_seq_len; kept == SEG_LEN (see header comment)

SEG_CHUNK = 8                                          # segments batched per grid step
SEQ_PAD = ((SEG_CHUNK + SEG_LEN - 1 + 7) // 8) * 8     # padded token-window rows (=16)
V_PAD = 128                                            # vocab padded to a full lane tile

WEIGHT_ORDER = (
    "emb",
    "w1f_x", "w1f_h", "b1f", "w1b_x", "w1b_h", "b1b",
    "w2f_x", "w2f_h", "b2f", "w2b_x", "w2b_h", "b2b",
)


def seq2seq_kernel(ids_ref,                                   # SMEM (P,) int32
                   emb_ref,                                   # (V, E)
                   w1fx_ref, w1fh_ref, b1f_ref,               # layer-1 forward LSTM
                   w1bx_ref, w1bh_ref, b1b_ref,               # layer-1 backward LSTM
                   w2fx_ref, w2fh_ref, b2f_ref,               # layer-2 forward LSTM
                   w2bx_ref, w2bh_ref, b2b_ref,               # layer-2 backward LSTM
                   wfc_ref, bfc_ref,                          # padded fc weights
                   out_ref,                                   # (SEG_CHUNK, V_PAD)
                   embs_ref,                                  # VMEM (SEQ_PAD, E)
                   h1f_ref, h1b_ref):                         # VMEM (T*S, H) each
    chunk = pl.program_id(0)
    base = chunk * SEG_CHUNK
    H = HID
    T = SEG_LEN
    S = SEG_CHUNK

    def f32dot(a, b):
        return jnp.dot(a, b, preferred_element_type=jnp.float32)

    def lstm_gates(g, c_prev):
        # PyTorch gate order: i, f, g(cell), o
        i_g = jax.nn.sigmoid(g[:, 0:H])
        f_g = jax.nn.sigmoid(g[:, H:2 * H])
        g_g = jnp.tanh(g[:, 2 * H:3 * H])
        o_g = jax.nn.sigmoid(g[:, 3 * H:4 * H])
        c_new = f_g * c_prev + i_g * g_g
        h_new = o_g * jnp.tanh(c_new)
        return h_new, c_new

    # ---- 1) gather the chunk's padded token window once into VMEM -----------
    # segment (base+s) at time t uses token ids[base + s + t]  (sliding window)
    for i in range(SEQ_PAD):
        tok = ids_ref[base + i]
        embs_ref[pl.ds(i, 1), :] = emb_ref[pl.ds(tok, 1), :]
    embs = embs_ref[...]                                       # (SEQ_PAD, E)

    # ---- 2) layer 1: hoisted input projections over the shared window -------
    pre1f = f32dot(embs, w1fx_ref[...]) + b1f_ref[...]         # (SEQ_PAD, 4H)
    pre1b = f32dot(embs, w1bx_ref[...]) + b1b_ref[...]

    # forward direction (batched over S segments)
    w1fh = w1fh_ref[...]
    h = jnp.zeros((S, H), jnp.float32)
    c = jnp.zeros((S, H), jnp.float32)
    for t in range(T):
        g = pre1f[t:t + S, :] + f32dot(h, w1fh)                # row s -> segment s, time t
        h, c = lstm_gates(g, c)
        h1f_ref[t * S:(t + 1) * S, :] = h
    h1f_last = h                                               # layer-1 fwd output @ t=T-1

    # backward direction
    w1bh = w1bh_ref[...]
    h = jnp.zeros((S, H), jnp.float32)
    c = jnp.zeros((S, H), jnp.float32)
    h1b_last = None
    for step in range(T):
        t = T - 1 - step
        g = pre1b[t:t + S, :] + f32dot(h, w1bh)
        h, c = lstm_gates(g, c)
        h1b_ref[t * S:(t + 1) * S, :] = h
        if step == 0:
            h1b_last = h                                       # layer-1 bwd output @ t=T-1

    # ---- 3) layer 2 forward: hoisted input projection (split halves, no concat)
    h1f_all = h1f_ref[...]                                     # (T*S, H), row t*S + s
    h1b_all = h1b_ref[...]
    w2fx = w2fx_ref[...]                                       # (2H, 4H)
    pre2f = (f32dot(h1f_all, w2fx[:H, :]) + f32dot(h1b_all, w2fx[H:, :])
             + b2f_ref[...])                                   # (T*S, 4H)

    w2fh = w2fh_ref[...]
    h = jnp.zeros((S, H), jnp.float32)
    c = jnp.zeros((S, H), jnp.float32)
    for t in range(T):
        g = pre2f[t * S:(t + 1) * S, :] + f32dot(h, w2fh)
        h, c = lstm_gates(g, c)
    h2f_last = h                                               # layer-2 fwd output @ t=T-1

    # ---- 4) layer 2 backward: only its t=T-1 output is consumed downstream,
    #         and it starts from a zero (h, c) state -> one exact cell eval.
    w2bx = w2bx_ref[...]
    gb = (f32dot(h1f_last, w2bx[:H, :]) + f32dot(h1b_last, w2bx[H:, :])
          + b2b_ref[...])                                      # (S, 4H)
    i_g = jax.nn.sigmoid(gb[:, 0:H])
    # forget gate multiplies the zero initial cell state -> drops out exactly
    g_g = jnp.tanh(gb[:, 2 * H:3 * H])
    o_g = jax.nn.sigmoid(gb[:, 3 * H:4 * H])
    c2b = i_g * g_g
    h2b_last = o_g * jnp.tanh(c2b)

    # ---- 5) epilogue: attention == identity; only row MAX_SEQ_LEN-1 (=T-1)
    #         of fc+softmax survives -> one lane-dense (S, V_PAD) softmax.
    wfc = wfc_ref[...]                                         # (2H, V_PAD)
    logits = (f32dot(h2f_last, wfc[:H, :]) + f32dot(h2b_last, wfc[H:, :])
              + bfc_ref[...])                                  # (S, V_PAD)
    out_ref[...] = jax.nn.softmax(logits, axis=-1)


def init_params(key):
    keys = iter(jax.random.split(key, 64))

    def uni(shape, scale):
        return jax.random.uniform(next(keys), shape, jnp.float32, -scale, scale)

    s = 1.0 / math.sqrt(HID)
    p = {}
    emb = uni((VOCAB, EMB), 1.0)
    p["emb"] = emb.at[0].set(0.0)                      # padding_idx=0
    for layer, in_dim in ((1, EMB), (2, 2 * HID)):
        for d in ("f", "b"):
            p[f"w{layer}{d}_x"] = uni((in_dim, 4 * HID), s)     # W_ih^T
            p[f"w{layer}{d}_h"] = uni((HID, 4 * HID), s)        # W_hh^T
            p[f"b{layer}{d}"] = uni((1, 4 * HID), s) + uni((1, 4 * HID), s)
    sp = 1.0 / math.sqrt(2 * HID)
    p["wp"] = uni((2 * HID, ATT), sp)                  # proj_w.weight^T
    p["bp"] = uni((1, ATT), sp)                        # proj_w.bias
    sv = 1.0 / math.sqrt(ATT)
    p["v"] = uni((ATT, 1), sv)                         # proj_v.weight^T (no bias)
    p["wfc"] = uni((2 * HID, VOCAB), sp)               # fc_layer.weight^T
    p["bfc"] = uni((1, VOCAB), sp)                     # fc_layer.bias
    return p


def _pad_ids(src):
    """pad_list_by_num_segments: left-pad with SEG_LEN-1 zeros, right-pad to
    num_segments * SEG_LEN.
    TODO(synk): `pad_list` is undefined in the source module; zero padding assumed."""
    L = src.shape[1]
    num_segments = L if L - 1 > 0 else 1               # get_num_segments
    flat = src[0].astype(jnp.int32)
    padded = jnp.concatenate([jnp.zeros((SEG_LEN - 1,), jnp.int32), flat])
    max_len = num_segments * SEG_LEN
    padded = jnp.pad(padded, (0, max(0, max_len - int(padded.shape[0]))))
    return padded, num_segments


def reference_forward(params, src):
    """Literal pure-JAX transcription of the torch forward (per segment,
    batch=1), INCLUDING the un-simplified MLP-attention path. Verification only."""
    high = jax.lax.Precision.HIGHEST
    mm = lambda a, b: jnp.dot(a, b, precision=high)
    padded, num_segments = _pad_ids(src)
    H = HID

    def run_dir(X, wx, wh, b, reverse):
        h = jnp.zeros((1, H), jnp.float32)
        c = jnp.zeros((1, H), jnp.float32)
        outs = [None] * SEG_LEN
        order = range(SEG_LEN - 1, -1, -1) if reverse else range(SEG_LEN)
        for t in order:
            g = mm(X[t:t + 1], wx) + mm(h, wh) + b
            i = jax.nn.sigmoid(g[:, :H]); f = jax.nn.sigmoid(g[:, H:2 * H])
            gg = jnp.tanh(g[:, 2 * H:3 * H]); o = jax.nn.sigmoid(g[:, 3 * H:])
            c = f * c + i * gg
            h = o * jnp.tanh(c)
            outs[t] = h
        return jnp.concatenate(outs, axis=0)           # (T, H)

    preds = []
    for n in range(num_segments):
        ids_seg = padded[n:n + SEG_LEN]
        X = params["emb"][ids_seg]                      # (T, E)
        o1f = run_dir(X, params["w1f_x"], params["w1f_h"], params["b1f"], False)
        o1b = run_dir(X, params["w1b_x"], params["w1b_h"], params["b1b"], True)
        x1 = jnp.concatenate([o1f, o1b], axis=1)
        o2f = run_dir(x1, params["w2f_x"], params["w2f_h"], params["b2f"], False)
        o2b = run_dir(x1, params["w2b_x"], params["w2b_h"], params["b2b"], True)
        x2 = jnp.concatenate([o2f, o2b], axis=1)        # (T, 2H)
        if MAX_SEQ_LEN > SEG_LEN:
            x2 = jnp.concatenate(
                [x2, jnp.zeros((MAX_SEQ_LEN - SEG_LEN, 2 * H), jnp.float32)], axis=0)
        # MLPAttentionNetwork (batch-first misuse reproduced literally)
        mlp = mm(x2, params["wp"]) + params["bp"]       # (T, A)
        s = mm(mlp, params["v"])                        # (T, 1)
        scores = jnp.broadcast_to(s, (MAX_SEQ_LEN, SEG_LEN))
        w = jax.nn.softmax(scores, axis=-1)             # (T, SEG) uniform
        attn = jnp.sum(w.T[:, :, None] * x2[None, :, :], axis=0)   # (T, 2H) == x2
        logits = jax.nn.softmax(mm(attn, params["wfc"]) + params["bfc"], axis=1)
        preds.append(logits[MAX_SEQ_LEN - 1])
    return jnp.stack(preds, axis=0)


def seq2seq_forward(params, src, tgt):
    """src: (1, L) int32 token ids (matches the torch (batch=1, src_len) input)."""
    padded, num_segments = _pad_ids(src)
    num_chunks = pl.cdiv(num_segments, SEG_CHUNK)

    # every in-kernel window read ids[chunk*SEG_CHUNK + i], i < SEQ_PAD, must be
    # in bounds (padding segments read token 0 -> zero embedding row; their
    # output rows are sliced away below).
    needed = num_chunks * SEG_CHUNK + SEQ_PAD
    ids = jnp.pad(padded, (0, max(0, needed - int(padded.shape[0]))))

    # vocab padded to a full 128-lane tile; padded bias lanes = -1e30 so the
    # softmax over the padded row equals the softmax over the real vocab.
    wfc_p = jnp.zeros((2 * HID, V_PAD), jnp.float32).at[:, :VOCAB].set(params["wfc"])
    bfc_p = jnp.full((1, V_PAD), -1e30, jnp.float32).at[:, :VOCAB].set(params["bfc"])

    operands = [params[name] for name in WEIGHT_ORDER] + [wfc_p, bfc_p]
    in_specs = [pl.BlockSpec(op.shape, lambda c, ids_sm: (0, 0)) for op in operands]

    grid_spec = pltpu.PrefetchScalarGridSpec(
        num_scalar_prefetch=1,                           # padded token ids -> SMEM
        grid=(num_chunks,),
        in_specs=in_specs,
        out_specs=pl.BlockSpec((SEG_CHUNK, V_PAD), lambda c, ids_sm: (c, 0)),
        scratch_shapes=[
            pltpu.VMEM((SEQ_PAD, EMB), jnp.float32),                   # gathered embeddings
            pltpu.VMEM((SEG_LEN * SEG_CHUNK, HID), jnp.float32),       # layer-1 fwd outputs
            pltpu.VMEM((SEG_LEN * SEG_CHUNK, HID), jnp.float32),       # layer-1 bwd outputs
        ],
    )
    out = pl.pallas_call(
        seq2seq_kernel,
        grid_spec=grid_spec,
        out_shape=jax.ShapeDtypeStruct((num_chunks * SEG_CHUNK, V_PAD), jnp.float32),
        compiler_params=pltpu.CompilerParams(dimension_semantics=("parallel",)),
    )(ids, *operands)
    # torch allocates the output buffer as float64; we keep float32.
    return out[:num_segments, :VOCAB], tgt


if __name__ == "__main__":
    key = jax.random.PRNGKey(0)
    pkey, dkey = jax.random.split(key)
    params = init_params(pkey)

    src_len = 5
    src = jax.random.randint(dkey, (1, src_len), 1, VOCAB, dtype=jnp.int32)
    tgt = jnp.zeros((src_len,), jnp.int32)              # unused by forward

    outputs, tgt_out = seq2seq_forward(params, src, tgt)
    outputs = jax.block_until_ready(outputs)

    assert outputs.shape == (src_len, VOCAB)
    assert bool(jnp.all(jnp.isfinite(outputs)))
    # each prediction is a softmax distribution over the vocab
    assert bool(jnp.all(jnp.abs(jnp.sum(outputs, axis=1) - 1.0) < 1e-4))

    # compare against a literal (un-simplified) transcription of the torch path
    ref = reference_forward(params, src)
    err = float(jnp.max(jnp.abs(outputs - ref)))
    assert err < 5e-3, f"kernel vs reference max abs err {err}"
    print("KERNEL_OK")
</pallas_src>

<mosaic_0001>
module attributes {stable_mosaic.version = 11 : i64} {
  func.func @seq2seq_kernel(%arg0: i32, %arg1: memref<40xi32, #tpu.memory_space<smem>>, %arg2: memref<32x32xf32, #tpu.memory_space<vmem>>, %arg3: memref<32x128xf32, #tpu.memory_space<vmem>>, %arg4: memref<32x128xf32, #tpu.memory_space<vmem>>, %arg5: memref<1x128xf32, #tpu.memory_space<vmem>>, %arg6: memref<32x128xf32, #tpu.memory_space<vmem>>, %arg7: memref<32x128xf32, #tpu.memory_space<vmem>>, %arg8: memref<1x128xf32, #tpu.memory_space<vmem>>, %arg9: memref<64x128xf32, #tpu.memory_space<vmem>>, %arg10: memref<32x128xf32, #tpu.memory_space<vmem>>, %arg11: memref<1x128xf32, #tpu.memory_space<vmem>>, %arg12: memref<64x128xf32, #tpu.memory_space<vmem>>, %arg13: memref<32x128xf32, #tpu.memory_space<vmem>>, %arg14: memref<1x128xf32, #tpu.memory_space<vmem>>, %arg15: memref<64x128xf32, #tpu.memory_space<vmem>>, %arg16: memref<1x128xf32, #tpu.memory_space<vmem>>, %arg17: memref<8x128xf32, #tpu.memory_space<vmem>>, %arg18: memref<16x32xf32, #tpu.memory_space<vmem>>, %arg19: memref<64x32xf32, #tpu.memory_space<vmem>>, %arg20: memref<64x32xf32, #tpu.memory_space<vmem>>) attributes {dimension_semantics = [#tpu.dimension_semantics<parallel>], iteration_bounds = array<i64: 1>, scalar_prefetch = 1 : i64, scratch_operands = 3 : i64, tpu.core_type = #tpu.core_type<tc>, window_params = [{pipeline_mode = #tpu.pipeline_mode<synchronous>, transform_indices = @transform_0, window_bounds = array<i64: 32, 32>}, {pipeline_mode = #tpu.pipeline_mode<synchronous>, transform_indices = @transform_1, window_bounds = array<i64: 32, 128>}, {pipeline_mode = #tpu.pipeline_mode<synchronous>, transform_indices = @transform_2, window_bounds = array<i64: 32, 128>}, {pipeline_mode = #tpu.pipeline_mode<synchronous>, transform_indices = @transform_3, window_bounds = array<i64: 1, 128>}, {pipeline_mode = #tpu.pipeline_mode<synchronous>, transform_indices = @transform_4, window_bounds = array<i64: 32, 128>}, {pipeline_mode = #tpu.pipeline_mode<synchronous>, transform_indices = @transform_5, window_bounds = array<i64: 32, 128>}, {pipeline_mode = #tpu.pipeline_mode<synchronous>, transform_indices = @transform_6, window_bounds = array<i64: 1, 128>}, {pipeline_mode = #tpu.pipeline_mode<synchronous>, transform_indices = @transform_7, window_bounds = array<i64: 64, 128>}, {pipeline_mode = #tpu.pipeline_mode<synchronous>, transform_indices = @transform_8, window_bounds = array<i64: 32, 128>}, {pipeline_mode = #tpu.pipeline_mode<synchronous>, transform_indices = @transform_9, window_bounds = array<i64: 1, 128>}, {pipeline_mode = #tpu.pipeline_mode<synchronous>, transform_indices = @transform_10, window_bounds = array<i64: 64, 128>}, {pipeline_mode = #tpu.pipeline_mode<synchronous>, transform_indices = @transform_11, window_bounds = array<i64: 32, 128>}, {pipeline_mode = #tpu.pipeline_mode<synchronous>, transform_indices = @transform_12, window_bounds = array<i64: 1, 128>}, {pipeline_mode = #tpu.pipeline_mode<synchronous>, transform_indices = @transform_13, window_bounds = array<i64: 64, 128>}, {pipeline_mode = #tpu.pipeline_mode<synchronous>, transform_indices = @transform_14, window_bounds = array<i64: 1, 128>}, {transform_indices = @transform_15, window_bounds = array<i64: 8, 128>}]} {
    %c8_i32 = arith.constant 8 : i32
    %0 = arith.muli %arg0, %c8_i32 : i32
    %c0_i32 = arith.constant 0 : i32
    %1 = arith.addi %0, %c0_i32 : i32
    %2 = arith.index_cast %1 : i32 to index
    %3 = memref.load %arg1[%2] : memref<40xi32, #tpu.memory_space<smem>>
    %4 = arith.index_cast %3 : i32 to index
    %c0 = arith.constant 0 : index
    %5 = vector.load %arg2[%4, %c0] : memref<32x32xf32, #tpu.memory_space<vmem>>, vector<1x32xf32>
    %c0_0 = arith.constant 0 : index
    %c0_1 = arith.constant 0 : index
    %6 = vector.load %arg18[%c0_0, %c0_1] : memref<16x32xf32, #tpu.memory_space<vmem>>, vector<1x32xf32>
    tpu.vector_store %arg18[%c0_0, %c0_1], %5 {strides = array<i32>} : memref<16x32xf32, #tpu.memory_space<vmem>>, vector<1x32xf32>,
    %c1_i32 = arith.constant 1 : i32
    %7 = arith.addi %0, %c1_i32 : i32
    %8 = arith.index_cast %7 : i32 to index
    %9 = memref.load %arg1[%8] : memref<40xi32, #tpu.memory_space<smem>>
    %10 = arith.index_cast %9 : i32 to index
    %c0_2 = arith.constant 0 : index
    %11 = vector.load %arg2[%10, %c0_2] : memref<32x32xf32, #tpu.memory_space<vmem>>, vector<1x32xf32>
    %c1 = arith.constant 1 : index
    %c0_3 = arith.constant 0 : index
    %12 = vector.load %arg18[%c1, %c0_3] : memref<16x32xf32, #tpu.memory_space<vmem>>, vector<1x32xf32>
    tpu.vector_store %arg18[%c1, %c0_3], %11 {strides = array<i32>} : memref<16x32xf32, #tpu.memory_space<vmem>>, vector<1x32xf32>,
    %c2_i32 = arith.constant 2 : i32
    %13 = arith.addi %0, %c2_i32 : i32
    %14 = arith.index_cast %13 : i32 to index
    %15 = memref.load %arg1[%14] : memref<40xi32, #tpu.memory_space<smem>>
    %16 = arith.index_cast %15 : i32 to index
    %c0_4 = arith.constant 0 : index
    %17 = vector.load %arg2[%16, %c0_4] : memref<32x32xf32, #tpu.memory_space<vmem>>, vector<1x32xf32>
    %c2 = arith.constant 2 : index
    %c0_5 = arith.constant 0 : index
    %18 = vector.load %arg18[%c2, %c0_5] : memref<16x32xf32, #tpu.memory_space<vmem>>, vector<1x32xf32>
    tpu.vector_store %arg18[%c2, %c0_5], %17 {strides = array<i32>} : memref<16x32xf32, #tpu.memory_space<vmem>>, vector<1x32xf32>,
    %c3_i32 = arith.constant 3 : i32
    %19 = arith.addi %0, %c3_i32 : i32
    %20 = arith.index_cast %19 : i32 to index
    %21 = memref.load %arg1[%20] : memref<40xi32, #tpu.memory_space<smem>>
    %22 = arith.index_cast %21 : i32 to index
    %c0_6 = arith.constant 0 : index
    %23 = vector.load %arg2[%22, %c0_6] : memref<32x32xf32, #tpu.memory_space<vmem>>, vector<1x32xf32>
    %c3 = arith.constant 3 : index
    %c0_7 = arith.constant 0 : index
    %24 = vector.load %arg18[%c3, %c0_7] : memref<16x32xf32, #tpu.memory_space<vmem>>, vector<1x32xf32>
    tpu.vector_store %arg18[%c3, %c0_7], %23 {strides = array<i32>} : memref<16x32xf32, #tpu.memory_space<vmem>>, vector<1x32xf32>,
    %c4_i32 = arith.constant 4 : i32
    %25 = arith.addi %0, %c4_i32 : i32
    %26 = arith.index_cast %25 : i32 to index
    %27 = memref.load %arg1[%26] : memref<40xi32, #tpu.memory_space<smem>>
    %28 = arith.index_cast %27 : i32 to index
    %c0_8 = arith.constant 0 : index
    %29 = vector.load %arg2[%28, %c0_8] : memref<32x32xf32, #tpu.memory_space<vmem>>, vector<1x32xf32>
    %c4 = arith.constant 4 : index
    %c0_9 = arith.constant 0 : index
    %30 = vector.load %arg18[%c4, %c0_9] : memref<16x32xf32, #tpu.memory_space<vmem>>, vector<1x32xf32>
    tpu.vector_store %arg18[%c4, %c0_9], %29 {strides = array<i32>} : memref<16x32xf32, #tpu.memory_space<vmem>>, vector<1x32xf32>,
    %c5_i32 = arith.constant 5 : i32
    %31 = arith.addi %0, %c5_i32 : i32
    %32 = arith.index_cast %31 : i32 to index
    %33 = memref.load %arg1[%32] : memref<40xi32, #tpu.memory_space<smem>>
    %34 = arith.index_cast %33 : i32 to index
    %c0_10 = arith.constant 0 : index
    %35 = vector.load %arg2[%34, %c0_10] : memref<32x32xf32, #tpu.memory_space<vmem>>, vector<1x32xf32>
    %c5 = arith.constant 5 : index
    %c0_11 = arith.constant 0 : index
    %36 = vector.load %arg18[%c5, %c0_11] : memref<16x32xf32, #tpu.memory_space<vmem>>, vector<1x32xf32>
    tpu.vector_store %arg18[%c5, %c0_11], %35 {strides = array<i32>} : memref<16x32xf32, #tpu.memory_space<vmem>>, vector<1x32xf32>,
    %c6_i32 = arith.constant 6 : i32
    %37 = arith.addi %0, %c6_i32 : i32
    %38 = arith.index_cast %37 : i32 to index
    %39 = memref.load %arg1[%38] : memref<40xi32, #tpu.memory_space<smem>>
    %40 = arith.index_cast %39 : i32 to index
    %c0_12 = arith.constant 0 : index
    %41 = vector.load %arg2[%40, %c0_12] : memref<32x32xf32, #tpu.memory_space<vmem>>, vector<1x32xf32>
    %c6 = arith.constant 6 : index
    %c0_13 = arith.constant 0 : index
    %42 = vector.load %arg18[%c6, %c0_13] : memref<16x32xf32, #tpu.memory_space<vmem>>, vector<1x32xf32>
    tpu.vector_store %arg18[%c6, %c0_13], %41 {strides = array<i32>} : memref<16x32xf32, #tpu.memory_space<vmem>>, vector<1x32xf32>,
    %c7_i32 = arith.constant 7 : i32
    %43 = arith.addi %0, %c7_i32 : i32
    %44 = arith.index_cast %43 : i32 to index
    %45 = memref.load %arg1[%44] : memref<40xi32, #tpu.memory_space<smem>>
    %46 = arith.index_cast %45 : i32 to index
    %c0_14 = arith.constant 0 : index
    %47 = vector.load %arg2[%46, %c0_14] : memref<32x32xf32, #tpu.memory_space<vmem>>, vector<1x32xf32>
    %c7 = arith.constant 7 : index
    %c0_15 = arith.constant 0 : index
    %48 = vector.load %arg18[%c7, %c0_15] : memref<16x32xf32, #tpu.memory_space<vmem>>, vector<1x32xf32>
    tpu.vector_store %arg18[%c7, %c0_15], %47 {strides = array<i32>} : memref<16x32xf32, #tpu.memory_space<vmem>>, vector<1x32xf32>,
    %c8_i32_16 = arith.constant 8 : i32
    %49 = arith.addi %0, %c8_i32_16 : i32
    %50 = arith.index_cast %49 : i32 to index
    %51 = memref.load %arg1[%50] : memref<40xi32, #tpu.memory_space<smem>>
    %52 = arith.index_cast %51 : i32 to index
    %c0_17 = arith.constant 0 : index
    %53 = vector.load %arg2[%52, %c0_17] : memref<32x32xf32, #tpu.memory_space<vmem>>, vector<1x32xf32>
    %c8 = arith.constant 8 : index
    %c0_18 = arith.constant 0 : index
    %54 = vector.load %arg18[%c8, %c0_18] : memref<16x32xf32, #tpu.memory_space<vmem>>, vector<1x32xf32>
    tpu.vector_store %arg18[%c8, %c0_18], %53 {strides = array<i32>} : memref<16x32xf32, #tpu.memory_space<vmem>>, vector<1x32xf32>,
    %c9_i32 = arith.constant 9 : i32
    %55 = arith.addi %0, %c9_i32 : i32
    %56 = arith.index_cast %55 : i32 to index
    %57 = memref.load %arg1[%56] : memref<40xi32, #tpu.memory_space<smem>>
    %58 = arith.index_cast %57 : i32 to index
    %c0_19 = arith.constant 0 : index
    %59 = vector.load %arg2[%58, %c0_19] : memref<32x32xf32, #tpu.memory_space<vmem>>, vector<1x32xf32>
    %c9 = arith.constant 9 : index
    %c0_20 = arith.constant 0 : index
    %60 = vector.load %arg18[%c9, %c0_20] : memref<16x32xf32, #tpu.memory_space<vmem>>, vector<1x32xf32>
    tpu.vector_store %arg18[%c9, %c0_20], %59 {strides = array<i32>} : memref<16x32xf32, #tpu.memory_space<vmem>>, vector<1x32xf32>,
    %c10_i32 = arith.constant 10 : i32
    %61 = arith.addi %0, %c10_i32 : i32
    %62 = arith.index_cast %61 : i32 to index
    %63 = memref.load %arg1[%62] : memref<40xi32, #tpu.memory_space<smem>>
    %64 = arith.index_cast %63 : i32 to index
    %c0_21 = arith.constant 0 : index
    %65 = vector.load %arg2[%64, %c0_21] : memref<32x32xf32, #tpu.memory_space<vmem>>, vector<1x32xf32>
    %c10 = arith.constant 10 : index
    %c0_22 = arith.constant 0 : index
    %66 = vector.load %arg18[%c10, %c0_22] : memref<16x32xf32, #tpu.memory_space<vmem>>, vector<1x32xf32>
    tpu.vector_store %arg18[%c10, %c0_22], %65 {strides = array<i32>} : memref<16x32xf32, #tpu.memory_space<vmem>>, vector<1x32xf32>,
    %c11_i32 = arith.constant 11 : i32
    %67 = arith.addi %0, %c11_i32 : i32
    %68 = arith.index_cast %67 : i32 to index
    %69 = memref.load %arg1[%68] : memref<40xi32, #tpu.memory_space<smem>>
    %70 = arith.index_cast %69 : i32 to index
    %c0_23 = arith.constant 0 : index
    %71 = vector.load %arg2[%70, %c0_23] : memref<32x32xf32, #tpu.memory_space<vmem>>, vector<1x32xf32>
    %c11 = arith.constant 11 : index
    %c0_24 = arith.constant 0 : index
    %72 = vector.load %arg18[%c11, %c0_24] : memref<16x32xf32, #tpu.memory_space<vmem>>, vector<1x32xf32>
    tpu.vector_store %arg18[%c11, %c0_24], %71 {strides = array<i32>} : memref<16x32xf32, #tpu.memory_space<vmem>>, vector<1x32xf32>,
    %c12_i32 = arith.constant 12 : i32
    %73 = arith.addi %0, %c12_i32 : i32
    %74 = arith.index_cast %73 : i32 to index
    %75 = memref.load %arg1[%74] : memref<40xi32, #tpu.memory_space<smem>>
    %76 = arith.index_cast %75 : i32 to index
    %c0_25 = arith.constant 0 : index
    %77 = vector.load %arg2[%76, %c0_25] : memref<32x32xf32, #tpu.memory_space<vmem>>, vector<1x32xf32>
    %c12 = arith.constant 12 : index
    %c0_26 = arith.constant 0 : index
    %78 = vector.load %arg18[%c12, %c0_26] : memref<16x32xf32, #tpu.memory_space<vmem>>, vector<1x32xf32>
    tpu.vector_store %arg18[%c12, %c0_26], %77 {strides = array<i32>} : memref<16x32xf32, #tpu.memory_space<vmem>>, vector<1x32xf32>,
    %c13_i32 = arith.constant 13 : i32
    %79 = arith.addi %0, %c13_i32 : i32
    %80 = arith.index_cast %79 : i32 to index
    %81 = memref.load %arg1[%80] : memref<40xi32, #tpu.memory_space<smem>>
    %82 = arith.index_cast %81 : i32 to index
    %c0_27 = arith.constant 0 : index
    %83 = vector.load %arg2[%82, %c0_27] : memref<32x32xf32, #tpu.memory_space<vmem>>, vector<1x32xf32>
    %c13 = arith.constant 13 : index
    %c0_28 = arith.constant 0 : index
    %84 = vector.load %arg18[%c13, %c0_28] : memref<16x32xf32, #tpu.memory_space<vmem>>, vector<1x32xf32>
    tpu.vector_store %arg18[%c13, %c0_28], %83 {strides = array<i32>} : memref<16x32xf32, #tpu.memory_space<vmem>>, vector<1x32xf32>,
    %c14_i32 = arith.constant 14 : i32
    %85 = arith.addi %0, %c14_i32 : i32
    %86 = arith.index_cast %85 : i32 to index
    %87 = memref.load %arg1[%86] : memref<40xi32, #tpu.memory_space<smem>>
    %88 = arith.index_cast %87 : i32 to index
    %c0_29 = arith.constant 0 : index
    %89 = vector.load %arg2[%88, %c0_29] : memref<32x32xf32, #tpu.memory_space<vmem>>, vector<1x32xf32>
    %c14 = arith.constant 14 : index
    %c0_30 = arith.constant 0 : index
    %90 = vector.load %arg18[%c14, %c0_30] : memref<16x32xf32, #tpu.memory_space<vmem>>, vector<1x32xf32>
    tpu.vector_store %arg18[%c14, %c0_30], %89 {strides = array<i32>} : memref<16x32xf32, #tpu.memory_space<vmem>>, vector<1x32xf32>,
    %c15_i32 = arith.constant 15 : i32
    %91 = arith.addi %0, %c15_i32 : i32
    %92 = arith.index_cast %91 : i32 to index
    %93 = memref.load %arg1[%92] : memref<40xi32, #tpu.memory_space<smem>>
    %94 = arith.index_cast %93 : i32 to index
    %c0_31 = arith.constant 0 : index
    %95 = vector.load %arg2[%94, %c0_31] : memref<32x32xf32, #tpu.memory_space<vmem>>, vector<1x32xf32>
    %c15 = arith.constant 15 : index
    %c0_32 = arith.constant 0 : index
    %96 = vector.load %arg18[%c15, %c0_32] : memref<16x32xf32, #tpu.memory_space<vmem>>, vector<1x32xf32>
    tpu.vector_store %arg18[%c15, %c0_32], %95 {strides = array<i32>} : memref<16x32xf32, #tpu.memory_space<vmem>>, vector<1x32xf32>,
    %c0_33 = arith.constant 0 : index
    %c0_34 = arith.constant 0 : index
    %97 = vector.load %arg18[%c0_33, %c0_34] : memref<16x32xf32, #tpu.memory_space<vmem>>, vector<16x32xf32>
    %c0_35 = arith.constant 0 : index
    %c0_36 = arith.constant 0 : index
    %98 = vector.load %arg3[%c0_35, %c0_36] : memref<32x128xf32, #tpu.memory_space<vmem>>, vector<32x128xf32>
    %cst = arith.constant dense<0.000000e+00> : vector<16x128xf32>
    %99 = tpu.matmul %97, %98, %cst {dimension_numbers = #tpu.dot_dimension_numbers<[1], [0], [0], [1], [0, 0, 1, 1], [], []>} : vector<16x32xf32>, vector<32x128xf32>, vector<16x128xf32> -> vector<16x128xf32>
    %c0_37 = arith.constant 0 : index
    %c0_38 = arith.constant 0 : index
    %100 = vector.load %arg5[%c0_37, %c0_38] : memref<1x128xf32, #tpu.memory_space<vmem>>, vector<1x128xf32>
    %101 = vector.broadcast %100 : vector<1x128xf32> to vector<16x128xf32>
    %102 = arith.addf %99, %101 : vector<16x128xf32>
    %c0_39 = arith.constant 0 : index
    %c0_40 = arith.constant 0 : index
    %103 = vector.load %arg6[%c0_39, %c0_40] : memref<32x128xf32, #tpu.memory_space<vmem>>, vector<32x128xf32>
    %cst_41 = arith.constant dense<0.000000e+00> : vector<16x128xf32>
    %104 = tpu.matmul %97, %103, %cst_41 {dimension_numbers = #tpu.dot_dimension_numbers<[1], [0], [0], [1], [0, 0, 1, 1], [], []>} : vector<16x32xf32>, vector<32x128xf32>, vector<16x128xf32> -> vector<16x128xf32>
    %c0_42 = arith.constant 0 : index
    %c0_43 = arith.constant 0 : index
    %105 = vector.load %arg8[%c0_42, %c0_43] : memref<1x128xf32, #tpu.memory_space<vmem>>, vector<1x128xf32>
    %106 = vector.broadcast %105 : vector<1x128xf32> to vector<16x128xf32>
    %107 = arith.addf %104, %106 : vector<16x128xf32>
    %c0_44 = arith.constant 0 : index
    %c0_45 = arith.constant 0 : index
    %108 = vector.load %arg4[%c0_44, %c0_45] : memref<32x128xf32, #tpu.memory_space<vmem>>, vector<32x128xf32>
    %cst_46 = arith.constant 0.000000e+00 : f32
    %109 = vector.broadcast %cst_46 : f32 to vector<8x32xf32>
    %cst_47 = arith.constant 0.000000e+00 : f32
    %110 = vector.broadcast %cst_47 : f32 to vector<8x32xf32>
    %111 = vector.extract_strided_slice %102 {offsets = [0, 0], sizes = [8, 128], strides = [1, 1]} : vector<16x128xf32> to vector<8x128xf32>
    %cst_48 = arith.constant dense<0.000000e+00> : vector<8x128xf32>
    %112 = tpu.matmul %109, %108, %cst_48 {dimension_numbers = #tpu.dot_dimension_numbers<[1], [0], [0], [1], [0, 0, 1, 1], [], []>} : vector<8x32xf32>, vector<32x128xf32>, vector<8x128xf32> -> vector<8x128xf32>
    %113 = arith.addf %111, %112 : vector<8x128xf32>
    %114 = vector.extract_strided_slice %113 {offsets = [0, 0], sizes = [8, 32], strides = [1, 1]} : vector<8x128xf32> to vector<8x32xf32>
    %115 = arith.negf %114 : vector<8x32xf32>
    %116 = math.exp %115 : vector<8x32xf32>
    %cst_49 = arith.constant 1.000000e+00 : f32
    %117 = vector.broadcast %cst_49 : f32 to vector<8x32xf32>
    %118 = arith.addf %117, %116 : vector<8x32xf32>
    %119 = arith.divf %117, %118 : vector<8x32xf32>
    %120 = vector.extract_strided_slice %113 {offsets = [0, 32], sizes = [8, 32], strides = [1, 1]} : vector<8x128xf32> to vector<8x32xf32>
    %121 = arith.negf %120 : vector<8x32xf32>
    %122 = math.exp %121 : vector<8x32xf32>
    %cst_50 = arith.constant 1.000000e+00 : f32
    %123 = vector.broadcast %cst_50 : f32 to vector<8x32xf32>
    %124 = arith.addf %123, %122 : vector<8x32xf32>
    %125 = arith.divf %123, %124 : vector<8x32xf32>
    %126 = vector.extract_strided_slice %113 {offsets = [0, 64], sizes = [8, 32], strides = [1, 1]} : vector<8x128xf32> to vector<8x32xf32>
    %127 = math.tanh %126 : vector<8x32xf32>
    %128 = vector.extract_strided_slice %113 {offsets = [0, 96], sizes = [8, 32], strides = [1, 1]} : vector<8x128xf32> to vector<8x32xf32>
    %129 = arith.negf %128 : vector<8x32xf32>
    %130 = math.exp %129 : vector<8x32xf32>
    %cst_51 = arith.constant 1.000000e+00 : f32
    %131 = vector.broadcast %cst_51 : f32 to vector<8x32xf32>
    %132 = arith.addf %131, %130 : vector<8x32xf32>
    %133 = arith.divf %131, %132 : vector<8x32xf32>
    %134 = arith.mulf %125, %110 : vector<8x32xf32>
    %135 = arith.mulf %119, %127 : vector<8x32xf32>
    %136 = arith.addf %134, %135 : vector<8x32xf32>
    %137 = math.tanh %136 : vector<8x32xf32>
    %138 = arith.mulf %133, %137 : vector<8x32xf32>
    %c0_52 = arith.constant 0 : index
    %c0_53 = arith.constant 0 : index
    %139 = vector.load %arg19[%c0_52, %c0_53] : memref<64x32xf32, #tpu.memory_space<vmem>>, vector<8x32xf32>
    tpu.vector_store %arg19[%c0_52, %c0_53], %138 {strides = array<i32>} : memref<64x32xf32, #tpu.memory_space<vmem>>, vector<8x32xf32>,
    %140 = vector.extract_strided_slice %102 {offsets = [1, 0], sizes = [8, 128], strides = [1, 1]} : vector<16x128xf32> to vector<8x128xf32>
    %cst_54 = arith.constant dense<0.000000e+00> : vector<8x128xf32>
    %141 = tpu.matmul %138, %108, %cst_54 {dimension_numbers = #tpu.dot_dimension_numbers<[1], [0], [0], [1], [0, 0, 1, 1], [], []>} : vector<8x32xf32>, vector<32x128xf32>, vector<8x128xf32> -> vector<8x128xf32>
    %142 = arith.addf %140, %141 : vector<8x128xf32>
    %143 = vector.extract_strided_slice %142 {offsets = [0, 0], sizes = [8, 32], strides = [1, 1]} : vector<8x128xf32> to vector<8x32xf32>
    %144 = arith.negf %143 : vector<8x32xf32>
    %145 = math.exp %144 : vector<8x32xf32>
    %cst_55 = arith.constant 1.000000e+00 : f32
    %146 = vector.broadcast %cst_55 : f32 to vector<8x32xf32>
    %147 = arith.addf %146, %145 : vector<8x32xf32>
    %148 = arith.divf %146, %147 : vector<8x32xf32>
    %149 = vector.extract_strided_slice %142 {offsets = [0, 32], sizes = [8, 32], strides = [1, 1]} : vector<8x128xf32> to vector<8x32xf32>
    %150 = arith.negf %149 : vector<8x32xf32>
    %151 = math.exp %150 : vector<8x32xf32>
    %cst_56 = arith.constant 1.000000e+00 : f32
    %152 = vector.broadcast %cst_56 : f32 to vector<8x32xf32>
    %153 = arith.addf %152, %151 : vector<8x32xf32>
    %154 = arith.divf %152, %153 : vector<8x32xf32>
    %155 = vector.extract_strided_slice %142 {offsets = [0, 64], sizes = [8, 32], strides = [1, 1]} : vector<8x128xf32> to vector<8x32xf32>
    %156 = math.tanh %155 : vector<8x32xf32>
    %157 = vector.extract_strided_slice %142 {offsets = [0, 96], sizes = [8, 32], strides = [1, 1]} : vector<8x128xf32> to vector<8x32xf32>
    %158 = arith.negf %157 : vector<8x32xf32>
    %159 = math.exp %158 : vector<8x32xf32>
    %cst_57 = arith.constant 1.000000e+00 : f32
    %160 = vector.broadcast %cst_57 : f32 to vector<8x32xf32>
    %161 = arith.addf %160, %159 : vector<8x32xf32>
    %162 = arith.divf %160, %161 : vector<8x32xf32>
    %163 = arith.mulf %154, %136 : vector<8x32xf32>
    %164 = arith.mulf %148, %156 : vector<8x32xf32>
    %165 = arith.addf %163, %164 : vector<8x32xf32>
    %166 = math.tanh %165 : vector<8x32xf32>
    %167 = arith.mulf %162, %166 : vector<8x32xf32>
    %c8_58 = arith.constant 8 : index
    %c0_59 = arith.constant 0 : index
    %168 = vector.load %arg19[%c8_58, %c0_59] : memref<64x32xf32, #tpu.memory_space<vmem>>, vector<8x32xf32>
    tpu.vector_store %arg19[%c8_58, %c0_59], %167 {strides = array<i32>} : memref<64x32xf32, #tpu.memory_space<vmem>>, vector<8x32xf32>,
    %169 = vector.extract_strided_slice %102 {offsets = [2, 0], sizes = [8, 128], strides = [1, 1]} : vector<16x128xf32> to vector<8x128xf32>
    %cst_60 = arith.constant dense<0.000000e+00> : vector<8x128xf32>
    %170 = tpu.matmul %167, %108, %cst_60 {dimension_numbers = #tpu.dot_dimension_numbers<[1], [0], [0], [1], [0, 0, 1, 1], [], []>} : vector<8x32xf32>, vector<32x128xf32>, vector<8x128xf32> -> vector<8x128xf32>
    %171 = arith.addf %169, %170 : vector<8x128xf32>
    %172 = vector.extract_strided_slice %171 {offsets = [0, 0], sizes = [8, 32], strides = [1, 1]} : vector<8x128xf32> to vector<8x32xf32>
    %173 = arith.negf %172 : vector<8x32xf32>
    %174 = math.exp %173 : vector<8x32xf32>
    %cst_61 = arith.constant 1.000000e+00 : f32
    %175 = vector.broadcast %cst_61 : f32 to vector<8x32xf32>
    %176 = arith.addf %175, %174 : vector<8x32xf32>
    %177 = arith.divf %175, %176 : vector<8x32xf32>
    %178 = vector.extract_strided_slice %171 {offsets = [0, 32], sizes = [8, 32], strides = [1, 1]} : vector<8x128xf32> to vector<8x32xf32>
    %179 = arith.negf %178 : vector<8x32xf32>
    %180 = math.exp %179 : vector<8x32xf32>
    %cst_62 = arith.constant 1.000000e+00 : f32
    %181 = vector.broadcast %cst_62 : f32 to vector<8x32xf32>
    %182 = arith.addf %181, %180 : vector<8x32xf32>
    %183 = arith.divf %181, %182 : vector<8x32xf32>
    %184 = vector.extract_strided_slice %171 {offsets = [0, 64], sizes = [8, 32], strides = [1, 1]} : vector<8x128xf32> to vector<8x32xf32>
    %185 = math.tanh %184 : vector<8x32xf32>
    %186 = vector.extract_strided_slice %171 {offsets = [0, 96], sizes = [8, 32], strides = [1, 1]} : vector<8x128xf32> to vector<8x32xf32>
    %187 = arith.negf %186 : vector<8x32xf32>
    %188 = math.exp %187 : vector<8x32xf32>
    %cst_63 = arith.constant 1.000000e+00 : f32
    %189 = vector.broadcast %cst_63 : f32 to vector<8x32xf32>
    %190 = arith.addf %189, %188 : vector<8x32xf32>
    %191 = arith.divf %189, %190 : vector<8x32xf32>
    %192 = arith.mulf %183, %165 : vector<8x32xf32>
    %193 = arith.mulf %177, %185 : vector<8x32xf32>
    %194 = arith.addf %192, %193 : vector<8x32xf32>
    %195 = math.tanh %194 : vector<8x32xf32>
    %196 = arith.mulf %191, %195 : vector<8x32xf32>
    %c16 = arith.constant 16 : index
    %c0_64 = arith.constant 0 : index
    %197 = vector.load %arg19[%c16, %c0_64] : memref<64x32xf32, #tpu.memory_space<vmem>>, vector<8x32xf32>
    tpu.vector_store %arg19[%c16, %c0_64], %196 {strides = array<i32>} : memref<64x32xf32, #tpu.memory_space<vmem>>, vector<8x32xf32>,
    %198 = vector.extract_strided_slice %102 {offsets = [3, 0], sizes = [8, 128], strides = [1, 1]} : vector<16x128xf32> to vector<8x128xf32>
    %cst_65 = arith.constant dense<0.000000e+00> : vector<8x128xf32>
    %199 = tpu.matmul %196, %108, %cst_65 {dimension_numbers = #tpu.dot_dimension_numbers<[1], [0], [0], [1], [0, 0, 1, 1], [], []>} : vector<8x32xf32>, vector<32x128xf32>, vector<8x128xf32> -> vector<8x128xf32>
    %200 = arith.addf %198, %199 : vector<8x128xf32>
    %201 = vector.extract_strided_slice %200 {offsets = [0, 0], sizes = [8, 32], strides = [1, 1]} : vector<8x128xf32> to vector<8x32xf32>
    %202 = arith.negf %201 : vector<8x32xf32>
    %203 = math.exp %202 : vector<8x32xf32>
    %cst_66 = arith.constant 1.000000e+00 : f32
    %204 = vector.broadcast %cst_66 : f32 to vector<8x32xf32>
    %205 = arith.addf %204, %203 : vector<8x32xf32>
    %206 = arith.divf %204, %205 : vector<8x32xf32>
    %207 = vector.extract_strided_slice %200 {offsets = [0, 32], sizes = [8, 32], strides = [1, 1]} : vector<8x128xf32> to vector<8x32xf32>
    %208 = arith.negf %207 : vector<8x32xf32>
    %209 = math.exp %208 : vector<8x32xf32>
    %cst_67 = arith.constant 1.000000e+00 : f32
    %210 = vector.broadcast %cst_67 : f32 to vector<8x32xf32>
    %211 = arith.addf %210, %209 : vector<8x32xf32>
    %212 = arith.divf %210, %211 : vector<8x32xf32>
    %213 = vector.extract_strided_slice %200 {offsets = [0, 64], sizes = [8, 32], strides = [1, 1]} : vector<8x128xf32> to vector<8x32xf32>
    %214 = math.tanh %213 : vector<8x32xf32>
    %215 = vector.extract_strided_slice %200 {offsets = [0, 96], sizes = [8, 32], strides = [1, 1]} : vector<8x128xf32> to vector<8x32xf32>
    %216 = arith.negf %215 : vector<8x32xf32>
    %217 = math.exp %216 : vector<8x32xf32>
    %cst_68 = arith.constant 1.000000e+00 : f32
    %218 = vector.broadcast %cst_68 : f32 to vector<8x32xf32>
    %219 = arith.addf %218, %217 : vector<8x32xf32>
    %220 = arith.divf %218, %219 : vector<8x32xf32>
    %221 = arith.mulf %212, %194 : vector<8x32xf32>
    %222 = arith.mulf %206, %214 : vector<8x32xf32>
    %223 = arith.addf %221, %222 : vector<8x32xf32>
    %224 = math.tanh %223 : vector<8x32xf32>
    %225 = arith.mulf %220, %224 : vector<8x32xf32>
    %c24 = arith.constant 24 : index
    %c0_69 = arith.constant 0 : index
    %226 = vector.load %arg19[%c24, %c0_69] : memref<64x32xf32, #tpu.memory_space<vmem>>, vector<8x32xf32>
    tpu.vector_store %arg19[%c24, %c0_69], %225 {strides = array<i32>} : memref<64x32xf32, #tpu.memory_space<vmem>>, vector<8x32xf32>,
    %227 = vector.extract_strided_slice %102 {offsets = [4, 0], sizes = [8, 128], strides = [1, 1]} : vector<16x128xf32> to vector<8x128xf32>
    %cst_70 = arith.constant dense<0.000000e+00> : vector<8x128xf32>
    %228 = tpu.matmul %225, %108, %cst_70 {dimension_numbers = #tpu.dot_dimension_numbers<[1], [0], [0], [1], [0, 0, 1, 1], [], []>} : vector<8x32xf32>, vector<32x128xf32>, vector<8x128xf32> -> vector<8x128xf32>
    %229 = arith.addf %227, %228 : vector<8x128xf32>
    %230 = vector.extract_strided_slice %229 {offsets = [0, 0], sizes = [8, 32], strides = [1, 1]} : vector<8x128xf32> to vector<8x32xf32>
    %231 = arith.negf %230 : vector<8x32xf32>
    %232 = math.exp %231 : vector<8x32xf32>
    %cst_71 = arith.constant 1.000000e+00 : f32
    %233 = vector.broadcast %cst_71 : f32 to vector<8x32xf32>
    %234 = arith.addf %233, %232 : vector<8x32xf32>
    %235 = arith.divf %233, %234 : vector<8x32xf32>
    %236 = vector.extract_strided_slice %229 {offsets = [0, 32], sizes = [8, 32], strides = [1, 1]} : vector<8x128xf32> to vector<8x32xf32>
    %237 = arith.negf %236 : vector<8x32xf32>
    %238 = math.exp %237 : vector<8x32xf32>
    %cst_72 = arith.constant 1.000000e+00 : f32
    %239 = vector.broadcast %cst_72 : f32 to vector<8x32xf32>
    %240 = arith.addf %239, %238 : vector<8x32xf32>
    %241 = arith.divf %239, %240 : vector<8x32xf32>
    %242 = vector.extract_strided_slice %229 {offsets = [0, 64], sizes = [8, 32], strides = [1, 1]} : vector<8x128xf32> to vector<8x32xf32>
    %243 = math.tanh %242 : vector<8x32xf32>
    %244 = vector.extract_strided_slice %229 {offsets = [0, 96], sizes = [8, 32], strides = [1, 1]} : vector<8x128xf32> to vector<8x32xf32>
    %245 = arith.negf %244 : vector<8x32xf32>
    %246 = math.exp %245 : vector<8x32xf32>
    %cst_73 = arith.constant 1.000000e+00 : f32
    %247 = vector.broadcast %cst_73 : f32 to vector<8x32xf32>
    %248 = arith.addf %247, %246 : vector<8x32xf32>
    %249 = arith.divf %247, %248 : vector<8x32xf32>
    %250 = arith.mulf %241, %223 : vector<8x32xf32>
    %251 = arith.mulf %235, %243 : vector<8x32xf32>
    %252 = arith.addf %250, %251 : vector<8x32xf32>
    %253 = math.tanh %252 : vector<8x32xf32>
    %254 = arith.mulf %249, %253 : vector<8x32xf32>
    %c32 = arith.constant 32 : index
    %c0_74 = arith.constant 0 : index
    %255 = vector.load %arg19[%c32, %c0_74] : memref<64x32xf32, #tpu.memory_space<vmem>>, vector<8x32xf32>
    tpu.vector_store %arg19[%c32, %c0_74], %254 {strides = array<i32>} : memref<64x32xf32, #tpu.memory_space<vmem>>, vector<8x32xf32>,
    %256 = vector.extract_strided_slice %102 {offsets = [5, 0], sizes = [8, 128], strides = [1, 1]} : vector<16x128xf32> to vector<8x128xf32>
    %cst_75 = arith.constant dense<0.000000e+00> : vector<8x128xf32>
    %257 = tpu.matmul %254, %108, %cst_75 {dimension_numbers = #tpu.dot_dimension_numbers<[1], [0], [0], [1], [0, 0, 1, 1], [], []>} : vector<8x32xf32>, vector<32x128xf32>, vector<8x128xf32> -> vector<8x128xf32>
    %258 = arith.addf %256, %257 : vector<8x128xf32>
    %259 = vector.extract_strided_slice %258 {offsets = [0, 0], sizes = [8, 32], strides = [1, 1]} : vector<8x128xf32> to vector<8x32xf32>
    %260 = arith.negf %259 : vector<8x32xf32>
    %261 = math.exp %260 : vector<8x32xf32>
    %cst_76 = arith.constant 1.000000e+00 : f32
    %262 = vector.broadcast %cst_76 : f32 to vector<8x32xf32>
    %263 = arith.addf %262, %261 : vector<8x32xf32>
    %264 = arith.divf %262, %263 : vector<8x32xf32>
    %265 = vector.extract_strided_slice %258 {offsets = [0, 32], sizes = [8, 32], strides = [1, 1]} : vector<8x128xf32> to vector<8x32xf32>
    %266 = arith.negf %265 : vector<8x32xf32>
    %267 = math.exp %266 : vector<8x32xf32>
    %cst_77 = arith.constant 1.000000e+00 : f32
    %268 = vector.broadcast %cst_77 : f32 to vector<8x32xf32>
    %269 = arith.addf %268, %267 : vector<8x32xf32>
    %270 = arith.divf %268, %269 : vector<8x32xf32>
    %271 = vector.extract_strided_slice %258 {offsets = [0, 64], sizes = [8, 32], strides = [1, 1]} : vector<8x128xf32> to vector<8x32xf32>
    %272 = math.tanh %271 : vector<8x32xf32>
    %273 = vector.extract_strided_slice %258 {offsets = [0, 96], sizes = [8, 32], strides = [1, 1]} : vector<8x128xf32> to vector<8x32xf32>
    %274 = arith.negf %273 : vector<8x32xf32>
    %275 = math.exp %274 : vector<8x32xf32>
    %cst_78 = arith.constant 1.000000e+00 : f32
    %276 = vector.broadcast %cst_78 : f32 to vector<8x32xf32>
    %277 = arith.addf %276, %275 : vector<8x32xf32>
    %278 = arith.divf %276, %277 : vector<8x32xf32>
    %279 = arith.mulf %270, %252 : vector<8x32xf32>
    %280 = arith.mulf %264, %272 : vector<8x32xf32>
    %281 = arith.addf %279, %280 : vector<8x32xf32>
    %282 = math.tanh %281 : vector<8x32xf32>
    %283 = arith.mulf %278, %282 : vector<8x32xf32>
    %c40 = arith.constant 40 : index
    %c0_79 = arith.constant 0 : index
    %284 = vector.load %arg19[%c40, %c0_79] : memref<64x32xf32, #tpu.memory_space<vmem>>, vector<8x32xf32>
    tpu.vector_store %arg19[%c40, %c0_79], %283 {strides = array<i32>} : memref<64x32xf32, #tpu.memory_space<vmem>>, vector<8x32xf32>,
    %285 = vector.extract_strided_slice %102 {offsets = [6, 0], sizes = [8, 128], strides = [1, 1]} : vector<16x128xf32> to vector<8x128xf32>
    %cst_80 = arith.constant dense<0.000000e+00> : vector<8x128xf32>
    %286 = tpu.matmul %283, %108, %cst_80 {dimension_numbers = #tpu.dot_dimension_numbers<[1], [0], [0], [1], [0, 0, 1, 1], [], []>} : vector<8x32xf32>, vector<32x128xf32>, vector<8x128xf32> -> vector<8x128xf32>
    %287 = arith.addf %285, %286 : vector<8x128xf32>
    %288 = vector.extract_strided_slice %287 {offsets = [0, 0], sizes = [8, 32], strides = [1, 1]} : vector<8x128xf32> to vector<8x32xf32>
    %289 = arith.negf %288 : vector<8x32xf32>
    %290 = math.exp %289 : vector<8x32xf32>
    %cst_81 = arith.constant 1.000000e+00 : f32
    %291 = vector.broadcast %cst_81 : f32 to vector<8x32xf32>
    %292 = arith.addf %291, %290 : vector<8x32xf32>
    %293 = arith.divf %291, %292 : vector<8x32xf32>
    %294 = vector.extract_strided_slice %287 {offsets = [0, 32], sizes = [8, 32], strides = [1, 1]} : vector<8x128xf32> to vector<8x32xf32>
    %295 = arith.negf %294 : vector<8x32xf32>
    %296 = math.exp %295 : vector<8x32xf32>
    %cst_82 = arith.constant 1.000000e+00 : f32
    %297 = vector.broadcast %cst_82 : f32 to vector<8x32xf32>
    %298 = arith.addf %297, %296 : vector<8x32xf32>
    %299 = arith.divf %297, %298 : vector<8x32xf32>
    %300 = vector.extract_strided_slice %287 {offsets = [0, 64], sizes = [8, 32], strides = [1, 1]} : vector<8x128xf32> to vector<8x32xf32>
    %301 = math.tanh %300 : vector<8x32xf32>
    %302 = vector.extract_strided_slice %287 {offsets = [0, 96], sizes = [8, 32], strides = [1, 1]} : vector<8x128xf32> to vector<8x32xf32>
    %303 = arith.negf %302 : vector<8x32xf32>
    %304 = math.exp %303 : vector<8x32xf32>
    %cst_83 = arith.constant 1.000000e+00 : f32
    %305 = vector.broadcast %cst_83 : f32 to vector<8x32xf32>
    %306 = arith.addf %305, %304 : vector<8x32xf32>
    %307 = arith.divf %305, %306 : vector<8x32xf32>
    %308 = arith.mulf %299, %281 : vector<8x32xf32>
    %309 = arith.mulf %293, %301 : vector<8x32xf32>
    %310 = arith.addf %308, %309 : vector<8x32xf32>
    %311 = math.tanh %310 : vector<8x32xf32>
    %312 = arith.mulf %307, %311 : vector<8x32xf32>
    %c48 = arith.constant 48 : index
    %c0_84 = arith.constant 0 : index
    %313 = vector.load %arg19[%c48, %c0_84] : memref<64x32xf32, #tpu.memory_space<vmem>>, vector<8x32xf32>
    tpu.vector_store %arg19[%c48, %c0_84], %312 {strides = array<i32>} : memref<64x32xf32, #tpu.memory_space<vmem>>, vector<8x32xf32>,
    %314 = vector.extract_strided_slice %102 {offsets = [7, 0], sizes = [8, 128], strides = [1, 1]} : vector<16x128xf32> to vector<8x128xf32>
    %cst_85 = arith.constant dense<0.000000e+00> : vector<8x128xf32>
    %315 = tpu.matmul %312, %108, %cst_85 {dimension_numbers = #tpu.dot_dimension_numbers<[1], [0], [0], [1], [0, 0, 1, 1], [], []>} : vector<8x32xf32>, vector<32x128xf32>, vector<8x128xf32> -> vector<8x128xf32>
    %316 = arith.addf %314, %315 : vector<8x128xf32>
    %317 = vector.extract_strided_slice %316 {offsets = [0, 0], sizes = [8, 32], strides = [1, 1]} : vector<8x128xf32> to vector<8x32xf32>
    %318 = arith.negf %317 : vector<8x32xf32>
    %319 = math.exp %318 : vector<8x32xf32>
    %cst_86 = arith.constant 1.000000e+00 : f32
    %320 = vector.broadcast %cst_86 : f32 to vector<8x32xf32>
    %321 = arith.addf %320, %319 : vector<8x32xf32>
    %322 = arith.divf %320, %321 : vector<8x32xf32>
    %323 = vector.extract_strided_slice %316 {offsets = [0, 32], sizes = [8, 32], strides = [1, 1]} : vector<8x128xf32> to vector<8x32xf32>
    %324 = arith.negf %323 : vector<8x32xf32>
    %325 = math.exp %324 : vector<8x32xf32>
    %cst_87 = arith.constant 1.000000e+00 : f32
    %326 = vector.broadcast %cst_87 : f32 to vector<8x32xf32>
    %327 = arith.addf %326, %325 : vector<8x32xf32>
    %328 = arith.divf %326, %327 : vector<8x32xf32>
    %329 = vector.extract_strided_slice %316 {offsets = [0, 64], sizes = [8, 32], strides = [1, 1]} : vector<8x128xf32> to vector<8x32xf32>
    %330 = math.tanh %329 : vector<8x32xf32>
    %331 = vector.extract_strided_slice %316 {offsets = [0, 96], sizes = [8, 32], strides = [1, 1]} : vector<8x128xf32> to vector<8x32xf32>
    %332 = arith.negf %331 : vector<8x32xf32>
    %333 = math.exp %332 : vector<8x32xf32>
    %cst_88 = arith.constant 1.000000e+00 : f32
    %334 = vector.broadcast %cst_88 : f32 to vector<8x32xf32>
    %335 = arith.addf %334, %333 : vector<8x32xf32>
    %336 = arith.divf %334, %335 : vector<8x32xf32>
    %337 = arith.mulf %328, %310 : vector<8x32xf32>
    %338 = arith.mulf %322, %330 : vector<8x32xf32>
    %339 = arith.addf %337, %338 : vector<8x32xf32>
    %340 = math.tanh %339 : vector<8x32xf32>
    %341 = arith.mulf %336, %340 : vector<8x32xf32>
    %c56 = arith.constant 56 : index
    %c0_89 = arith.constant 0 : index
    %342 = vector.load %arg19[%c56, %c0_89] : memref<64x32xf32, #tpu.memory_space<vmem>>, vector<8x32xf32>
    tpu.vector_store %arg19[%c56, %c0_89], %341 {strides = array<i32>} : memref<64x32xf32, #tpu.memory_space<vmem>>, vector<8x32xf32>,
    %c0_90 = arith.constant 0 : index
    %c0_91 = arith.constant 0 : index
    %343 = vector.load %arg7[%c0_90, %c0_91] : memref<32x128xf32, #tpu.memory_space<vmem>>, vector<32x128xf32>
    %cst_92 = arith.constant 0.000000e+00 : f32
    %344 = vector.broadcast %cst_92 : f32 to vector<8x32xf32>
    %cst_93 = arith.constant 0.000000e+00 : f32
    %345 = vector.broadcast %cst_93 : f32 to vector<8x32xf32>
    %346 = vector.extract_strided_slice %107 {offsets = [7, 0], sizes = [8, 128], strides = [1, 1]} : vector<16x128xf32> to vector<8x128xf32>
    %cst_94 = arith.constant dense<0.000000e+00> : vector<8x128xf32>
    %347 = tpu.matmul %344, %343, %cst_94 {dimension_numbers = #tpu.dot_dimension_numbers<[1], [0], [0], [1], [0, 0, 1, 1], [], []>} : vector<8x32xf32>, vector<32x128xf32>, vector<8x128xf32> -> vector<8x128xf32>
    %348 = arith.addf %346, %347 : vector<8x128xf32>
    %349 = vector.extract_strided_slice %348 {offsets = [0, 0], sizes = [8, 32], strides = [1, 1]} : vector<8x128xf32> to vector<8x32xf32>
    %350 = arith.negf %349 : vector<8x32xf32>
    %351 = math.exp %350 : vector<8x32xf32>
    %cst_95 = arith.constant 1.000000e+00 : f32
    %352 = vector.broadcast %cst_95 : f32 to vector<8x32xf32>
    %353 = arith.addf %352, %351 : vector<8x32xf32>
    %354 = arith.divf %352, %353 : vector<8x32xf32>
    %355 = vector.extract_strided_slice %348 {offsets = [0, 32], sizes = [8, 32], strides = [1, 1]} : vector<8x128xf32> to vector<8x32xf32>
    %356 = arith.negf %355 : vector<8x32xf32>
    %357 = math.exp %356 : vector<8x32xf32>
    %cst_96 = arith.constant 1.000000e+00 : f32
    %358 = vector.broadcast %cst_96 : f32 to vector<8x32xf32>
    %359 = arith.addf %358, %357 : vector<8x32xf32>
    %360 = arith.divf %358, %359 : vector<8x32xf32>
    %361 = vector.extract_strided_slice %348 {offsets = [0, 64], sizes = [8, 32], strides = [1, 1]} : vector<8x128xf32> to vector<8x32xf32>
    %362 = math.tanh %361 : vector<8x32xf32>
    %363 = vector.extract_strided_slice %348 {offsets = [0, 96], sizes = [8, 32], strides = [1, 1]} : vector<8x128xf32> to vector<8x32xf32>
    %364 = arith.negf %363 : vector<8x32xf32>
    %365 = math.exp %364 : vector<8x32xf32>
    %cst_97 = arith.constant 1.000000e+00 : f32
    %366 = vector.broadcast %cst_97 : f32 to vector<8x32xf32>
    %367 = arith.addf %366, %365 : vector<8x32xf32>
    %368 = arith.divf %366, %367 : vector<8x32xf32>
    %369 = arith.mulf %360, %345 : vector<8x32xf32>
    %370 = arith.mulf %354, %362 : vector<8x32xf32>
    %371 = arith.addf %369, %370 : vector<8x32xf32>
    %372 = math.tanh %371 : vector<8x32xf32>
    %373 = arith.mulf %368, %372 : vector<8x32xf32>
    %c56_98 = arith.constant 56 : index
    %c0_99 = arith.constant 0 : index
    %374 = vector.load %arg20[%c56_98, %c0_99] : memref<64x32xf32, #tpu.memory_space<vmem>>, vector<8x32xf32>
    tpu.vector_store %arg20[%c56_98, %c0_99], %373 {strides = array<i32>} : memref<64x32xf32, #tpu.memory_space<vmem>>, vector<8x32xf32>,
    %375 = vector.extract_strided_slice %107 {offsets = [6, 0], sizes = [8, 128], strides = [1, 1]} : vector<16x128xf32> to vector<8x128xf32>
    %cst_100 = arith.constant dense<0.000000e+00> : vector<8x128xf32>
    %376 = tpu.matmul %373, %343, %cst_100 {dimension_numbers = #tpu.dot_dimension_numbers<[1], [0], [0], [1], [0, 0, 1, 1], [], []>} : vector<8x32xf32>, vector<32x128xf32>, vector<8x128xf32> -> vector<8x128xf32>
    %377 = arith.addf %375, %376 : vector<8x128xf32>
    %378 = vector.extract_strided_slice %377 {offsets = [0, 0], sizes = [8, 32], strides = [1, 1]} : vector<8x128xf32> to vector<8x32xf32>
    %379 = arith.negf %378 : vector<8x32xf32>
    %380 = math.exp %379 : vector<8x32xf32>
    %cst_101 = arith.constant 1.000000e+00 : f32
    %381 = vector.broadcast %cst_101 : f32 to vector<8x32xf32>
    %382 = arith.addf %381, %380 : vector<8x32xf32>
    %383 = arith.divf %381, %382 : vector<8x32xf32>
    %384 = vector.extract_strided_slice %377 {offsets = [0, 32], sizes = [8, 32], strides = [1, 1]} : vector<8x128xf32> to vector<8x32xf32>
    %385 = arith.negf %384 : vector<8x32xf32>
    %386 = math.exp %385 : vector<8x32xf32>
    %cst_102 = arith.constant 1.000000e+00 : f32
    %387 = vector.broadcast %cst_102 : f32 to vector<8x32xf32>
    %388 = arith.addf %387, %386 : vector<8x32xf32>
    %389 = arith.divf %387, %388 : vector<8x32xf32>
    %390 = vector.extract_strided_slice %377 {offsets = [0, 64], sizes = [8, 32], strides = [1, 1]} : vector<8x128xf32> to vector<8x32xf32>
    %391 = math.tanh %390 : vector<8x32xf32>
    %392 = vector.extract_strided_slice %377 {offsets = [0, 96], sizes = [8, 32], strides = [1, 1]} : vector<8x128xf32> to vector<8x32xf32>
    %393 = arith.negf %392 : vector<8x32xf32>
    %394 = math.exp %393 : vector<8x32xf32>
    %cst_103 = arith.constant 1.000000e+00 : f32
    %395 = vector.broadcast %cst_103 : f32 to vector<8x32xf32>
    %396 = arith.addf %395, %394 : vector<8x32xf32>
    %397 = arith.divf %395, %396 : vector<8x32xf32>
    %398 = arith.mulf %389, %371 : vector<8x32xf32>
    %399 = arith.mulf %383, %391 : vector<8x32xf32>
    %400 = arith.addf %398, %399 : vector<8x32xf32>
    %401 = math.tanh %400 : vector<8x32xf32>
    %402 = arith.mulf %397, %401 : vector<8x32xf32>
    %c48_104 = arith.constant 48 : index
    %c0_105 = arith.constant 0 : index
    %403 = vector.load %arg20[%c48_104, %c0_105] : memref<64x32xf32, #tpu.memory_space<vmem>>, vector<8x32xf32>
    tpu.vector_store %arg20[%c48_104, %c0_105], %402 {strides = array<i32>} : memref<64x32xf32, #tpu.memory_space<vmem>>, vector<8x32xf32>,
    %404 = vector.extract_strided_slice %107 {offsets = [5, 0], sizes = [8, 128], strides = [1, 1]} : vector<16x128xf32> to vector<8x128xf32>
    %cst_106 = arith.constant dense<0.000000e+00> : vector<8x128xf32>
    %405 = tpu.matmul %402, %343, %cst_106 {dimension_numbers = #tpu.dot_dimension_numbers<[1], [0], [0], [1], [0, 0, 1, 1], [], []>} : vector<8x32xf32>, vector<32x128xf32>, vector<8x128xf32> -> vector<8x128xf32>
    %406 = arith.addf %404, %405 : vector<8x128xf32>
    %407 = vector.extract_strided_slice %406 {offsets = [0, 0], sizes = [8, 32], strides = [1, 1]} : vector<8x128xf32> to vector<8x32xf32>
    %408 = arith.negf %407 : vector<8x32xf32>
    %409 = math.exp %408 : vector<8x32xf32>
    %cst_107 = arith.constant 1.000000e+00 : f32
    %410 = vector.broadcast %cst_107 : f32 to vector<8x32xf32>
    %411 = arith.addf %410, %409 : vector<8x32xf32>
    %412 = arith.divf %410, %411 : vector<8x32xf32>
    %413 = vector.extract_strided_slice %406 {offsets = [0, 32], sizes = [8, 32], strides = [1, 1]} : vector<8x128xf32> to vector<8x32xf32>
    %414 = arith.negf %413 : vector<8x32xf32>
    %415 = math.exp %414 : vector<8x32xf32>
    %cst_108 = arith.constant 1.000000e+00 : f32
    %416 = vector.broadcast %cst_108 : f32 to vector<8x32xf32>
    %417 = arith.addf %416, %415 : vector<8x32xf32>
    %418 = arith.divf %416, %417 : vector<8x32xf32>
    %419 = vector.extract_strided_slice %406 {offsets = [0, 64], sizes = [8, 32], strides = [1, 1]} : vector<8x128xf32> to vector<8x32xf32>
    %420 = math.tanh %419 : vector<8x32xf32>
    %421 = vector.extract_strided_slice %406 {offsets = [0, 96], sizes = [8, 32], strides = [1, 1]} : vector<8x128xf32> to vector<8x32xf32>
    %422 = arith.negf %421 : vector<8x32xf32>
    %423 = math.exp %422 : vector<8x32xf32>
    %cst_109 = arith.constant 1.000000e+00 : f32
    %424 = vector.broadcast %cst_109 : f32 to vector<8x32xf32>
    %425 = arith.addf %424, %423 : vector<8x32xf32>
    %426 = arith.divf %424, %425 : vector<8x32xf32>
    %427 = arith.mulf %418, %400 : vector<8x32xf32>
    %428 = arith.mulf %412, %420 : vector<8x32xf32>
    %429 = arith.addf %427, %428 : vector<8x32xf32>
    %430 = math.tanh %429 : vector<8x32xf32>
    %431 = arith.mulf %426, %430 : vector<8x32xf32>
    %c40_110 = arith.constant 40 : index
    %c0_111 = arith.constant 0 : index
    %432 = vector.load %arg20[%c40_110, %c0_111] : memref<64x32xf32, #tpu.memory_space<vmem>>, vector<8x32xf32>
    tpu.vector_store %arg20[%c40_110, %c0_111], %431 {strides = array<i32>} : memref<64x32xf32, #tpu.memory_space<vmem>>, vector<8x32xf32>,
    %433 = vector.extract_strided_slice %107 {offsets = [4, 0], sizes = [8, 128], strides = [1, 1]} : vector<16x128xf32> to vector<8x128xf32>
    %cst_112 = arith.constant dense<0.000000e+00> : vector<8x128xf32>
    %434 = tpu.matmul %431, %343, %cst_112 {dimension_numbers = #tpu.dot_dimension_numbers<[1], [0], [0], [1], [0, 0, 1, 1], [], []>} : vector<8x32xf32>, vector<32x128xf32>, vector<8x128xf32> -> vector<8x128xf32>
    %435 = arith.addf %433, %434 : vector<8x128xf32>
    %436 = vector.extract_strided_slice %435 {offsets = [0, 0], sizes = [8, 32], strides = [1, 1]} : vector<8x128xf32> to vector<8x32xf32>
    %437 = arith.negf %436 : vector<8x32xf32>
    %438 = math.exp %437 : vector<8x32xf32>
    %cst_113 = arith.constant 1.000000e+00 : f32
    %439 = vector.broadcast %cst_113 : f32 to vector<8x32xf32>
    %440 = arith.addf %439, %438 : vector<8x32xf32>
    %441 = arith.divf %439, %440 : vector<8x32xf32>
    %442 = vector.extract_strided_slice %435 {offsets = [0, 32], sizes = [8, 32], strides = [1, 1]} : vector<8x128xf32> to vector<8x32xf32>
    %443 = arith.negf %442 : vector<8x32xf32>
    %444 = math.exp %443 : vector<8x32xf32>
    %cst_114 = arith.constant 1.000000e+00 : f32
    %445 = vector.broadcast %cst_114 : f32 to vector<8x32xf32>
    %446 = arith.addf %445, %444 : vector<8x32xf32>
    %447 = arith.divf %445, %446 : vector<8x32xf32>
    %448 = vector.extract_strided_slice %435 {offsets = [0, 64], sizes = [8, 32], strides = [1, 1]} : vector<8x128xf32> to vector<8x32xf32>
    %449 = math.tanh %448 : vector<8x32xf32>
    %450 = vector.extract_strided_slice %435 {offsets = [0, 96], sizes = [8, 32], strides = [1, 1]} : vector<8x128xf32> to vector<8x32xf32>
    %451 = arith.negf %450 : vector<8x32xf32>
    %452 = math.exp %451 : vector<8x32xf32>
    %cst_115 = arith.constant 1.000000e+00 : f32
    %453 = vector.broadcast %cst_115 : f32 to vector<8x32xf32>
    %454 = arith.addf %453, %452 : vector<8x32xf32>
    %455 = arith.divf %453, %454 : vector<8x32xf32>
    %456 = arith.mulf %447, %429 : vector<8x32xf32>
    %457 = arith.mulf %441, %449 : vector<8x32xf32>
    %458 = arith.addf %456, %457 : vector<8x32xf32>
    %459 = math.tanh %458 : vector<8x32xf32>
    %460 = arith.mulf %455, %459 : vector<8x32xf32>
    %c32_116 = arith.constant 32 : index
    %c0_117 = arith.constant 0 : index
    %461 = vector.load %arg20[%c32_116, %c0_117] : memref<64x32xf32, #tpu.memory_space<vmem>>, vector<8x32xf32>
    tpu.vector_store %arg20[%c32_116, %c0_117], %460 {strides = array<i32>} : memref<64x32xf32, #tpu.memory_space<vmem>>, vector<8x32xf32>,
    %462 = vector.extract_strided_slice %107 {offsets = [3, 0], sizes = [8, 128], strides = [1, 1]} : vector<16x128xf32> to vector<8x128xf32>
    %cst_118 = arith.constant dense<0.000000e+00> : vector<8x128xf32>
    %463 = tpu.matmul %460, %343, %cst_118 {dimension_numbers = #tpu.dot_dimension_numbers<[1], [0], [0], [1], [0, 0, 1, 1], [], []>} : vector<8x32xf32>, vector<32x128xf32>, vector<8x128xf32> -> vector<8x128xf32>
    %464 = arith.addf %462, %463 : vector<8x128xf32>
    %465 = vector.extract_strided_slice %464 {offsets = [0, 0], sizes = [8, 32], strides = [1, 1]} : vector<8x128xf32> to vector<8x32xf32>
    %466 = arith.negf %465 : vector<8x32xf32>
    %467 = math.exp %466 : vector<8x32xf32>
    %cst_119 = arith.constant 1.000000e+00 : f32
    %468 = vector.broadcast %cst_119 : f32 to vector<8x32xf32>
    %469 = arith.addf %468, %467 : vector<8x32xf32>
    %470 = arith.divf %468, %469 : vector<8x32xf32>
    %471 = vector.extract_strided_slice %464 {offsets = [0, 32], sizes = [8, 32], strides = [1, 1]} : vector<8x128xf32> to vector<8x32xf32>
    %472 = arith.negf %471 : vector<8x32xf32>
    %473 = math.exp %472 : vector<8x32xf32>
    %cst_120 = arith.constant 1.000000e+00 : f32
    %474 = vector.broadcast %cst_120 : f32 to vector<8x32xf32>
    %475 = arith.addf %474, %473 : vector<8x32xf32>
    %476 = arith.divf %474, %475 : vector<8x32xf32>
    %477 = vector.extract_strided_slice %464 {offsets = [0, 64], sizes = [8, 32], strides = [1, 1]} : vector<8x128xf32> to vector<8x32xf32>
    %478 = math.tanh %477 : vector<8x32xf32>
    %479 = vector.extract_strided_slice %464 {offsets = [0, 96], sizes = [8, 32], strides = [1, 1]} : vector<8x128xf32> to vector<8x32xf32>
    %480 = arith.negf %479 : vector<8x32xf32>
    %481 = math.exp %480 : vector<8x32xf32>
    %cst_121 = arith.constant 1.000000e+00 : f32
    %482 = vector.broadcast %cst_121 : f32 to vector<8x32xf32>
    %483 = arith.addf %482, %481 : vector<8x32xf32>
    %484 = arith.divf %482, %483 : vector<8x32xf32>
    %485 = arith.mulf %476, %458 : vector<8x32xf32>
    %486 = arith.mulf %470, %478 : vector<8x32xf32>
    %487 = arith.addf %485, %486 : vector<8x32xf32>
    %488 = math.tanh %487 : vector<8x32xf32>
    %489 = arith.mulf %484, %488 : vector<8x32xf32>
    %c24_122 = arith.constant 24 : index
    %c0_123 = arith.constant 0 : index
    %490 = vector.load %arg20[%c24_122, %c0_123] : memref<64x32xf32, #tpu.memory_space<vmem>>, vector<8x32xf32>
    tpu.vector_store %arg20[%c24_122, %c0_123], %489 {strides = array<i32>} : memref<64x32xf32, #tpu.memory_space<vmem>>, vector<8x32xf32>,
    %491 = vector.extract_strided_slice %107 {offsets = [2, 0], sizes = [8, 128], strides = [1, 1]} : vector<16x128xf32> to vector<8x128xf32>
    %cst_124 = arith.constant dense<0.000000e+00> : vector<8x128xf32>
    %492 = tpu.matmul %489, %343, %cst_124 {dimension_numbers = #tpu.dot_dimension_numbers<[1], [0], [0], [1], [0, 0, 1, 1], [], []>} : vector<8x32xf32>, vector<32x128xf32>, vector<8x128xf32> -> vector<8x128xf32>
    %493 = arith.addf %491, %492 : vector<8x128xf32>
    %494 = vector.extract_strided_slice %493 {offsets = [0, 0], sizes = [8, 32], strides = [1, 1]} : vector<8x128xf32> to vector<8x32xf32>
    %495 = arith.negf %494 : vector<8x32xf32>
    %496 = math.exp %495 : vector<8x32xf32>
    %cst_125 = arith.constant 1.000000e+00 : f32
    %497 = vector.broadcast %cst_125 : f32 to vector<8x32xf32>
    %498 = arith.addf %497, %496 : vector<8x32xf32>
    %499 = arith.divf %497, %498 : vector<8x32xf32>
    %500 = vector.extract_strided_slice %493 {offsets = [0, 32], sizes = [8, 32], strides = [1, 1]} : vector<8x128xf32> to vector<8x32xf32>
    %501 = arith.negf %500 : vector<8x32xf32>
    %502 = math.exp %501 : vector<8x32xf32>
    %cst_126 = arith.constant 1.000000e+00 : f32
    %503 = vector.broadcast %cst_126 : f32 to vector<8x32xf32>
    %504 = arith.addf %503, %502 : vector<8x32xf32>
    %505 = arith.divf %503, %504 : vector<8x32xf32>
    %506 = vector.extract_strided_slice %493 {offsets = [0, 64], sizes = [8, 32], strides = [1, 1]} : vector<8x128xf32> to vector<8x32xf32>
    %507 = math.tanh %506 : vector<8x32xf32>
    %508 = vector.extract_strided_slice %493 {offsets = [0, 96], sizes = [8, 32], strides = [1, 1]} : vector<8x128xf32> to vector<8x32xf32>
    %509 = arith.negf %508 : vector<8x32xf32>
    %510 = math.exp %509 : vector<8x32xf32>
    %cst_127 = arith.constant 1.000000e+00 : f32
    %511 = vector.broadcast %cst_127 : f32 to vector<8x32xf32>
    %512 = arith.addf %511, %510 : vector<8x32xf32>
    %513 = arith.divf %511, %512 : vector<8x32xf32>
    %514 = arith.mulf %505, %487 : vector<8x32xf32>
    %515 = arith.mulf %499, %507 : vector<8x32xf32>
    %516 = arith.addf %514, %515 : vector<8x32xf32>
    %517 = math.tanh %516 : vector<8x32xf32>
    %518 = arith.mulf %513, %517 : vector<8x32xf32>
    %c16_128 = arith.constant 16 : index
    %c0_129 = arith.constant 0 : index
    %519 = vector.load %arg20[%c16_128, %c0_129] : memref<64x32xf32, #tpu.memory_space<vmem>>, vector<8x32xf32>
    tpu.vector_store %arg20[%c16_128, %c0_129], %518 {strides = array<i32>} : memref<64x32xf32, #tpu.memory_space<vmem>>, vector<8x32xf32>,
    %520 = vector.extract_strided_slice %107 {offsets = [1, 0], sizes = [8, 128], strides = [1, 1]} : vector<16x128xf32> to vector<8x128xf32>
    %cst_130 = arith.constant dense<0.000000e+00> : vector<8x128xf32>
    %521 = tpu.matmul %518, %343, %cst_130 {dimension_numbers = #tpu.dot_dimension_numbers<[1], [0], [0], [1], [0, 0, 1, 1], [], []>} : vector<8x32xf32>, vector<32x128xf32>, vector<8x128xf32> -> vector<8x128xf32>
    %522 = arith.addf %520, %521 : vector<8x128xf32>
    %523 = vector.extract_strided_slice %522 {offsets = [0, 0], sizes = [8, 32], strides = [1, 1]} : vector<8x128xf32> to vector<8x32xf32>
    %524 = arith.negf %523 : vector<8x32xf32>
    %525 = math.exp %524 : vector<8x32xf32>
    %cst_131 = arith.constant 1.000000e+00 : f32
    %526 = vector.broadcast %cst_131 : f32 to vector<8x32xf32>
    %527 = arith.addf %526, %525 : vector<8x32xf32>
    %528 = arith.divf %526, %527 : vector<8x32xf32>
    %529 = vector.extract_strided_slice %522 {offsets = [0, 32], sizes = [8, 32], strides = [1, 1]} : vector<8x128xf32> to vector<8x32xf32>
    %530 = arith.negf %529 : vector<8x32xf32>
    %531 = math.exp %530 : vector<8x32xf32>
    %cst_132 = arith.constant 1.000000e+00 : f32
    %532 = vector.broadcast %cst_132 : f32 to vector<8x32xf32>
    %533 = arith.addf %532, %531 : vector<8x32xf32>
    %534 = arith.divf %532, %533 : vector<8x32xf32>
    %535 = vector.extract_strided_slice %522 {offsets = [0, 64], sizes = [8, 32], strides = [1, 1]} : vector<8x128xf32> to vector<8x32xf32>
    %536 = math.tanh %535 : vector<8x32xf32>
    %537 = vector.extract_strided_slice %522 {offsets = [0, 96], sizes = [8, 32], strides = [1, 1]} : vector<8x128xf32> to vector<8x32xf32>
    %538 = arith.negf %537 : vector<8x32xf32>
    %539 = math.exp %538 : vector<8x32xf32>
    %cst_133 = arith.constant 1.000000e+00 : f32
    %540 = vector.broadcast %cst_133 : f32 to vector<8x32xf32>
    %541 = arith.addf %540, %539 : vector<8x32xf32>
    %542 = arith.divf %540, %541 : vector<8x32xf32>
    %543 = arith.mulf %534, %516 : vector<8x32xf32>
    %544 = arith.mulf %528, %536 : vector<8x32xf32>
    %545 = arith.addf %543, %544 : vector<8x32xf32>
    %546 = math.tanh %545 : vector<8x32xf32>
    %547 = arith.mulf %542, %546 : vector<8x32xf32>
    %c8_134 = arith.constant 8 : index
    %c0_135 = arith.constant 0 : index
    %548 = vector.load %arg20[%c8_134, %c0_135] : memref<64x32xf32, #tpu.memory_space<vmem>>, vector<8x32xf32>
    tpu.vector_store %arg20[%c8_134, %c0_135], %547 {strides = array<i32>} : memref<64x32xf32, #tpu.memory_space<vmem>>, vector<8x32xf32>,
    %549 = vector.extract_strided_slice %107 {offsets = [0, 0], sizes = [8, 128], strides = [1, 1]} : vector<16x128xf32> to vector<8x128xf32>
    %cst_136 = arith.constant dense<0.000000e+00> : vector<8x128xf32>
    %550 = tpu.matmul %547, %343, %cst_136 {dimension_numbers = #tpu.dot_dimension_numbers<[1], [0], [0], [1], [0, 0, 1, 1], [], []>} : vector<8x32xf32>, vector<32x128xf32>, vector<8x128xf32> -> vector<8x128xf32>
    %551 = arith.addf %549, %550 : vector<8x128xf32>
    %552 = vector.extract_strided_slice %551 {offsets = [0, 0], sizes = [8, 32], strides = [1, 1]} : vector<8x128xf32> to vector<8x32xf32>
    %553 = arith.negf %552 : vector<8x32xf32>
    %554 = math.exp %553 : vector<8x32xf32>
    %cst_137 = arith.constant 1.000000e+00 : f32
    %555 = vector.broadcast %cst_137 : f32 to vector<8x32xf32>
    %556 = arith.addf %555, %554 : vector<8x32xf32>
    %557 = arith.divf %555, %556 : vector<8x32xf32>
    %558 = vector.extract_strided_slice %551 {offsets = [0, 32], sizes = [8, 32], strides = [1, 1]} : vector<8x128xf32> to vector<8x32xf32>
    %559 = arith.negf %558 : vector<8x32xf32>
    %560 = math.exp %559 : vector<8x32xf32>
    %cst_138 = arith.constant 1.000000e+00 : f32
    %561 = vector.broadcast %cst_138 : f32 to vector<8x32xf32>
    %562 = arith.addf %561, %560 : vector<8x32xf32>
    %563 = arith.divf %561, %562 : vector<8x32xf32>
    %564 = vector.extract_strided_slice %551 {offsets = [0, 64], sizes = [8, 32], strides = [1, 1]} : vector<8x128xf32> to vector<8x32xf32>
    %565 = math.tanh %564 : vector<8x32xf32>
    %566 = vector.extract_strided_slice %551 {offsets = [0, 96], sizes = [8, 32], strides = [1, 1]} : vector<8x128xf32> to vector<8x32xf32>
    %567 = arith.negf %566 : vector<8x32xf32>
    %568 = math.exp %567 : vector<8x32xf32>
    %cst_139 = arith.constant 1.000000e+00 : f32
    %569 = vector.broadcast %cst_139 : f32 to vector<8x32xf32>
    %570 = arith.addf %569, %568 : vector<8x32xf32>
    %571 = arith.divf %569, %570 : vector<8x32xf32>
    %572 = arith.mulf %563, %545 : vector<8x32xf32>
    %573 = arith.mulf %557, %565 : vector<8x32xf32>
    %574 = arith.addf %572, %573 : vector<8x32xf32>
    %575 = math.tanh %574 : vector<8x32xf32>
    %576 = arith.mulf %571, %575 : vector<8x32xf32>
    %c0_140 = arith.constant 0 : index
    %c0_141 = arith.constant 0 : index
    %577 = vector.load %arg20[%c0_140, %c0_141] : memref<64x32xf32, #tpu.memory_space<vmem>>, vector<8x32xf32>
    tpu.vector_store %arg20[%c0_140, %c0_141], %576 {strides = array<i32>} : memref<64x32xf32, #tpu.memory_space<vmem>>, vector<8x32xf32>,
    %c0_142 = arith.constant 0 : index
    %c0_143 = arith.constant 0 : index
    %578 = vector.load %arg19[%c0_142, %c0_143] : memref<64x32xf32, #tpu.memory_space<vmem>>, vector<64x32xf32>
    %c0_144 = arith.constant 0 : index
    %c0_145 = arith.constant 0 : index
    %579 = vector.load %arg20[%c0_144, %c0_145] : memref<64x32xf32, #tpu.memory_space<vmem>>, vector<64x32xf32>
    %c0_146 = arith.constant 0 : index
    %c0_147 = arith.constant 0 : index
    %580 = vector.load %arg9[%c0_146, %c0_147] : memref<64x128xf32, #tpu.memory_space<vmem>>, vector<64x128xf32>
    %581 = vector.extract_strided_slice %580 {offsets = [0, 0], sizes = [32, 128], strides = [1, 1]} : vector<64x128xf32> to vector<32x128xf32>
    %cst_148 = arith.constant dense<0.000000e+00> : vector<64x128xf32>
    %582 = tpu.matmul %578, %581, %cst_148 {dimension_numbers = #tpu.dot_dimension_numbers<[1], [0], [0], [1], [0, 0, 1, 1], [], []>} : vector<64x32xf32>, vector<32x128xf32>, vector<64x128xf32> -> vector<64x128xf32>
    %583 = vector.extract_strided_slice %580 {offsets = [32, 0], sizes = [32, 128], strides = [1, 1]} : vector<64x128xf32> to vector<32x128xf32>
    %cst_149 = arith.constant dense<0.000000e+00> : vector<64x128xf32>
    %584 = tpu.matmul %579, %583, %cst_149 {dimension_numbers = #tpu.dot_dimension_numbers<[1], [0], [0], [1], [0, 0, 1, 1], [], []>} : vector<64x32xf32>, vector<32x128xf32>, vector<64x128xf32> -> vector<64x128xf32>
    %585 = arith.addf %582, %584 : vector<64x128xf32>
    %c0_150 = arith.constant 0 : index
    %c0_151 = arith.constant 0 : index
    %586 = vector.load %arg11[%c0_150, %c0_151] : memref<1x128xf32, #tpu.memory_space<vmem>>, vector<1x128xf32>
    %587 = vector.broadcast %586 : vector<1x128xf32> to vector<64x128xf32>
    %588 = arith.addf %585, %587 : vector<64x128xf32>
    %c0_152 = arith.constant 0 : index
    %c0_153 = arith.constant 0 : index
    %589 = vector.load %arg10[%c0_152, %c0_153] : memref<32x128xf32, #tpu.memory_space<vmem>>, vector<32x128xf32>
    %cst_154 = arith.constant 0.000000e+00 : f32
    %590 = vector.broadcast %cst_154 : f32 to vector<8x32xf32>
    %cst_155 = arith.constant 0.000000e+00 : f32
    %591 = vector.broadcast %cst_155 : f32 to vector<8x32xf32>
    %592 = vector.extract_strided_slice %588 {offsets = [0, 0], sizes = [8, 128], strides = [1, 1]} : vector<64x128xf32> to vector<8x128xf32>
    %cst_156 = arith.constant dense<0.000000e+00> : vector<8x128xf32>
    %593 = tpu.matmul %590, %589, %cst_156 {dimension_numbers = #tpu.dot_dimension_numbers<[1], [0], [0], [1], [0, 0, 1, 1], [], []>} : vector<8x32xf32>, vector<32x128xf32>, vector<8x128xf32> -> vector<8x128xf32>
    %594 = arith.addf %592, %593 : vector<8x128xf32>
    %595 = vector.extract_strided_slice %594 {offsets = [0, 0], sizes = [8, 32], strides = [1, 1]} : vector<8x128xf32> to vector<8x32xf32>
    %596 = arith.negf %595 : vector<8x32xf32>
    %597 = math.exp %596 : vector<8x32xf32>
    %cst_157 = arith.constant 1.000000e+00 : f32
    %598 = vector.broadcast %cst_157 : f32 to vector<8x32xf32>
    %599 = arith.addf %598, %597 : vector<8x32xf32>
    %600 = arith.divf %598, %599 : vector<8x32xf32>
    %601 = vector.extract_strided_slice %594 {offsets = [0, 32], sizes = [8, 32], strides = [1, 1]} : vector<8x128xf32> to vector<8x32xf32>
    %602 = arith.negf %601 : vector<8x32xf32>
    %603 = math.exp %602 : vector<8x32xf32>
    %cst_158 = arith.constant 1.000000e+00 : f32
    %604 = vector.broadcast %cst_158 : f32 to vector<8x32xf32>
    %605 = arith.addf %604, %603 : vector<8x32xf32>
    %606 = arith.divf %604, %605 : vector<8x32xf32>
    %607 = vector.extract_strided_slice %594 {offsets = [0, 64], sizes = [8, 32], strides = [1, 1]} : vector<8x128xf32> to vector<8x32xf32>
    %608 = math.tanh %607 : vector<8x32xf32>
    %609 = vector.extract_strided_slice %594 {offsets = [0, 96], sizes = [8, 32], strides = [1, 1]} : vector<8x128xf32> to vector<8x32xf32>
    %610 = arith.negf %609 : vector<8x32xf32>
    %611 = math.exp %610 : vector<8x32xf32>
    %cst_159 = arith.constant 1.000000e+00 : f32
    %612 = vector.broadcast %cst_159 : f32 to vector<8x32xf32>
    %613 = arith.addf %612, %611 : vector<8x32xf32>
    %614 = arith.divf %612, %613 : vector<8x32xf32>
    %615 = arith.mulf %606, %591 : vector<8x32xf32>
    %616 = arith.mulf %600, %608 : vector<8x32xf32>
    %617 = arith.addf %615, %616 : vector<8x32xf32>
    %618 = math.tanh %617 : vector<8x32xf32>
    %619 = arith.mulf %614, %618 : vector<8x32xf32>
    %620 = vector.extract_strided_slice %588 {offsets = [8, 0], sizes = [8, 128], strides = [1, 1]} : vector<64x128xf32> to vector<8x128xf32>
    %cst_160 = arith.constant dense<0.000000e+00> : vector<8x128xf32>
    %621 = tpu.matmul %619, %589, %cst_160 {dimension_numbers = #tpu.dot_dimension_numbers<[1], [0], [0], [1], [0, 0, 1, 1], [], []>} : vector<8x32xf32>, vector<32x128xf32>, vector<8x128xf32> -> vector<8x128xf32>
    %622 = arith.addf %620, %621 : vector<8x128xf32>
    %623 = vector.extract_strided_slice %622 {offsets = [0, 0], sizes = [8, 32], strides = [1, 1]} : vector<8x128xf32> to vector<8x32xf32>
    %624 = arith.negf %623 : vector<8x32xf32>
    %625 = math.exp %624 : vector<8x32xf32>
    %cst_161 = arith.constant 1.000000e+00 : f32
    %626 = vector.broadcast %cst_161 : f32 to vector<8x32xf32>
    %627 = arith.addf %626, %625 : vector<8x32xf32>
    %628 = arith.divf %626, %627 : vector<8x32xf32>
    %629 = vector.extract_strided_slice %622 {offsets = [0, 32], sizes = [8, 32], strides = [1, 1]} : vector<8x128xf32> to vector<8x32xf32>
    %630 = arith.negf %629 : vector<8x32xf32>
    %631 = math.exp %630 : vector<8x32xf32>
    %cst_162 = arith.constant 1.000000e+00 : f32
    %632 = vector.broadcast %cst_162 : f32 to vector<8x32xf32>
    %633 = arith.addf %632, %631 : vector<8x32xf32>
    %634 = arith.divf %632, %633 : vector<8x32xf32>
    %635 = vector.extract_strided_slice %622 {offsets = [0, 64], sizes = [8, 32], strides = [1, 1]} : vector<8x128xf32> to vector<8x32xf32>
    %636 = math.tanh %635 : vector<8x32xf32>
    %637 = vector.extract_strided_slice %622 {offsets = [0, 96], sizes = [8, 32], strides = [1, 1]} : vector<8x128xf32> to vector<8x32xf32>
    %638 = arith.negf %637 : vector<8x32xf32>
    %639 = math.exp %638 : vector<8x32xf32>
    %cst_163 = arith.constant 1.000000e+00 : f32
    %640 = vector.broadcast %cst_163 : f32 to vector<8x32xf32>
    %641 = arith.addf %640, %639 : vector<8x32xf32>
    %642 = arith.divf %640, %641 : vector<8x32xf32>
    %643 = arith.mulf %634, %617 : vector<8x32xf32>
    %644 = arith.mulf %628, %636 : vector<8x32xf32>
    %645 = arith.addf %643, %644 : vector<8x32xf32>
    %646 = math.tanh %645 : vector<8x32xf32>
    %647 = arith.mulf %642, %646 : vector<8x32xf32>
    %648 = vector.extract_strided_slice %588 {offsets = [16, 0], sizes = [8, 128], strides = [1, 1]} : vector<64x128xf32> to vector<8x128xf32>
    %cst_164 = arith.constant dense<0.000000e+00> : vector<8x128xf32>
    %649 = tpu.matmul %647, %589, %cst_164 {dimension_numbers = #tpu.dot_dimension_numbers<[1], [0], [0], [1], [0, 0, 1, 1], [], []>} : vector<8x32xf32>, vector<32x128xf32>, vector<8x128xf32> -> vector<8x128xf32>
    %650 = arith.addf %648, %649 : vector<8x128xf32>
    %651 = vector.extract_strided_slice %650 {offsets = [0, 0], sizes = [8, 32], strides = [1, 1]} : vector<8x128xf32> to vector<8x32xf32>
    %652 = arith.negf %651 : vector<8x32xf32>
    %653 = math.exp %652 : vector<8x32xf32>
    %cst_165 = arith.constant 1.000000e+00 : f32
    %654 = vector.broadcast %cst_165 : f32 to vector<8x32xf32>
    %655 = arith.addf %654, %653 : vector<8x32xf32>
    %656 = arith.divf %654, %655 : vector<8x32xf32>
    %657 = vector.extract_strided_slice %650 {offsets = [0, 32], sizes = [8, 32], strides = [1, 1]} : vector<8x128xf32> to vector<8x32xf32>
    %658 = arith.negf %657 : vector<8x32xf32>
    %659 = math.exp %658 : vector<8x32xf32>
    %cst_166 = arith.constant 1.000000e+00 : f32
    %660 = vector.broadcast %cst_166 : f32 to vector<8x32xf32>
    %661 = arith.addf %660, %659 : vector<8x32xf32>
    %662 = arith.divf %660, %661 : vector<8x32xf32>
    %663 = vector.extract_strided_slice %650 {offsets = [0, 64], sizes = [8, 32], strides = [1, 1]} : vector<8x128xf32> to vector<8x32xf32>
    %664 = math.tanh %663 : vector<8x32xf32>
    %665 = vector.extract_strided_slice %650 {offsets = [0, 96], sizes = [8, 32], strides = [1, 1]} : vector<8x128xf32> to vector<8x32xf32>
    %666 = arith.negf %665 : vector<8x32xf32>
    %667 = math.exp %666 : vector<8x32xf32>
    %cst_167 = arith.constant 1.000000e+00 : f32
    %668 = vector.broadcast %cst_167 : f32 to vector<8x32xf32>
    %669 = arith.addf %668, %667 : vector<8x32xf32>
    %670 = arith.divf %668, %669 : vector<8x32xf32>
    %671 = arith.mulf %662, %645 : vector<8x32xf32>
    %672 = arith.mulf %656, %664 : vector<8x32xf32>
    %673 = arith.addf %671, %672 : vector<8x32xf32>
    %674 = math.tanh %673 : vector<8x32xf32>
    %675 = arith.mulf %670, %674 : vector<8x32xf32>
    %676 = vector.extract_strided_slice %588 {offsets = [24, 0], sizes = [8, 128], strides = [1, 1]} : vector<64x128xf32> to vector<8x128xf32>
    %cst_168 = arith.constant dense<0.000000e+00> : vector<8x128xf32>
    %677 = tpu.matmul %675, %589, %cst_168 {dimension_numbers = #tpu.dot_dimension_numbers<[1], [0], [0], [1], [0, 0, 1, 1], [], []>} : vector<8x32xf32>, vector<32x128xf32>, vector<8x128xf32> -> vector<8x128xf32>
    %678 = arith.addf %676, %677 : vector<8x128xf32>
    %679 = vector.extract_strided_slice %678 {offsets = [0, 0], sizes = [8, 32], strides = [1, 1]} : vector<8x128xf32> to vector<8x32xf32>
    %680 = arith.negf %679 : vector<8x32xf32>
    %681 = math.exp %680 : vector<8x32xf32>
    %cst_169 = arith.constant 1.000000e+00 : f32
    %682 = vector.broadcast %cst_169 : f32 to vector<8x32xf32>
    %683 = arith.addf %682, %681 : vector<8x32xf32>
    %684 = arith.divf %682, %683 : vector<8x32xf32>
    %685 = vector.extract_strided_slice %678 {offsets = [0, 32], sizes = [8, 32], strides = [1, 1]} : vector<8x128xf32> to vector<8x32xf32>
    %686 = arith.negf %685 : vector<8x32xf32>
    %687 = math.exp %686 : vector<8x32xf32>
    %cst_170 = arith.constant 1.000000e+00 : f32
    %688 = vector.broadcast %cst_170 : f32 to vector<8x32xf32>
    %689 = arith.addf %688, %687 : vector<8x32xf32>
    %690 = arith.divf %688, %689 : vector<8x32xf32>
    %691 = vector.extract_strided_slice %678 {offsets = [0, 64], sizes = [8, 32], strides = [1, 1]} : vector<8x128xf32> to vector<8x32xf32>
    %692 = math.tanh %691 : vector<8x32xf32>
    %693 = vector.extract_strided_slice %678 {offsets = [0, 96], sizes = [8, 32], strides = [1, 1]} : vector<8x128xf32> to vector<8x32xf32>
    %694 = arith.negf %693 : vector<8x32xf32>
    %695 = math.exp %694 : vector<8x32xf32>
    %cst_171 = arith.constant 1.000000e+00 : f32
    %696 = vector.broadcast %cst_171 : f32 to vector<8x32xf32>
    %697 = arith.addf %696, %695 : vector<8x32xf32>
    %698 = arith.divf %696, %697 : vector<8x32xf32>
    %699 = arith.mulf %690, %673 : vector<8x32xf32>
    %700 = arith.mulf %684, %692 : vector<8x32xf32>
    %701 = arith.addf %699, %700 : vector<8x32xf32>
    %702 = math.tanh %701 : vector<8x32xf32>
    %703 = arith.mulf %698, %702 : vector<8x32xf32>
    %704 = vector.extract_strided_slice %588 {offsets = [32, 0], sizes = [8, 128], strides = [1, 1]} : vector<64x128xf32> to vector<8x128xf32>
    %cst_172 = arith.constant dense<0.000000e+00> : vector<8x128xf32>
    %705 = tpu.matmul %703, %589, %cst_172 {dimension_numbers = #tpu.dot_dimension_numbers<[1], [0], [0], [1], [0, 0, 1, 1], [], []>} : vector<8x32xf32>, vector<32x128xf32>, vector<8x128xf32> -> vector<8x128xf32>
    %706 = arith.addf %704, %705 : vector<8x128xf32>
    %707 = vector.extract_strided_slice %706 {offsets = [0, 0], sizes = [8, 32], strides = [1, 1]} : vector<8x128xf32> to vector<8x32xf32>
    %708 = arith.negf %707 : vector<8x32xf32>
    %709 = math.exp %708 : vector<8x32xf32>
    %cst_173 = arith.constant 1.000000e+00 : f32
    %710 = vector.broadcast %cst_173 : f32 to vector<8x32xf32>
    %711 = arith.addf %710, %709 : vector<8x32xf32>
    %712 = arith.divf %710, %711 : vector<8x32xf32>
    %713 = vector.extract_strided_slice %706 {offsets = [0, 32], sizes = [8, 32], strides = [1, 1]} : vector<8x128xf32> to vector<8x32xf32>
    %714 = arith.negf %713 : vector<8x32xf32>
    %715 = math.exp %714 : vector<8x32xf32>
    %cst_174 = arith.constant 1.000000e+00 : f32
    %716 = vector.broadcast %cst_174 : f32 to vector<8x32xf32>
    %717 = arith.addf %716, %715 : vector<8x32xf32>
    %718 = arith.divf %716, %717 : vector<8x32xf32>
    %719 = vector.extract_strided_slice %706 {offsets = [0, 64], sizes = [8, 32], strides = [1, 1]} : vector<8x128xf32> to vector<8x32xf32>
    %720 = math.tanh %719 : vector<8x32xf32>
    %721 = vector.extract_strided_slice %706 {offsets = [0, 96], sizes = [8, 32], strides = [1, 1]} : vector<8x128xf32> to vector<8x32xf32>
    %722 = arith.negf %721 : vector<8x32xf32>
    %723 = math.exp %722 : vector<8x32xf32>
    %cst_175 = arith.constant 1.000000e+00 : f32
    %724 = vector.broadcast %cst_175 : f32 to vector<8x32xf32>
    %725 = arith.addf %724, %723 : vector<8x32xf32>
    %726 = arith.divf %724, %725 : vector<8x32xf32>
    %727 = arith.mulf %718, %701 : vector<8x32xf32>
    %728 = arith.mulf %712, %720 : vector<8x32xf32>
    %729 = arith.addf %727, %728 : vector<8x32xf32>
    %730 = math.tanh %729 : vector<8x32xf32>
    %731 = arith.mulf %726, %730 : vector<8x32xf32>
    %732 = vector.extract_strided_slice %588 {offsets = [40, 0], sizes = [8, 128], strides = [1, 1]} : vector<64x128xf32> to vector<8x128xf32>
    %cst_176 = arith.constant dense<0.000000e+00> : vector<8x128xf32>
    %733 = tpu.matmul %731, %589, %cst_176 {dimension_numbers = #tpu.dot_dimension_numbers<[1], [0], [0], [1], [0, 0, 1, 1], [], []>} : vector<8x32xf32>, vector<32x128xf32>, vector<8x128xf32> -> vector<8x128xf32>
    %734 = arith.addf %732, %733 : vector<8x128xf32>
    %735 = vector.extract_strided_slice %734 {offsets = [0, 0], sizes = [8, 32], strides = [1, 1]} : vector<8x128xf32> to vector<8x32xf32>
    %736 = arith.negf %735 : vector<8x32xf32>
    %737 = math.exp %736 : vector<8x32xf32>
    %cst_177 = arith.constant 1.000000e+00 : f32
    %738 = vector.broadcast %cst_177 : f32 to vector<8x32xf32>
    %739 = arith.addf %738, %737 : vector<8x32xf32>
    %740 = arith.divf %738, %739 : vector<8x32xf32>
    %741 = vector.extract_strided_slice %734 {offsets = [0, 32], sizes = [8, 32], strides = [1, 1]} : vector<8x128xf32> to vector<8x32xf32>
    %742 = arith.negf %741 : vector<8x32xf32>
    %743 = math.exp %742 : vector<8x32xf32>
    %cst_178 = arith.constant 1.000000e+00 : f32
    %744 = vector.broadcast %cst_178 : f32 to vector<8x32xf32>
    %745 = arith.addf %744, %743 : vector<8x32xf32>
    %746 = arith.divf %744, %745 : vector<8x32xf32>
    %747 = vector.extract_strided_slice %734 {offsets = [0, 64], sizes = [8, 32], strides = [1, 1]} : vector<8x128xf32> to vector<8x32xf32>
    %748 = math.tanh %747 : vector<8x32xf32>
    %749 = vector.extract_strided_slice %734 {offsets = [0, 96], sizes = [8, 32], strides = [1, 1]} : vector<8x128xf32> to vector<8x32xf32>
    %750 = arith.negf %749 : vector<8x32xf32>
    %751 = math.exp %750 : vector<8x32xf32>
    %cst_179 = arith.constant 1.000000e+00 : f32
    %752 = vector.broadcast %cst_179 : f32 to vector<8x32xf32>
    %753 = arith.addf %752, %751 : vector<8x32xf32>
    %754 = arith.divf %752, %753 : vector<8x32xf32>
    %755 = arith.mulf %746, %729 : vector<8x32xf32>
    %756 = arith.mulf %740, %748 : vector<8x32xf32>
    %757 = arith.addf %755, %756 : vector<8x32xf32>
    %758 = math.tanh %757 : vector<8x32xf32>
    %759 = arith.mulf %754, %758 : vector<8x32xf32>
    %760 = vector.extract_strided_slice %588 {offsets = [48, 0], sizes = [8, 128], strides = [1, 1]} : vector<64x128xf32> to vector<8x128xf32>
    %cst_180 = arith.constant dense<0.000000e+00> : vector<8x128xf32>
    %761 = tpu.matmul %759, %589, %cst_180 {dimension_numbers = #tpu.dot_dimension_numbers<[1], [0], [0], [1], [0, 0, 1, 1], [], []>} : vector<8x32xf32>, vector<32x128xf32>, vector<8x128xf32> -> vector<8x128xf32>
    %762 = arith.addf %760, %761 : vector<8x128xf32>
    %763 = vector.extract_strided_slice %762 {offsets = [0, 0], sizes = [8, 32], strides = [1, 1]} : vector<8x128xf32> to vector<8x32xf32>
    %764 = arith.negf %763 : vector<8x32xf32>
    %765 = math.exp %764 : vector<8x32xf32>
    %cst_181 = arith.constant 1.000000e+00 : f32
    %766 = vector.broadcast %cst_181 : f32 to vector<8x32xf32>
    %767 = arith.addf %766, %765 : vector<8x32xf32>
    %768 = arith.divf %766, %767 : vector<8x32xf32>
    %769 = vector.extract_strided_slice %762 {offsets = [0, 32], sizes = [8, 32], strides = [1, 1]} : vector<8x128xf32> to vector<8x32xf32>
    %770 = arith.negf %769 : vector<8x32xf32>
    %771 = math.exp %770 : vector<8x32xf32>
    %cst_182 = arith.constant 1.000000e+00 : f32
    %772 = vector.broadcast %cst_182 : f32 to vector<8x32xf32>
    %773 = arith.addf %772, %771 : vector<8x32xf32>
    %774 = arith.divf %772, %773 : vector<8x32xf32>
    %775 = vector.extract_strided_slice %762 {offsets = [0, 64], sizes = [8, 32], strides = [1, 1]} : vector<8x128xf32> to vector<8x32xf32>
    %776 = math.tanh %775 : vector<8x32xf32>
    %777 = vector.extract_strided_slice %762 {offsets = [0, 96], sizes = [8, 32], strides = [1, 1]} : vector<8x128xf32> to vector<8x32xf32>
    %778 = arith.negf %777 : vector<8x32xf32>
    %779 = math.exp %778 : vector<8x32xf32>
    %cst_183 = arith.constant 1.000000e+00 : f32
    %780 = vector.broadcast %cst_183 : f32 to vector<8x32xf32>
    %781 = arith.addf %780, %779 : vector<8x32xf32>
    %782 = arith.divf %780, %781 : vector<8x32xf32>
    %783 = arith.mulf %774, %757 : vector<8x32xf32>
    %784 = arith.mulf %768, %776 : vector<8x32xf32>
    %785 = arith.addf %783, %784 : vector<8x32xf32>
    %786 = math.tanh %785 : vector<8x32xf32>
    %787 = arith.mulf %782, %786 : vector<8x32xf32>
    %788 = vector.extract_strided_slice %588 {offsets = [56, 0], sizes = [8, 128], strides = [1, 1]} : vector<64x128xf32> to vector<8x128xf32>
    %cst_184 = arith.constant dense<0.000000e+00> : vector<8x128xf32>
    %789 = tpu.matmul %787, %589, %cst_184 {dimension_numbers = #tpu.dot_dimension_numbers<[1], [0], [0], [1], [0, 0, 1, 1], [], []>} : vector<8x32xf32>, vector<32x128xf32>, vector<8x128xf32> -> vector<8x128xf32>
    %790 = arith.addf %788, %789 : vector<8x128xf32>
    %791 = vector.extract_strided_slice %790 {offsets = [0, 0], sizes = [8, 32], strides = [1, 1]} : vector<8x128xf32> to vector<8x32xf32>
    %792 = arith.negf %791 : vector<8x32xf32>
    %793 = math.exp %792 : vector<8x32xf32>
    %cst_185 = arith.constant 1.000000e+00 : f32
    %794 = vector.broadcast %cst_185 : f32 to vector<8x32xf32>
    %795 = arith.addf %794, %793 : vector<8x32xf32>
    %796 = arith.divf %794, %795 : vector<8x32xf32>
    %797 = vector.extract_strided_slice %790 {offsets = [0, 32], sizes = [8, 32], strides = [1, 1]} : vector<8x128xf32> to vector<8x32xf32>
    %798 = arith.negf %797 : vector<8x32xf32>
    %799 = math.exp %798 : vector<8x32xf32>
    %cst_186 = arith.constant 1.000000e+00 : f32
    %800 = vector.broadcast %cst_186 : f32 to vector<8x32xf32>
    %801 = arith.addf %800, %799 : vector<8x32xf32>
    %802 = arith.divf %800, %801 : vector<8x32xf32>
    %803 = vector.extract_strided_slice %790 {offsets = [0, 64], sizes = [8, 32], strides = [1, 1]} : vector<8x128xf32> to vector<8x32xf32>
    %804 = math.tanh %803 : vector<8x32xf32>
    %805 = vector.extract_strided_slice %790 {offsets = [0, 96], sizes = [8, 32], strides = [1, 1]} : vector<8x128xf32> to vector<8x32xf32>
    %806 = arith.negf %805 : vector<8x32xf32>
    %807 = math.exp %806 : vector<8x32xf32>
    %cst_187 = arith.constant 1.000000e+00 : f32
    %808 = vector.broadcast %cst_187 : f32 to vector<8x32xf32>
    %809 = arith.addf %808, %807 : vector<8x32xf32>
    %810 = arith.divf %808, %809 : vector<8x32xf32>
    %811 = arith.mulf %802, %785 : vector<8x32xf32>
    %812 = arith.mulf %796, %804 : vector<8x32xf32>
    %813 = arith.addf %811, %812 : vector<8x32xf32>
    %814 = math.tanh %813 : vector<8x32xf32>
    %815 = arith.mulf %810, %814 : vector<8x32xf32>
    %c0_188 = arith.constant 0 : index
    %c0_189 = arith.constant 0 : index
    %816 = vector.load %arg12[%c0_188, %c0_189] : memref<64x128xf32, #tpu.memory_space<vmem>>, vector<64x128xf32>
    %817 = vector.extract_strided_slice %816 {offsets = [0, 0], sizes = [32, 128], strides = [1, 1]} : vector<64x128xf32> to vector<32x128xf32>
    %cst_190 = arith.constant dense<0.000000e+00> : vector<8x128xf32>
    %818 = tpu.matmul %341, %817, %cst_190 {dimension_numbers = #tpu.dot_dimension_numbers<[1], [0], [0], [1], [0, 0, 1, 1], [], []>} : vector<8x32xf32>, vector<32x128xf32>, vector<8x128xf32> -> vector<8x128xf32>
    %819 = vector.extract_strided_slice %816 {offsets = [32, 0], sizes = [32, 128], strides = [1, 1]} : vector<64x128xf32> to vector<32x128xf32>
    %cst_191 = arith.constant dense<0.000000e+00> : vector<8x128xf32>
    %820 = tpu.matmul %373, %819, %cst_191 {dimension_numbers = #tpu.dot_dimension_numbers<[1], [0], [0], [1], [0, 0, 1, 1], [], []>} : vector<8x32xf32>, vector<32x128xf32>, vector<8x128xf32> -> vector<8x128xf32>
    %821 = arith.addf %818, %820 : vector<8x128xf32>
    %c0_192 = arith.constant 0 : index
    %c0_193 = arith.constant 0 : index
    %822 = vector.load %arg14[%c0_192, %c0_193] : memref<1x128xf32, #tpu.memory_space<vmem>>, vector<1x128xf32>
    %823 = vector.broadcast %822 : vector<1x128xf32> to vector<8x128xf32>
    %824 = arith.addf %821, %823 : vector<8x128xf32>
    %825 = vector.extract_strided_slice %824 {offsets = [0, 0], sizes = [8, 32], strides = [1, 1]} : vector<8x128xf32> to vector<8x32xf32>
    %826 = arith.negf %825 : vector<8x32xf32>
    %827 = math.exp %826 : vector<8x32xf32>
    %cst_194 = arith.constant 1.000000e+00 : f32
    %828 = vector.broadcast %cst_194 : f32 to vector<8x32xf32>
    %829 = arith.addf %828, %827 : vector<8x32xf32>
    %830 = arith.divf %828, %829 : vector<8x32xf32>
    %831 = vector.extract_strided_slice %824 {offsets = [0, 64], sizes = [8, 32], strides = [1, 1]} : vector<8x128xf32> to vector<8x32xf32>
    %832 = math.tanh %831 : vector<8x32xf32>
    %833 = vector.extract_strided_slice %824 {offsets = [0, 96], sizes = [8, 32], strides = [1, 1]} : vector<8x128xf32> to vector<8x32xf32>
    %834 = arith.negf %833 : vector<8x32xf32>
    %835 = math.exp %834 : vector<8x32xf32>
    %cst_195 = arith.constant 1.000000e+00 : f32
    %836 = vector.broadcast %cst_195 : f32 to vector<8x32xf32>
    %837 = arith.addf %836, %835 : vector<8x32xf32>
    %838 = arith.divf %836, %837 : vector<8x32xf32>
    %839 = arith.mulf %830, %832 : vector<8x32xf32>
    %840 = math.tanh %839 : vector<8x32xf32>
    %841 = arith.mulf %838, %840 : vector<8x32xf32>
    %c0_196 = arith.constant 0 : index
    %c0_197 = arith.constant 0 : index
    %842 = vector.load %arg15[%c0_196, %c0_197] : memref<64x128xf32, #tpu.memory_space<vmem>>, vector<64x128xf32>
    %843 = vector.extract_strided_slice %842 {offsets = [0, 0], sizes = [32, 128], strides = [1, 1]} : vector<64x128xf32> to vector<32x128xf32>
    %cst_198 = arith.constant dense<0.000000e+00> : vector<8x128xf32>
    %844 = tpu.matmul %815, %843, %cst_198 {dimension_numbers = #tpu.dot_dimension_numbers<[1], [0], [0], [1], [0, 0, 1, 1], [], []>} : vector<8x32xf32>, vector<32x128xf32>, vector<8x128xf32> -> vector<8x128xf32>
    %845 = vector.extract_strided_slice %842 {offsets = [32, 0], sizes = [32, 128], strides = [1, 1]} : vector<64x128xf32> to vector<32x128xf32>
    %cst_199 = arith.constant dense<0.000000e+00> : vector<8x128xf32>
    %846 = tpu.matmul %841, %845, %cst_199 {dimension_numbers = #tpu.dot_dimension_numbers<[1], [0], [0], [1], [0, 0, 1, 1], [], []>} : vector<8x32xf32>, vector<32x128xf32>, vector<8x128xf32> -> vector<8x128xf32>
    %847 = arith.addf %844, %846 : vector<8x128xf32>
    %c0_200 = arith.constant 0 : index
    %c0_201 = arith.constant 0 : index
    %848 = vector.load %arg16[%c0_200, %c0_201] : memref<1x128xf32, #tpu.memory_space<vmem>>, vector<1x128xf32>
    %849 = vector.broadcast %848 : vector<1x128xf32> to vector<8x128xf32>
    %850 = arith.addf %847, %849 : vector<8x128xf32>
    %cst_202 = arith.constant dense<0xFF800000> : vector<8xf32>
    %851 = vector.multi_reduction <maximumf>, %850, %cst_202 [1] : vector<8x128xf32> to vector<8xf32>
    %cst_203 = arith.constant 0xFF800000 : f32
    %852 = vector.broadcast %cst_203 : f32 to vector<8xf32>
    %853 = arith.maximumf %852, %851 : vector<8xf32>
    %854 = vector.shape_cast %853 : vector<8xf32> to vector<8x1xf32>
    %855 = vector.broadcast %854 : vector<8x1xf32> to vector<8x128xf32>
    %856 = arith.subf %850, %855 : vector<8x128xf32>
    %857 = math.exp %856 : vector<8x128xf32>
    %cst_204 = arith.constant dense<0.000000e+00> : vector<8xf32>
    %858 = vector.multi_reduction <add>, %857, %cst_204 [1] : vector<8x128xf32> to vector<8xf32>
    %859 = vector.shape_cast %858 : vector<8xf32> to vector<8x1xf32>
    %860 = vector.broadcast %859 : vector<8x1xf32> to vector<8x128xf32>
    %861 = arith.divf %857, %860 : vector<8x128xf32>
    %c0_205 = arith.constant 0 : index
    %c0_206 = arith.constant 0 : index
    %862 = vector.load %arg17[%c0_205, %c0_206] : memref<8x128xf32, #tpu.memory_space<vmem>>, vector<8x128xf32>
    tpu.vector_store %arg17[%c0_205, %c0_206], %861 {strides = array<i32>} : memref<8x128xf32, #tpu.memory_space<vmem>>, vector<8x128xf32>,
    return
  }
  func.func @transform_0(%arg0: i32, %arg1: memref<40xi32, #tpu.memory_space<smem>>) -> (i32, i32) {
    %c0_i32 = arith.constant 0 : i32
    %c0_i32_0 = arith.constant 0 : i32
    %c0_i32_1 = arith.constant 0 : i32
    return %c0_i32, %c0_i32_0 : i32, i32
  }
  func.func @transform_1(%arg0: i32, %arg1: memref<40xi32, #tpu.memory_space<smem>>) -> (i32, i32) {
    %c0_i32 = arith.constant 0 : i32
    %c0_i32_0 = arith.constant 0 : i32
    %c0_i32_1 = arith.constant 0 : i32
    return %c0_i32, %c0_i32_0 : i32, i32
  }
  func.func @transform_2(%arg0: i32, %arg1: memref<40xi32, #tpu.memory_space<smem>>) -> (i32, i32) {
    %c0_i32 = arith.constant 0 : i32
    %c0_i32_0 = arith.constant 0 : i32
    %c0_i32_1 = arith.constant 0 : i32
    return %c0_i32, %c0_i32_0 : i32, i32
  }
  func.func @transform_3(%arg0: i32, %arg1: memref<40xi32, #tpu.memory_space<smem>>) -> (i32, i32) {
    %c0_i32 = arith.constant 0 : i32
    %c0_i32_0 = arith.constant 0 : i32
    %c0_i32_1 = arith.constant 0 : i32
    return %c0_i32, %c0_i32_0 : i32, i32
  }
  func.func @transform_4(%arg0: i32, %arg1: memref<40xi32, #tpu.memory_space<smem>>) -> (i32, i32) {
    %c0_i32 = arith.constant 0 : i32
    %c0_i32_0 = arith.constant 0 : i32
    %c0_i32_1 = arith.constant 0 : i32
    return %c0_i32, %c0_i32_0 : i32, i32
  }
  func.func @transform_5(%arg0: i32, %arg1: memref<40xi32, #tpu.memory_space<smem>>) -> (i32, i32) {
    %c0_i32 = arith.constant 0 : i32
    %c0_i32_0 = arith.constant 0 : i32
    %c0_i32_1 = arith.constant 0 : i32
    return %c0_i32, %c0_i32_0 : i32, i32
  }
  func.func @transform_6(%arg0: i32, %arg1: memref<40xi32, #tpu.memory_space<smem>>) -> (i32, i32) {
    %c0_i32 = arith.constant 0 : i32
    %c0_i32_0 = arith.constant 0 : i32
    %c0_i32_1 = arith.constant 0 : i32
    return %c0_i32, %c0_i32_0 : i32, i32
  }
  func.func @transform_7(%arg0: i32, %arg1: memref<40xi32, #tpu.memory_space<smem>>) -> (i32, i32) {
    %c0_i32 = arith.constant 0 : i32
    %c0_i32_0 = arith.constant 0 : i32
    %c0_i32_1 = arith.constant 0 : i32
    return %c0_i32, %c0_i32_0 : i32, i32
  }
  func.func @transform_8(%arg0: i32, %arg1: memref<40xi32, #tpu.memory_space<smem>>) -> (i32, i32) {
    %c0_i32 = arith.constant 0 : i32
    %c0_i32_0 = arith.constant 0 : i32
    %c0_i32_1 = arith.constant 0 : i32
    return %c0_i32, %c0_i32_0 : i32, i32
  }
  func.func @transform_9(%arg0: i32, %arg1: memref<40xi32, #tpu.memory_space<smem>>) -> (i32, i32) {
    %c0_i32 = arith.constant 0 : i32
    %c0_i32_0 = arith.constant 0 : i32
    %c0_i32_1 = arith.constant 0 : i32
    return %c0_i32, %c0_i32_0 : i32, i32
  }
  func.func @transform_10(%arg0: i32, %arg1: memref<40xi32, #tpu.memory_space<smem>>) -> (i32, i32) {
    %c0_i32 = arith.constant 0 : i32
    %c0_i32_0 = arith.constant 0 : i32
    %c0_i32_1 = arith.constant 0 : i32
    return %c0_i32, %c0_i32_0 : i32, i32
  }
  func.func @transform_11(%arg0: i32, %arg1: memref<40xi32, #tpu.memory_space<smem>>) -> (i32, i32) {
    %c0_i32 = arith.constant 0 : i32
    %c0_i32_0 = arith.constant 0 : i32
    %c0_i32_1 = arith.constant 0 : i32
    return %c0_i32, %c0_i32_0 : i32, i32
  }
  func.func @transform_12(%arg0: i32, %arg1: memref<40xi32, #tpu.memory_space<smem>>) -> (i32, i32) {
    %c0_i32 = arith.constant 0 : i32
    %c0_i32_0 = arith.constant 0 : i32
    %c0_i32_1 = arith.constant 0 : i32
    return %c0_i32, %c0_i32_0 : i32, i32
  }
  func.func @transform_13(%arg0: i32, %arg1: memref<40xi32, #tpu.memory_space<smem>>) -> (i32, i32) {
    %c0_i32 = arith.constant 0 : i32
    %c0_i32_0 = arith.constant 0 : i32
    %c0_i32_1 = arith.constant 0 : i32
    return %c0_i32, %c0_i32_0 : i32, i32
  }
  func.func @transform_14(%arg0: i32, %arg1: memref<40xi32, #tpu.memory_space<smem>>) -> (i32, i32) {
    %c0_i32 = arith.constant 0 : i32
    %c0_i32_0 = arith.constant 0 : i32
    %c0_i32_1 = arith.constant 0 : i32
    return %c0_i32, %c0_i32_0 : i32, i32
  }
  func.func @transform_15(%arg0: i32, %arg1: memref<40xi32, #tpu.memory_space<smem>>) -> (i32, i32) {
    %c0_i32 = arith.constant 0 : i32
    %c0_i32_0 = arith.constant 0 : i32
    return %arg0, %c0_i32 : i32, i32
  }
}

</mosaic_0001>

<bundles_post_ra>
// kernel: tpu_custom_call.1
= control target key start
LH: loop header
LB: loop body
LE: loop exit
PB: predicated region body
PF: predicated region fallthrough
CT: control target
= control target key end

     0   :  { %s5451_s21 = smov [#allocation6]   ;;  %s6488_s0 = inlined_call_operand.hbm [shape: s32[40], index: 0, kind: input, shape index: {}]   ;;  %s6489_s1 = inlined_call_operand.hbm [shape: f32[32,32], index: 1, kind: input, shape index: {}]   ;;  %s6490_s2 = inlined_call_operand.hbm [shape: f32[32,128], index: 2, kind: input, shape index: {}]   ;;  %s6491_s3 = inlined_call_operand.hbm [shape: f32[32,128], index: 3, kind: input, shape index: {}]   ;;  %s6492_s4 = inlined_call_operand.vmem [shape: f32[1,128], index: 4, kind: input, shape index: {}]   ;;  %s6493_s5 = inlined_call_operand.hbm [shape: f32[32,128], index: 5, kind: input, shape index: {}]   ;;  %s6494_s6 = inlined_call_operand.hbm [shape: f32[32,128], index: 6, kind: input, shape index: {}]   ;;  %s6495_s7 = inlined_call_operand.vmem [shape: f32[1,128], index: 7, kind: input, shape index: {}]   ;;  %s6496_s8 = inlined_call_operand.hbm [shape: f32[64,128], index: 8, kind: input, shape index: {}]   ;;  %s6497_s9 = inlined_call_operand.hbm [shape: f32[32,128], index: 9, kind: input, shape index: {}]   ;;  %s6498_s10 = inlined_call_operand.vmem [shape: f32[1,128], index: 10, kind: input, shape index: {}]   ;;  %s6499_s11 = inlined_call_operand.hbm [shape: f32[64,128], index: 11, kind: input, shape index: {}]   ;;  %s6500_s12 = inlined_call_operand.hbm [shape: f32[32,128], index: 12, kind: input, shape index: {}]   ;;  %s6501_s13 = inlined_call_operand.vmem [shape: f32[1,128], index: 13, kind: input, shape index: {}]   ;;  %s6502_s14 = inlined_call_operand.hbm [shape: f32[64,128], index: 14, kind: input, shape index: {}]   ;;  %s6503_s15 = inlined_call_operand.vmem [shape: f32[1,128], index: 15, kind: input, shape index: {}]   ;;  %s6504_s16 = inlined_call_operand.hbm [shape: f32[8,128], index: 16, kind: output, shape index: {}]  }
   0x1   :  { %6505 = sst [smem:[#allocation33_spill]] %s6488_s0 }
   0x2   :  { %6506 = sst [smem:[#allocation34_spill]] %s6498_s10 }
   0x3   :  { %s6507_s10 = sld [smem:[#allocation33_spill]] }
   0x9   :  { %22 = dma.hbm_to_smem %s6507_s10, 16, %s5451_s21, [#allocation5] }
   0xa   :  { %5435 = dma.done.wait [#allocation5], 16 }
   0xb   :  { %5436 = vsyncadd [#allocation5], 4294967280 }
   0xc   :  { %24 = sfence }
   0xd   :  { %25 = vsyncpa [#allocation8], 0 }
   0xe   :  { %26 = vsyncpa [#allocation11], 0 }
   0xf   :  { %27 = vsyncpa [#allocation14], 0 }
  0x10   :  { %28 = vsyncpa [#allocation17], 0 }
  0x11   :  { %29 = vsyncpa [#allocation20], 0 }
  0x12   :  { %30 = vsyncpa [#allocation23], 0 }
  0x13   :  { %31 = vsyncpa [#allocation9], 0  ;;  %s5452_s24 = smov [#allocation10]   ;;  %s5453_s26 = smov [#allocation13]  }
  0x14   :  { %s49_s25 = sshll.u32 %s5452_s24, 4  ;;  %s75_s27 = sshll.u32 %s5453_s26, 4  ;;  %s50_s25 = int_to_ptr.vmem [resolvable:$true] %s49_s25  ;;  %s76_s27 = int_to_ptr.vmem [resolvable:$true] %s75_s27 }
  0x15   :  { %s5223_s28 = scalar_lea.vmem %s50_s25, 512  ;;  %p5228_p1 = scmp.lt.s32.totalorder %s50_s25, %s50_s25 }
  0x16   :  { %p5224_p0 = scmp.ne.s32.totalorder %s50_s25, %s5223_s28  ;;  %p5229_p2 = scmp.lt.s32.totalorder %s5223_s28, %s5223_s28 }
  0x18   :  { %p5230_p3 = por %p5229_p2, %p5228_p1 }
  0x1a   :  { %p5231_p4 = pnand %p5230_p3, %p5224_p0 }
  0x1c   :  { %5234 = shalt.err (!%p5231_p4)
}
  0x1d   :  { %s5454_s10 = smov 128   ;;  %s5455_s29 = smov 8  }
  0x1e   :  { %55 = dma.hbm_to_vmem [thread:$0]  %s6490_s2, 512, %s50_s25, [#allocation11], %s5454_s10, %s5454_s10, %s5455_s29  }
  0x1f   :  { %s5243_s17 = scalar_lea.vmem %s76_s27, 512  ;;  %p5248_p6 = scmp.lt.s32.totalorder %s76_s27, %s76_s27 }
  0x20   :  { %p5244_p5 = scmp.ne.s32.totalorder %s76_s27, %s5243_s17  ;;  %p5249_p7 = scmp.lt.s32.totalorder %s5243_s17, %s5243_s17 }
  0x22   :  { %p5250_p8 = por %p5249_p7, %p5248_p6 }
  0x24   :  { %p5251_p9 = pnand %p5250_p8, %p5244_p5 }
  0x26   :  { %5254 = shalt.err (!%p5251_p9)
}
  0x27   :  { %81 = dma.hbm_to_vmem [thread:$0]  %s6493_s5, 512, %s76_s27, [#allocation14], %s5454_s10, %s5454_s10, %s5455_s29  }
  0x28   :  { %s5456_s20 = smov [#allocation16]   ;;  %s5457_s22 = smov [#allocation19]  }
  0x29   :  { %s101_s21 = sshll.u32 %s5456_s20, 4  ;;  %s127_s23 = sshll.u32 %s5457_s22, 4  ;;  %s102_s21 = int_to_ptr.vmem [resolvable:$true] %s101_s21  ;;  %s128_s23 = int_to_ptr.vmem [resolvable:$true] %s127_s23 }
  0x2a   :  { %s5263_s2 = scalar_lea.vmem %s102_s21, 1024  ;;  %p5268_p11 = scmp.lt.s32.totalorder %s102_s21, %s102_s21 }
  0x2b   :  { %p5264_p10 = scmp.ne.s32.totalorder %s102_s21, %s5263_s2  ;;  %p5269_p12 = scmp.lt.s32.totalorder %s5263_s2, %s5263_s2 }
  0x2d   :  { %p5270_p13 = por %p5269_p12, %p5268_p11 }
  0x2f   :  { %p5271_p0 = pnand %p5270_p13, %p5264_p10 }
  0x31   :  { %5274 = shalt.err (!%p5271_p0)
}
  0x32   :  { %107 = dma.hbm_to_vmem [thread:$0]  %s6496_s8, 1024, %s102_s21, [#allocation17], %s5454_s10, %s5454_s10, %s5455_s29  }
  0x33   :  { %s5283_s5 = scalar_lea.vmem %s128_s23, 1024  ;;  %p5288_p2 = scmp.lt.s32.totalorder %s128_s23, %s128_s23 }
  0x34   :  { %p5284_p1 = scmp.ne.s32.totalorder %s128_s23, %s5283_s5  ;;  %p5289_p3 = scmp.lt.s32.totalorder %s5283_s5, %s5283_s5 }
  0x36   :  { %p5290_p4 = por %p5289_p3, %p5288_p2 }
  0x38   :  { %p5291_p5 = pnand %p5290_p4, %p5284_p1 }
  0x3a   :  { %5294 = shalt.err (!%p5291_p5)
}
  0x3b   :  { %133 = dma.hbm_to_vmem [thread:$0]  %s6499_s11, 1024, %s128_s23, [#allocation20], %s5454_s10, %s5454_s10, %s5455_s29  }
  0x3c   :  { %s5458_s28 = smov [#allocation7]   ;;  %s5459_s0 = smov [#allocation12]  }
  0x3d   :  { %s37_s30 = sshll.u32 %s5458_s28, 4  ;;  %s61_s17 = sshll.u32 %s5459_s0, 4  ;;  %s38_s30 = int_to_ptr.vmem [resolvable:$true] %s37_s30  ;;  %s62_s17 = int_to_ptr.vmem [resolvable:$true] %s61_s17 }
  0x3e   :  { %s5303_s8 = scalar_lea.vmem %s38_s30, 512  ;;  %p5308_p7 = scmp.lt.s32.totalorder %s38_s30, %s38_s30 }
  0x3f   :  { %p5304_p6 = scmp.ne.s32.totalorder %s38_s30, %s5303_s8  ;;  %p5309_p8 = scmp.lt.s32.totalorder %s5303_s8, %s5303_s8 }
  0x41   :  { %p5310_p9 = por %p5309_p8, %p5308_p7 }
  0x43   :  { %p5311_p10 = pnand %p5310_p9, %p5304_p6 }
  0x45   :  { %5314 = shalt.err (!%p5311_p10)
}
  0x46   :  { %43 = dma.hbm_to_vmem [thread:$0]  %s6489_s1, 512, %s38_s30, [#allocation8], %s5454_s10, %s5454_s10, %s5455_s29  }
  0x47   :  { %s5323_s11 = scalar_lea.vmem %s62_s17, 512  ;;  %p5328_p12 = scmp.lt.s32.totalorder %s62_s17, %s62_s17 }
  0x48   :  { %p5324_p11 = scmp.ne.s32.totalorder %s62_s17, %s5323_s11  ;;  %p5329_p13 = scmp.lt.s32.totalorder %s5323_s11, %s5323_s11 }
  0x4a   :  { %p5330_p0 = por %p5329_p13, %p5328_p12 }
  0x4c   :  { %p5331_p1 = pnand %p5330_p0, %p5324_p11 }
  0x4e   :  { %5334 = shalt.err (!%p5331_p1)
}
  0x4f   :  { %67 = dma.hbm_to_vmem [thread:$0]  %s6491_s3, 512, %s62_s17, [#allocation11], %s5454_s10, %s5454_s10, %s5455_s29  }
  0x50   :  { %s5460_s22 = smov [#allocation15]   ;;  %s5461_s2 = smov [#allocation18]  }
  0x51   :  { %s87_s23 = sshll.u32 %s5460_s22, 4  ;;  %s113_s24 = sshll.u32 %s5461_s2, 4  ;;  %s88_s23 = int_to_ptr.vmem [resolvable:$true] %s87_s23  ;;  %s114_s24 = int_to_ptr.vmem [resolvable:$true] %s113_s24 }
  0x52   :  { %s5343_s1 = scalar_lea.vmem %s88_s23, 512  ;;  %p5348_p3 = scmp.lt.s32.totalorder %s88_s23, %s88_s23 }
  0x53   :  { %p5344_p2 = scmp.ne.s32.totalorder %s88_s23, %s5343_s1  ;;  %p5349_p4 = scmp.lt.s32.totalorder %s5343_s1, %s5343_s1 }
  0x55   :  { %p5350_p5 = por %p5349_p4, %p5348_p3 }
  0x57   :  { %p5351_p6 = pnand %p5350_p5, %p5344_p2 }
  0x59   :  { %5354 = shalt.err (!%p5351_p6)
}
  0x5a   :  { %93 = dma.hbm_to_vmem [thread:$0]  %s6494_s6, 512, %s88_s23, [#allocation14], %s5454_s10, %s5454_s10, %s5455_s29  }
  0x5b   :  { %s5363_s3 = scalar_lea.vmem %s114_s24, 512  ;;  %p5368_p8 = scmp.lt.s32.totalorder %s114_s24, %s114_s24 }
  0x5c   :  { %p5364_p7 = scmp.ne.s32.totalorder %s114_s24, %s5363_s3  ;;  %p5369_p9 = scmp.lt.s32.totalorder %s5363_s3, %s5363_s3 }
  0x5e   :  { %p5370_p10 = por %p5369_p9, %p5368_p8 }
  0x60   :  { %p5371_p11 = pnand %p5370_p10, %p5364_p7 }
  0x62   :  { %5374 = shalt.err (!%p5371_p11)
}
  0x63   :  { %119 = dma.hbm_to_vmem [thread:$0]  %s6497_s9, 512, %s114_s24, [#allocation17], %s5454_s10, %s5454_s10, %s5455_s29  }
  0x64   :  { %s5462_s28 = smov [#allocation21]   ;;  %s5463_s0 = smov [#allocation22]  }
  0x65   :  { %s139_s30 = sshll.u32 %s5462_s28, 4  ;;  %s153_s17 = sshll.u32 %s5463_s0, 4  ;;  %s140_s30 = int_to_ptr.vmem [resolvable:$true] %s139_s30  ;;  %s154_s17 = int_to_ptr.vmem [resolvable:$true] %s153_s17 }
  0x66   :  { %s5383_s6 = scalar_lea.vmem %s140_s30, 512  ;;  %p5388_p13 = scmp.lt.s32.totalorder %s140_s30, %s140_s30 }
  0x67   :  { %p5384_p12 = scmp.ne.s32.totalorder %s140_s30, %s5383_s6  ;;  %p5389_p0 = scmp.lt.s32.totalorder %s5383_s6, %s5383_s6 }
  0x69   :  { %p5390_p1 = por %p5389_p0, %p5388_p13 }
  0x6b   :  { %p5391_p2 = pnand %p5390_p1, %p5384_p12 }
  0x6d   :  { %5394 = shalt.err (!%p5391_p2)
}
  0x6e   :  { %145 = dma.hbm_to_vmem [thread:$0]  %s6500_s12, 512, %s140_s30, [#allocation20], %s5454_s10, %s5454_s10, %s5455_s29  }
  0x6f   :  { %s5403_s9 = scalar_lea.vmem %s154_s17, 1024  ;;  %p5408_p4 = scmp.lt.s32.totalorder %s154_s17, %s154_s17 }
  0x70   :  { %p5404_p3 = scmp.ne.s32.totalorder %s154_s17, %s5403_s9  ;;  %p5409_p5 = scmp.lt.s32.totalorder %s5403_s9, %s5403_s9 }
  0x72   :  { %p5410_p6 = por %p5409_p5, %p5408_p4 }
  0x74   :  { %p5411_p7 = pnand %p5410_p6, %p5404_p3 }
  0x76   :  { %5414 = shalt.err (!%p5411_p7)
}
  0x77   :  { %159 = dma.hbm_to_vmem [thread:$0]  %s6502_s14, 1024, %s154_s17, [#allocation23], %s5454_s10, %s5454_s10, %s5455_s29  }
  0x78   :  { %5437 = dma.done.wait [#allocation8], 512  }
  0x79   :  { %5438 = vsyncadd [#allocation8], 4294966784 }
  0x7a   :  { %5439 = dma.done.wait [#allocation11], 1024  }
  0x7b   :  { %5440 = vsyncadd [#allocation11], 4294966272 }
  0x7c   :  { %5441 = dma.done.wait [#allocation14], 1024  }
  0x7d   :  { %5442 = vsyncadd [#allocation14], 4294966272 }
  0x7e   :  { %5443 = dma.done.wait [#allocation17], 1536  }
  0x7f   :  { %5444 = vsyncadd [#allocation17], 4294965760 }
  0x80   :  { %5445 = dma.done.wait [#allocation20], 1536  }
  0x81   :  { %5446 = vsyncadd [#allocation20], 4294965760 }
  0x82   :  { %5447 = dma.done.wait [#allocation23], 1024  }
  0x83   :  { %5448 = vsyncadd [#allocation23], 4294966272  ;;  %s193_s12 = sld [smem:[#allocation6]]  ;;  %vm196_vm0 = vcmask 253952   ;;  %v278_v0 = vld [vmem:[#allocation10 + $0x18] sm:$0xff]  ;;  %v277_v1 = vld [vmem:[#allocation10 + $0x10] sm:$0xff] }
  0x84   :  { %s4222_s20 = sld [smem:[#allocation6 + $0x1]]  ;;  %4502 = vmatprep.subr.mxu0 %v278_v0  ;;  %v276_v3 = vld [vmem:[#allocation10 + $0x8] sm:$0xff]  ;;  %v275_v6 = vld [vmem:[#allocation10] sm:$0xff]  ;;  %v5464_v12 = vmov 0.0   ;;  %vm286_vm1 = vcmask 261120   ;;  %v5661_v22 = vld [vmem:[#allocation12 + $0x18] sm:$0xff] }
  0x85   :  { %s4223_s21 = sld [smem:[#allocation6 + $0x2]]  ;;  %4503 = vmatpush3.msra.mxu0 %v278_v0  ;;  %v5667_v24 = vld [vmem:[#allocation12 + $0x10] sm:$0xff]  ;;  %vm5465_vm2 = vmmov 0   ;;  %v5673_v25 = vld [vmem:[#allocation12 + $0x8] sm:$0xff]  ;;  %v5677_v26 = vld [vmem:[#allocation12] sm:$0xff]  ;;  %vm799_vm3 = vcmask 1040384  }
  0x86   :  { %s4224_s22 = sld [smem:[#allocation6 + $0x3]]  ;;  %4504 = vmatprep.subr.mxu0 %v277_v1  ;;  %v4237_v27 = vld [vmem:[%s6492_s4] ss:$0 sm:$0xff]  ;;  %s5467_s4 = smov 32   ;;  %v371_v45 = vld [vmem:[#allocation13 + $0x18] sm:$0xff]  ;;  %v369_v47 = vld [vmem:[#allocation13 + $0x8] sm:$0xff] }
  0x87   :  { %s5618_s23 = sld [smem:[#allocation6 + $0x4]]  ;;  %4505 = vmatpush3.msra.mxu0 %v277_v1  ;;  %v370_v46 = vld [vmem:[#allocation13 + $0x10] sm:$0xff]  ;;  %4513 = vmatprep.subr.mxu1 %v371_v45  ;;  %v368_v48 = vld [vmem:[#allocation13] sm:$0xff]  ;;  %vm700_vm4 = vcmask 1046528   ;;  %vm851_vm5 = vcmask 1045504   ;;  %vm1001_vm6 = vcmask 1044480  }
  0x88   :  { %s5620_s14 = sld [smem:[#allocation6 + $0x5]]  ;;  %4506 = vmatprep.subr.mxu0 %v276_v3  ;;  %4514 = vmatpush3.msra.mxu1 %v371_v45  ;;  %vm1151_vm7 = vcmask 1043456   ;;  %vm1301_vm8 = vcmask 1042432   ;;  %vm1451_vm9 = vcmask 1041408   ;;  %vm849_vm10 = vcmask 254976  }
  0x89   :  { %s5622_s10 = sld [smem:[#allocation6 + $0x6]]  ;;  %s194_s29 = scalar_lea.vmem [#allocation7], %s193_s12  ;;  %4507 = vmatpush3.msra.mxu0 %v276_v3  ;;  %4515 = vmatprep.subr.mxu1 %v370_v46  ;;  %vm999_vm11 = vcmask 256000   ;;  %vm1149_vm12 = vcmask 257024   ;;  %vm697_vm13 = vcmask 261121   ;;  %vm847_vm14 = vcmask 261122  }
  0x8a   :  { %v195_v2 = vld [vmem:[%s194_s29] sm:$0x1]  ;;  %s5624_s2 = sld [smem:[#allocation6 + $0x7]]  ;;  %s200_s24 = scalar_lea.vmem [#allocation7], %s4222_s20  ;;  %4508 = vmatprep.subr.mxu0 %v275_v6  ;;  %4516 = vmatpush3.msra.mxu1 %v370_v46  ;;  %vm997_vm15 = vcmask 261123  }
  0x8b   :  { %197 = vst.msk [vmem:[#allocation2] sm:$0x1] %vm196_vm0, %v195_v2  ;;  %v201_v4 = vld [vmem:[%s200_s24] sm:$0x1]  ;;  %s5627_s1 = sld [smem:[#allocation6 + $0x8]]  ;;  %s205_s25 = scalar_lea.vmem [#allocation7], %s4223_s21  ;;  %4509 = vmatpush3.msra.mxu0 %v275_v6  ;;  %4517 = vmatprep.subr.mxu1 %v369_v47 }
  0x8c   :  { %202 = vst.msk [vmem:[#allocation2 + $0x1] sm:$0x1] %vm196_vm0, %v201_v4  ;;  %v206_v5 = vld [vmem:[%s205_s25] sm:$0x1]  ;;  %s5630_s5 = sld [smem:[#allocation6 + $0x9]]  ;;  %s210_s3 = scalar_lea.vmem [#allocation7], %s4224_s22  ;;  %4524 = vmatprep.subr.mxu0 %v5464_v12  ;;  %4518 = vmatpush3.msra.mxu1 %v369_v47 }
  0x8d   :  { %207 = vst.msk [vmem:[#allocation2 + $0x2] sm:$0x1] %vm196_vm0, %v206_v5  ;;  %v211_v7 = vld [vmem:[%s210_s3] sm:$0x1]  ;;  %s5633_s26 = sld [smem:[#allocation6 + $0xa]]  ;;  %s215_s27 = scalar_lea.vmem [#allocation7], %s5618_s23  ;;  %4519 = vmatprep.subr.mxu1 %v368_v48 }
  0x8e   :  { %212 = vst.msk [vmem:[#allocation2 + $0x3] sm:$0x1] %vm196_vm0, %v211_v7  ;;  %v216_v8 = vld [vmem:[%s215_s27] sm:$0x1]  ;;  %s5637_s28 = sld [smem:[#allocation6 + $0xb]]  ;;  %s220_s30 = scalar_lea.vmem [#allocation7], %s5620_s14  ;;  %4520 = vmatpush3.msra.mxu1 %v368_v48 }
  0x8f   :  { %217 = vst.msk [vmem:[#allocation2 + $0x4] sm:$0x1] %vm196_vm0, %v216_v8  ;;  %v221_v9 = vld [vmem:[%s220_s30] sm:$0x1]  ;;  %s4233_s0 = sld [smem:[#allocation6 + $0xc]]  ;;  %s225_s17 = scalar_lea.vmem [#allocation7], %s5622_s10  ;;  %4535 = vmatprep.subr.mxu1 %v5464_v12 }
  0x90   :  { %222 = vst.msk [vmem:[#allocation2 + $0x5] sm:$0x1] %vm196_vm0, %v221_v9  ;;  %v226_v10 = vld [vmem:[%s225_s17] sm:$0x1]  ;;  %s4234_s6 = sld [smem:[#allocation6 + $0xd]]  ;;  %s230_s8 = scalar_lea.vmem [#allocation7], %s5624_s2 }
  0x91   :  { %227 = vst.msk [vmem:[#allocation2 + $0x6] sm:$0x1] %vm196_vm0, %v226_v10  ;;  %v231_v11 = vld [vmem:[%s230_s8] sm:$0x1]  ;;  %s4235_s18 = sld [smem:[#allocation6 + $0xe]]  ;;  %s235_s9 = scalar_lea.vmem [#allocation7], %s5627_s1 }
  0x92   :  { %232 = vst.msk [vmem:[#allocation2 + $0x7] sm:$0x1] %vm196_vm0, %v231_v11  ;;  %v236_v13 = vld [vmem:[%s235_s9] sm:$0x1]  ;;  %s4236_s19 = sld [smem:[#allocation6 + $0xf]]  ;;  %s240_s11 = scalar_lea.vmem [#allocation7], %s5630_s5 }
  0x93   :  { %237 = vst.msk [vmem:[#allocation2 + $0x8] sm:$0x1] %vm196_vm0, %v236_v13  ;;  %v241_v14 = vld [vmem:[%s240_s11] sm:$0x1]  ;;  %s245_s12 = scalar_lea.vmem [#allocation7], %s5633_s26  ;;  %s5466_s2 = smov 64  }
  0x94   :  { %242 = vst.msk [vmem:[#allocation2 + $0x9] sm:$0x1] %vm196_vm0, %v241_v14  ;;  %v246_v15 = vld [vmem:[%s245_s12] sm:$0x1]  ;;  %s250_s20 = scalar_lea.vmem [#allocation7], %s5637_s28  ;;  %s6508_s5 = sld [smem:[#allocation34_spill]] }
  0x95   :  { %247 = vst.msk [vmem:[#allocation2 + $0xa] sm:$0x1] %vm196_vm0, %v246_v15  ;;  %v251_v16 = vld [vmem:[%s250_s20] sm:$0x1]  ;;  %s255_s21 = scalar_lea.vmem [#allocation7], %s4233_s0  ;;  %s5469_s30 = smov [#allocation24]  }
  0x96   :  { %252 = vst.msk [vmem:[#allocation2 + $0xb] sm:$0x1] %vm196_vm0, %v251_v16  ;;  %v256_v17 = vld [vmem:[%s255_s21] sm:$0x1]  ;;  %s260_s22 = scalar_lea.vmem [#allocation7], %s4234_s6  ;;  %s4192_s0 = sshll.u32 %s5469_s30, 4  ;;  %s4193_s0 = int_to_ptr.vmem [resolvable:$true] %s4192_s0 }
  0x97   :  { %257 = vst.msk [vmem:[#allocation2 + $0xc] sm:$0x1] %vm196_vm0, %v256_v17  ;;  %v261_v18 = vld [vmem:[%s260_s22] sm:$0x1]  ;;  %s265_s23 = scalar_lea.vmem [#allocation7], %s4235_s18  ;;  %s5415_s17 = scalar_lea.vmem %s4193_s0, 128 }
  0x98   :  { %262 = vst.msk [vmem:[#allocation2 + $0xd] sm:$0x1] %vm196_vm0, %v261_v18  ;;  %v266_v19 = vld [vmem:[%s265_s23] sm:$0x1]  ;;  %s270_s14 = scalar_lea.vmem [#allocation7], %s4236_s19  ;;  %p5416_p8 = scmp.ne.s32.totalorder %s4193_s0, %s5415_s17 }
  0x99   :  { %v273_v20 = vld [vmem:[#allocation2] sm:$0xff]  ;;  %267 = vst.msk [vmem:[#allocation2 + $0xe] sm:$0x1] %vm196_vm0, %v266_v19  ;;  %p5420_p9 = scmp.lt.s32.totalorder %s4193_s0, %s4193_s0  ;;  %p5421_p10 = scmp.lt.s32.totalorder %s5415_s17, %s5415_s17 }
  0x9a   :  { %v271_v21 = vld [vmem:[%s270_s14] sm:$0x1]  ;;  %4510 = vmatprep.mubr.msk.f32.mxu0 %vm286_vm1, %v273_v20  ;;  %4521 = vmatprep.mubr.msk.f32.mxu1 %vm286_vm1, %v273_v20 }
  0x9b   :  { %272 = vst.msk [vmem:[#allocation2 + $0xf] sm:$0x1] %vm196_vm0, %v271_v21  ;;  %p5422_p11 = por %p5421_p10, %p5420_p9 }
  0x9d   :  { %p5423_p12 = pnand %p5422_p11, %p5416_p8 }
  0xa2   :  { %v5663_v23 = vld [vmem:[#allocation2 + $0x8] sm:$0xff] }
  0xa3   :  { %4511 = vmatmul.mubr.msk.f32.vlgmr.msra.gmra.mxu0 %vm286_vm1, %v5663_v23  ;;  %4522 = vmatmul.mubr.msk.f32.vlgmr.msra.gmra.mxu1 %vm286_vm1, %v5663_v23 }
  0xa4   :  { %4525 = vmatpush3.msra.mxu0 %v5661_v22  ;;  %4532 = vmatprep.mubr.msk.f32.mxu0 %vm5465_vm2, %v5464_v12 }
  0xa5   :  { %4526 = vmatprep.subr.mxu0 %v5464_v12  ;;  %4536 = vmatpush3.msra.mxu1 %v5661_v22 }
  0xa6   :  { %4527 = vmatpush3.msra.mxu0 %v5667_v24  ;;  %4543 = vmatprep.mubr.msk.f32.mxu1 %vm5465_vm2, %v5464_v12 }
  0xa7   :  { %4528 = vmatprep.subr.mxu0 %v5464_v12  ;;  %4537 = vmatprep.subr.mxu1 %v5464_v12 }
  0xa8   :  { %4529 = vmatpush3.msra.mxu0 %v5673_v25  ;;  %4538 = vmatpush3.msra.mxu1 %v5667_v24 }
  0xa9   :  { %4530 = vmatprep.subr.mxu0 %v5464_v12  ;;  %4539 = vmatprep.subr.mxu1 %v5464_v12 }
  0xaa   :  { %4531 = vmatpush3.msra.mxu0 %v5677_v26  ;;  %4540 = vmatpush3.msra.mxu1 %v5673_v25 }
  0xab   :  { %4533 = vmatmul.mubr.f32.vlgmr.msra.gmra.mxu0 %v5464_v12  ;;  %4546 = vmatprep.subr.mxu0 %v5464_v12 }
  0xac   :  { %4547 = vmatpush3.msra.mxu0 %v5661_v22  ;;  %4554 = vmatprep.mubr.msk.f32.mxu0 %vm5465_vm2, %v5464_v12 }
  0xad   :  { %4548 = vmatprep.subr.mxu0 %v5464_v12  ;;  %4541 = vmatprep.subr.mxu1 %v5464_v12 }
  0xae   :  { %4549 = vmatpush3.msra.mxu0 %v5667_v24  ;;  %4542 = vmatpush3.msra.mxu1 %v5677_v26 }
  0xaf   :  { %4550 = vmatprep.subr.mxu0 %v5464_v12  ;;  %4557 = vmatprep.subr.mxu1 %v5464_v12 }
  0xb0   :  { %4551 = vmatpush3.msra.mxu0 %v5673_v25 }
  0xb1   :  { %4552 = vmatprep.subr.mxu0 %v5464_v12 }
  0xb2   :  { %4553 = vmatpush3.msra.mxu0 %v5677_v26 }
  0xb3   :  { %4568 = vmatprep.subr.mxu0 %v5464_v12 }
 0x163   :  { %v4512_v28 = vpop.f32.mrf.mxu0  ;;  %v5734_v53 = vpop.f32.mrf.mxu1 }
 0x164   :  { %v5697_v29 = vadd.f32 %v4512_v28, %v4237_v27 }
 0x165   :  { %v359_v30 = vpop.f32.mrf.mxu0  ;;  %v5736_v54 = vpop.f32.mrf.mxu1 }
 0x166   :  { %v5699_v31 = vadd.f32 %v4237_v27, %v359_v30 }
 0x16b   :  { %v527_v32 = vpop.f32.mrf.mxu0 }
 0x16c   :  { %v531_v33 = vadd.f32 %v527_v32, %v5699_v31 }
 0x16d   :  { %v4534_v34 = vpop.f32.mrf.mxu0 }
 0x16e   :  { %4891 = vtanh.f32 %v531_v33  ;;  %v4243_v36 = vmul.f32 -1.442695, %v531_v33 }
 0x170   :  { %4893 = vpow2.f32 %v4243_v36 }
 0x17b   :  { %v4892_v35 = vpop.eup %4891 }
 0x17c   :  { %541 = vrot.lane.b32.xlu0 %v4892_v35, %s5466_s2 }
 0x17d   :  { %v4894_v37 = vpop.eup %4893 }
 0x17e   :  { %v535_v38 = vadd.f32 1.0, %v4894_v37 }
 0x180   :  { %4895 = vrcp.f32 %v535_v38 }
 0x18d   :  { %v4896_v39 = vpop.eup %4895 }
 0x18e   :  { %v539_v42 = vmul.f32 0.0, %v4896_v39 }
 0x1ee   :  { %v542_v40 = vpop.permute.xlu0 %541 }
 0x1ef   :  { %v544_v41 = vmul.f32 %v4896_v39, %v542_v40 }
 0x1f1   :  { %546 = vrot.lane.b32.xlu0 %v544_v41, %s5467_s4 }
 0x263   :  { %v547_v43 = vpop.permute.xlu0 %546 }
 0x264   :  { %v5704_v44 = vadd.f32 %v547_v43, %v539_v42 }
 0x266   :  { %4897 = vtanh.f32 %v5704_v44  ;;  %v653_v10 = vrot.slane %v5704_v44, 7 }
 0x273   :  { %v4898_v49 = vpop.eup %4897 }
 0x274   :  { %552 = vrot.lane.b32.xlu1 %v4898_v49, %s5466_s2 }
 0x2e6   :  { %v553_v50 = vpop.permute.xlu1 %552 }
 0x2e7   :  { %v555_v51 = vmul.f32 %v4896_v39, %v553_v50 }
 0x2e9   :  { %557 = vrot.lane.b32.xlu1 %v555_v51, %s5467_s4 }
 0x35b   :  { %v558_v52 = vpop.permute.xlu1 %557 }
 0x35c   :  { %560 = vst.msk [vmem:[#allocation3] sm:$0xff] %vm286_vm1, %v558_v52  ;;  %4544 = vmatmul.mubr.msk.f32.vlgmr.msra.gmra.mxu1 %vm286_vm1, %v558_v52 }
 0x35d   :  { %4558 = vmatpush3.msra.mxu1 %v5661_v22  ;;  %4565 = vmatprep.mubr.msk.f32.mxu1 %vm5465_vm2, %v5464_v12 }
 0x35e   :  { %4559 = vmatprep.subr.mxu1 %v5464_v12 }
 0x35f   :  { %4560 = vmatpush3.msra.mxu1 %v5667_v24 }
 0x360   :  { %4561 = vmatprep.subr.mxu1 %v5464_v12 }
 0x361   :  { %4562 = vmatpush3.msra.mxu1 %v5673_v25 }
 0x362   :  { %4563 = vmatprep.subr.mxu1 %v5464_v12 }
 0x363   :  { %4564 = vmatpush3.msra.mxu1 %v5677_v26 }
 0x364   :  { %4579 = vmatprep.subr.mxu1 %v5464_v12 }
 0x41c   :  { %v629_v55 = vpop.f32.mrf.mxu1 }
 0x41d   :  { %v634_v56 = vrot.slane %v629_v55, 7 }
 0x41e   :  { %v4545_v57 = vpop.f32.mrf.mxu1 }
 0x41f   :  { %v636_v58 = vadd.f32 %v634_v56, %v5699_v31  ;;  %v637_v59 = vadd.f32 %v634_v56, %v5697_v29 }
 0x421   :  { %4899 = vtanh.f32 %v636_v58  ;;  %v4245_v62 = vmul.f32 -1.442695, %v636_v58  ;;  %v4246_v63 = vmul.f32 -1.442695, %v637_v59 }
 0x422   :  { %4901 = vtanh.f32 %v637_v59 }
 0x423   :  { %4903 = vpow2.f32 %v4245_v62 }
 0x424   :  { %4905 = vpow2.f32 %v4246_v63 }
 0x42e   :  { %v4900_v60 = vpop.eup %4899 }
 0x42f   :  { %v4902_v61 = vpop.eup %4901  ;;  %659 = vrot.lane.b32.xlu0 %v4900_v60, %s5466_s2 }
 0x430   :  { %661 = vrot.lane.b32.xlu1 %v4902_v61, %s5466_s2  ;;  %v4904_v0 = vpop.eup %4903 }
 0x431   :  { %v4906_v1 = vpop.eup %4905  ;;  %v644_v2 = vadd.f32 1.0, %v4904_v0 }
 0x432   :  { %v645_v3 = vadd.f32 1.0, %v4906_v1 }
 0x433   :  { %4907 = vrcp.f32 %v644_v2 }
 0x434   :  { %4909 = vrcp.f32 %v645_v3 }
 0x440   :  { %v4908_v4 = vpop.eup %4907 }
 0x441   :  { %v4910_v6 = vpop.eup %4909  ;;  %v655_v11 = vmul.f32 %v4908_v4, %v653_v10 }
 0x442   :  { %v656_v13 = vmul.f32 %v4910_v6, %v653_v10 }
 0x4a1   :  { %v660_v5 = vpop.permute.xlu0 %659 }
 0x4a2   :  { %v662_v7 = vpop.permute.xlu1 %661  ;;  %v665_v8 = vmul.f32 %v4908_v4, %v660_v5 }
 0x4a3   :  { %v666_v9 = vmul.f32 %v4910_v6, %v662_v7 }
 0x4a4   :  { %669 = vrot.lane.b32.xlu0 %v665_v8, %s5467_s4 }
 0x4a5   :  { %671 = vrot.lane.b32.xlu1 %v666_v9, %s5467_s4 }
 0x516   :  { %v670_v14 = vpop.permute.xlu0 %669 }
 0x517   :  { %v672_v15 = vpop.permute.xlu1 %671  ;;  %v675_v16 = vadd.f32 %v670_v14, %v655_v11 }
 0x518   :  { %v676_v17 = vadd.f32 %v672_v15, %v656_v13 }
 0x519   :  { %4911 = vtanh.f32 %v675_v16  ;;  %v800_v18 = vrot.slane %v675_v16, 7 }
 0x51a   :  { %4913 = vtanh.f32 %v676_v17  ;;  %v801_v19 = vrot.slane %v676_v17, 7 }
 0x51c   :  { %v802_v20 = vsel %vm799_vm3, %v800_v18, %v801_v19 }
 0x526   :  { %v4912_v21 = vpop.eup %4911 }
 0x527   :  { %v4914_v23 = vpop.eup %4913  ;;  %681 = vrot.lane.b32.xlu0 %v4912_v21, %s5466_s2 }
 0x528   :  { %683 = vrot.lane.b32.xlu1 %v4914_v23, %s5466_s2 }
 0x599   :  { %v682_v27 = vpop.permute.xlu0 %681 }
 0x59a   :  { %v684_v28 = vpop.permute.xlu1 %683  ;;  %v5748_v30 = vmul.f32 %v4908_v4, %v682_v27 }
 0x59b   :  { %v5750_v32 = vmul.f32 %v4910_v6, %v684_v28 }
 0x59c   :  { %v701_v33 = vrot.slane %v5748_v30, 1 }
 0x59d   :  { %v702_v34 = vrot.slane %v5750_v32, 1 }
 0x59f   :  { %v703_v35 = vsel %vm700_vm4, %v701_v33, %v702_v34 }
 0x5a0   :  { %704 = vrot.lane.b32.xlu0 %v703_v35, %s5467_s4 }
 0x612   :  { %v705_v36 = vpop.permute.xlu0 %704 }
 0x613   :  { %4555 = vmatmul.mubr.msk.f32.vlgmr.msra.gmra.mxu0 %vm286_vm1, %v705_v36 }
 0x614   :  { %4569 = vmatpush3.msra.mxu0 %v5661_v22  ;;  %4576 = vmatprep.mubr.msk.f32.mxu0 %vm5465_vm2, %v5464_v12 }
 0x615   :  { %4570 = vmatprep.subr.mxu0 %v5464_v12 }
 0x616   :  { %4571 = vmatpush3.msra.mxu0 %v5667_v24 }
 0x617   :  { %4572 = vmatprep.subr.mxu0 %v5464_v12 }
 0x618   :  { %4573 = vmatpush3.msra.mxu0 %v5673_v25 }
 0x619   :  { %4574 = vmatprep.subr.mxu0 %v5464_v12 }
 0x61a   :  { %4575 = vmatpush3.msra.mxu0 %v5677_v26 }
 0x61b   :  { %4590 = vmatprep.subr.mxu0 %v5464_v12 }
 0x6d3   :  { %v774_v37 = vpop.f32.mrf.mxu0 }
 0x6d4   :  { %v779_v38 = vrot.slane %v774_v37, 6 }
 0x6d5   :  { %v4556_v39 = vpop.f32.mrf.mxu0 }
 0x6d6   :  { %v781_v40 = vadd.f32 %v779_v38, %v5699_v31  ;;  %v782_v41 = vadd.f32 %v779_v38, %v5697_v29 }
 0x6d8   :  { %4915 = vtanh.f32 %v781_v40  ;;  %v4248_v44 = vmul.f32 -1.442695, %v781_v40  ;;  %v4249_v45 = vmul.f32 -1.442695, %v782_v41 }
 0x6d9   :  { %4917 = vtanh.f32 %v782_v41 }
 0x6da   :  { %4919 = vpow2.f32 %v4248_v44 }
 0x6db   :  { %4921 = vpow2.f32 %v4249_v45 }
 0x6e5   :  { %v4916_v42 = vpop.eup %4915 }
 0x6e6   :  { %v4918_v43 = vpop.eup %4917  ;;  %809 = vrot.lane.b32.xlu1 %v4916_v42, %s5466_s2 }
 0x6e7   :  { %811 = vrot.lane.b32.xlu0 %v4918_v43, %s5466_s2  ;;  %v4920_v46 = vpop.eup %4919 }
 0x6e8   :  { %v4922_v47 = vpop.eup %4921  ;;  %v789_v48 = vadd.f32 1.0, %v4920_v46 }
 0x6e9   :  { %v790_v49 = vadd.f32 1.0, %v4922_v47 }
 0x6ea   :  { %4923 = vrcp.f32 %v789_v48 }
 0x6eb   :  { %4925 = vrcp.f32 %v790_v49 }
 0x6f7   :  { %v4924_v50 = vpop.eup %4923 }
 0x6f8   :  { %v4926_v52 = vpop.eup %4925  ;;  %v805_v58 = vmul.f32 %v4924_v50, %v800_v18 }
 0x6f9   :  { %v806_v59 = vmul.f32 %v4926_v52, %v802_v20 }
 0x758   :  { %v810_v51 = vpop.permute.xlu1 %809 }
 0x759   :  { %v812_v55 = vpop.permute.xlu0 %811  ;;  %v815_v56 = vmul.f32 %v4924_v50, %v810_v51 }
 0x75a   :  { %v816_v57 = vmul.f32 %v4926_v52, %v812_v55 }
 0x75b   :  { %819 = vrot.lane.b32.xlu1 %v815_v56, %s5467_s4 }
 0x75c   :  { %821 = vrot.lane.b32.xlu0 %v816_v57, %s5467_s4 }
 0x7cd   :  { %v820_v60 = vpop.permute.xlu1 %819 }
 0x7ce   :  { %v822_v61 = vpop.permute.xlu0 %821  ;;  %v825_v62 = vadd.f32 %v820_v60, %v805_v58 }
 0x7cf   :  { %v826_v63 = vadd.f32 %v822_v61, %v806_v59 }
 0x7d0   :  { %4927 = vtanh.f32 %v825_v62  ;;  %v950_v0 = vrot.slane %v825_v62, 7 }
 0x7d1   :  { %4929 = vtanh.f32 %v826_v63  ;;  %v951_v1 = vrot.slane %v826_v63, 7 }
 0x7d3   :  { %v952_v2 = vsel %vm799_vm3, %v950_v0, %v951_v1 }
 0x7dd   :  { %v4928_v3 = vpop.eup %4927 }
 0x7de   :  { %v4930_v4 = vpop.eup %4929  ;;  %831 = vrot.lane.b32.xlu1 %v4928_v3, %s5466_s2 }
 0x7df   :  { %833 = vrot.lane.b32.xlu0 %v4930_v4, %s5466_s2 }
 0x850   :  { %v832_v5 = vpop.permute.xlu1 %831 }
 0x851   :  { %v834_v6 = vpop.permute.xlu0 %833  ;;  %v5776_v7 = vmul.f32 %v4924_v50, %v832_v5 }
 0x852   :  { %v5778_v8 = vmul.f32 %v4926_v52, %v834_v6 }
 0x853   :  { %v852_v9 = vrot.slane %v5776_v7, 2 }
 0x854   :  { %v853_v10 = vrot.slane %v5778_v8, 2 }
 0x856   :  { %v854_v11 = vsel %vm851_vm5, %v852_v9, %v853_v10 }
 0x857   :  { %855 = vrot.lane.b32.xlu1 %v854_v11, %s5467_s4 }
 0x8c9   :  { %v856_v13 = vpop.permute.xlu1 %855 }
 0x8ca   :  { %4566 = vmatmul.mubr.msk.f32.vlgmr.msra.gmra.mxu1 %vm286_vm1, %v856_v13 }
 0x8cb   :  { %4580 = vmatpush3.msra.mxu1 %v5661_v22  ;;  %4587 = vmatprep.mubr.msk.f32.mxu1 %vm5465_vm2, %v5464_v12 }
 0x8cc   :  { %4581 = vmatprep.subr.mxu1 %v5464_v12 }
 0x8cd   :  { %4582 = vmatpush3.msra.mxu1 %v5667_v24 }
 0x8ce   :  { %4583 = vmatprep.subr.mxu1 %v5464_v12 }
 0x8cf   :  { %4584 = vmatpush3.msra.mxu1 %v5673_v25 }
 0x8d0   :  { %4585 = vmatprep.subr.mxu1 %v5464_v12 }
 0x8d1   :  { %4586 = vmatpush3.msra.mxu1 %v5677_v26 }
 0x8d2   :  { %4601 = vmatprep.subr.mxu1 %v5464_v12 }
 0x98a   :  { %v925_v14 = vpop.f32.mrf.mxu1 }
 0x98b   :  { %v930_v15 = vrot.slane %v925_v14, 5 }
 0x98c   :  { %v4567_v16 = vpop.f32.mrf.mxu1 }
 0x98d   :  { %v932_v17 = vadd.f32 %v930_v15, %v5699_v31  ;;  %v933_v18 = vadd.f32 %v930_v15, %v5697_v29 }
 0x98f   :  { %4931 = vtanh.f32 %v932_v17  ;;  %v4251_v21 = vmul.f32 -1.442695, %v932_v17  ;;  %v4252_v23 = vmul.f32 -1.442695, %v933_v18 }
 0x990   :  { %4933 = vtanh.f32 %v933_v18 }
 0x991   :  { %4935 = vpow2.f32 %v4251_v21 }
 0x992   :  { %4937 = vpow2.f32 %v4252_v23 }
 0x99c   :  { %v4932_v19 = vpop.eup %4931 }
 0x99d   :  { %v4934_v20 = vpop.eup %4933  ;;  %959 = vrot.lane.b32.xlu0 %v4932_v19, %s5466_s2 }
 0x99e   :  { %961 = vrot.lane.b32.xlu1 %v4934_v20, %s5466_s2  ;;  %v4936_v27 = vpop.eup %4935 }
 0x99f   :  { %v4938_v28 = vpop.eup %4937  ;;  %v940_v33 = vadd.f32 1.0, %v4936_v27 }
 0x9a0   :  { %v941_v34 = vadd.f32 1.0, %v4938_v28 }
 0x9a1   :  { %4939 = vrcp.f32 %v940_v33 }
 0x9a2   :  { %4941 = vrcp.f32 %v941_v34 }
 0x9ae   :  { %v4940_v35 = vpop.eup %4939 }
 0x9af   :  { %v4942_v37 = vpop.eup %4941  ;;  %v955_v41 = vmul.f32 %v4940_v35, %v950_v0 }
 0x9b0   :  { %v956_v42 = vmul.f32 %v4942_v37, %v952_v2 }
 0xa0f   :  { %v960_v36 = vpop.permute.xlu0 %959 }
 0xa10   :  { %v962_v38 = vpop.permute.xlu1 %961  ;;  %v965_v39 = vmul.f32 %v4940_v35, %v960_v36 }
 0xa11   :  { %v966_v40 = vmul.f32 %v4942_v37, %v962_v38 }
 0xa12   :  { %969 = vrot.lane.b32.xlu0 %v965_v39, %s5467_s4 }
 0xa13   :  { %971 = vrot.lane.b32.xlu1 %v966_v40, %s5467_s4 }
 0xa84   :  { %v970_v43 = vpop.permute.xlu0 %969 }
 0xa85   :  { %v972_v44 = vpop.permute.xlu1 %971  ;;  %v975_v45 = vadd.f32 %v970_v43, %v955_v41 }
 0xa86   :  { %v976_v46 = vadd.f32 %v972_v44, %v956_v42 }
 0xa87   :  { %4943 = vtanh.f32 %v975_v45  ;;  %v1100_v47 = vrot.slane %v975_v45, 7 }
 0xa88   :  { %4945 = vtanh.f32 %v976_v46  ;;  %v1101_v48 = vrot.slane %v976_v46, 7 }
 0xa8a   :  { %v1102_v49 = vsel %vm799_vm3, %v1100_v47, %v1101_v48 }
 0xa94   :  { %v4944_v50 = vpop.eup %4943 }
 0xa95   :  { %v4946_v51 = vpop.eup %4945  ;;  %981 = vrot.lane.b32.xlu0 %v4944_v50, %s5466_s2 }
 0xa96   :  { %983 = vrot.lane.b32.xlu1 %v4946_v51, %s5466_s2 }
 0xb07   :  { %v982_v52 = vpop.permute.xlu0 %981 }
 0xb08   :  { %v984_v55 = vpop.permute.xlu1 %983  ;;  %v5804_v56 = vmul.f32 %v4940_v35, %v982_v52 }
 0xb09   :  { %v5806_v57 = vmul.f32 %v4942_v37, %v984_v55 }
 0xb0a   :  { %v1002_v58 = vrot.slane %v5804_v56, 3 }
 0xb0b   :  { %v1003_v59 = vrot.slane %v5806_v57, 3 }
 0xb0d   :  { %v1004_v60 = vsel %vm1001_vm6, %v1002_v58, %v1003_v59 }
 0xb0e   :  { %1005 = vrot.lane.b32.xlu0 %v1004_v60, %s5467_s4 }
 0xb80   :  { %v1006_v61 = vpop.permute.xlu0 %1005 }
 0xb81   :  { %4577 = vmatmul.mubr.msk.f32.vlgmr.msra.gmra.mxu0 %vm286_vm1, %v1006_v61 }
 0xb82   :  { %4591 = vmatpush3.msra.mxu0 %v5661_v22  ;;  %4598 = vmatprep.mubr.msk.f32.mxu0 %vm5465_vm2, %v5464_v12 }
 0xb83   :  { %4592 = vmatprep.subr.mxu0 %v5464_v12 }
 0xb84   :  { %4593 = vmatpush3.msra.mxu0 %v5667_v24 }
 0xb85   :  { %4594 = vmatprep.subr.mxu0 %v5464_v12 }
 0xb86   :  { %4595 = vmatpush3.msra.mxu0 %v5673_v25 }
 0xb87   :  { %4596 = vmatprep.subr.mxu0 %v5464_v12 }
 0xb88   :  { %4597 = vmatpush3.msra.mxu0 %v5677_v26 }
 0xb89   :  { %4612 = vmatprep.subr.mxu0 %v5464_v12 }
 0xc41   :  { %v1075_v62 = vpop.f32.mrf.mxu0 }
 0xc42   :  { %v1080_v63 = vrot.slane %v1075_v62, 4 }
 0xc43   :  { %v4578_v0 = vpop.f32.mrf.mxu0 }
 0xc44   :  { %v1082_v1 = vadd.f32 %v1080_v63, %v5699_v31  ;;  %v1083_v2 = vadd.f32 %v1080_v63, %v5697_v29 }
 0xc46   :  { %4947 = vtanh.f32 %v1082_v1  ;;  %v4254_v5 = vmul.f32 -1.442695, %v1082_v1  ;;  %v4255_v6 = vmul.f32 -1.442695, %v1083_v2 }
 0xc47   :  { %4949 = vtanh.f32 %v1083_v2 }
 0xc48   :  { %4951 = vpow2.f32 %v4254_v5 }
 0xc49   :  { %4953 = vpow2.f32 %v4255_v6 }
 0xc53   :  { %v4948_v3 = vpop.eup %4947 }
 0xc54   :  { %v4950_v4 = vpop.eup %4949  ;;  %1109 = vrot.lane.b32.xlu1 %v4948_v3, %s5466_s2 }
 0xc55   :  { %1111 = vrot.lane.b32.xlu0 %v4950_v4, %s5466_s2  ;;  %v4952_v9 = vpop.eup %4951 }
 0xc56   :  { %v4954_v10 = vpop.eup %4953  ;;  %v1090_v11 = vadd.f32 1.0, %v4952_v9 }
 0xc57   :  { %v1091_v13 = vadd.f32 1.0, %v4954_v10 }
 0xc58   :  { %4955 = vrcp.f32 %v1090_v11 }
 0xc59   :  { %4957 = vrcp.f32 %v1091_v13 }
 0xc65   :  { %v4956_v14 = vpop.eup %4955 }
 0xc66   :  { %v4958_v16 = vpop.eup %4957  ;;  %v1105_v20 = vmul.f32 %v4956_v14, %v1100_v47 }
 0xc67   :  { %v1106_v21 = vmul.f32 %v4958_v16, %v1102_v49 }
 0xcc6   :  { %v1110_v15 = vpop.permute.xlu1 %1109 }
 0xcc7   :  { %v1112_v17 = vpop.permute.xlu0 %1111  ;;  %v1115_v18 = vmul.f32 %v4956_v14, %v1110_v15 }
 0xcc8   :  { %v1116_v19 = vmul.f32 %v4958_v16, %v1112_v17 }
 0xcc9   :  { %1119 = vrot.lane.b32.xlu1 %v1115_v18, %s5467_s4 }
 0xcca   :  { %1121 = vrot.lane.b32.xlu0 %v1116_v19, %s5467_s4 }
 0xd3b   :  { %v1120_v23 = vpop.permute.xlu1 %1119 }
 0xd3c   :  { %v1122_v27 = vpop.permute.xlu0 %1121  ;;  %v1125_v28 = vadd.f32 %v1120_v23, %v1105_v20 }
 0xd3d   :  { %v1126_v33 = vadd.f32 %v1122_v27, %v1106_v21  ;;  %v5876_v27 = vld [vmem:[#allocation15 + $0x18] sm:$0xff] }
 0xd3e   :  { %4959 = vtanh.f32 %v1125_v28  ;;  %v1250_v34 = vrot.slane %v1125_v28, 7 }
 0xd3f   :  { %4961 = vtanh.f32 %v1126_v33  ;;  %v1251_v35 = vrot.slane %v1126_v33, 7  ;;  %v5879_v33 = vld [vmem:[#allocation15 + $0x10] sm:$0xff] }
 0xd41   :  { %v1252_v36 = vsel %vm799_vm3, %v1250_v34, %v1251_v35  ;;  %v5889_v35 = vld [vmem:[#allocation15] sm:$0xff] }
 0xd4b   :  { %v4960_v37 = vpop.eup %4959 }
 0xd4c   :  { %v4962_v38 = vpop.eup %4961  ;;  %1131 = vrot.lane.b32.xlu1 %v4960_v37, %s5466_s2 }
 0xd4d   :  { %1133 = vrot.lane.b32.xlu0 %v4962_v38, %s5466_s2 }
 0xdbe   :  { %v1132_v39 = vpop.permute.xlu1 %1131 }
 0xdbf   :  { %v1134_v40 = vpop.permute.xlu0 %1133  ;;  %v5832_v41 = vmul.f32 %v4956_v14, %v1132_v39 }
 0xdc0   :  { %v5834_v42 = vmul.f32 %v4958_v16, %v1134_v40 }
 0xdc1   :  { %v1152_v43 = vrot.slane %v5832_v41, 4 }
 0xdc2   :  { %v1153_v44 = vrot.slane %v5834_v42, 4 }
 0xdc4   :  { %v1154_v45 = vsel %vm1151_vm7, %v1152_v43, %v1153_v44  ;;  %v4240_v43 = vld [vmem:[%s6495_s7] ss:$0 sm:$0xff] }
 0xdc5   :  { %1155 = vrot.lane.b32.xlu1 %v1154_v45, %s5467_s4  ;;  %v5912_v45 = vadd.f32 %v5734_v53, %v4240_v43 }
 0xe37   :  { %v1156_v46 = vpop.permute.xlu1 %1155 }
 0xe38   :  { %4588 = vmatmul.mubr.msk.f32.vlgmr.msra.gmra.mxu1 %vm286_vm1, %v1156_v46  ;;  %v5915_v46 = vadd.f32 %v4240_v43, %v5736_v54 }
 0xe39   :  { %4602 = vmatpush3.msra.mxu1 %v5661_v22  ;;  %4609 = vmatprep.mubr.msk.f32.mxu1 %vm5465_vm2, %v5464_v12 }
 0xe3a   :  { %4603 = vmatprep.subr.mxu1 %v5464_v12 }
 0xe3b   :  { %4604 = vmatpush3.msra.mxu1 %v5667_v24 }
 0xe3c   :  { %4605 = vmatprep.subr.mxu1 %v5464_v12 }
 0xe3d   :  { %4606 = vmatpush3.msra.mxu1 %v5673_v25 }
 0xe3e   :  { %4607 = vmatprep.subr.mxu1 %v5464_v12 }
 0xe3f   :  { %4608 = vmatpush3.msra.mxu1 %v5677_v26 }
 0xe40   :  { %4623 = vmatprep.subr.mxu1 %v5464_v12 }
 0xef8   :  { %v1225_v47 = vpop.f32.mrf.mxu1 }
 0xef9   :  { %v1230_v48 = vrot.slane %v1225_v47, 3 }
 0xefa   :  { %v4589_v22 = vpop.f32.mrf.mxu1 }
 0xefb   :  { %v1232_v49 = vadd.f32 %v1230_v48, %v5699_v31  ;;  %v1233_v50 = vadd.f32 %v1230_v48, %v5697_v29 }
 0xefd   :  { %4963 = vtanh.f32 %v1232_v49  ;;  %v4257_v25 = vmul.f32 -1.442695, %v1232_v49  ;;  %v4258_v52 = vmul.f32 -1.442695, %v1233_v50 }
 0xefe   :  { %4965 = vtanh.f32 %v1233_v50 }
 0xeff   :  { %4967 = vpow2.f32 %v4257_v25 }
 0xf00   :  { %4969 = vpow2.f32 %v4258_v52 }
 0xf0a   :  { %v4964_v24 = vpop.eup %4963 }
 0xf0b   :  { %v4966_v51 = vpop.eup %4965  ;;  %1259 = vrot.lane.b32.xlu0 %v4964_v24, %s5466_s2 }
 0xf0c   :  { %1261 = vrot.lane.b32.xlu1 %v4966_v51, %s5466_s2  ;;  %v4968_v26 = vpop.eup %4967 }
 0xf0d   :  { %v4970_v55 = vpop.eup %4969  ;;  %v1240_v58 = vadd.f32 1.0, %v4968_v26 }
 0xf0e   :  { %v1241_v59 = vadd.f32 1.0, %v4970_v55 }
 0xf0f   :  { %4971 = vrcp.f32 %v1240_v58 }
 0xf10   :  { %4973 = vrcp.f32 %v1241_v59 }
 0xf1c   :  { %v4972_v60 = vpop.eup %4971 }
 0xf1d   :  { %v4974_v62 = vpop.eup %4973  ;;  %v1255_v2 = vmul.f32 %v4972_v60, %v1250_v34  ;;  %v5885_v34 = vld [vmem:[#allocation15 + $0x8] sm:$0xff] }
 0xf1e   :  { %v1256_v3 = vmul.f32 %v4974_v62, %v1252_v36 }
 0xf7d   :  { %v1260_v61 = vpop.permute.xlu0 %1259 }
 0xf7e   :  { %v1262_v63 = vpop.permute.xlu1 %1261  ;;  %v1265_v0 = vmul.f32 %v4972_v60, %v1260_v61 }
 0xf7f   :  { %v1266_v1 = vmul.f32 %v4974_v62, %v1262_v63 }
 0xf80   :  { %1269 = vrot.lane.b32.xlu0 %v1265_v0, %s5467_s4 }
 0xf81   :  { %1271 = vrot.lane.b32.xlu1 %v1266_v1, %s5467_s4 }
 0xff2   :  { %v1270_v4 = vpop.permute.xlu0 %1269 }
 0xff3   :  { %v1272_v5 = vpop.permute.xlu1 %1271  ;;  %v5857_v6 = vadd.f32 %v1270_v4, %v1255_v2 }
 0xff4   :  { %v1276_v9 = vadd.f32 %v1272_v5, %v1256_v3 }
 0xff5   :  { %4975 = vtanh.f32 %v5857_v6  ;;  %v1400_v10 = vrot.slane %v5857_v6, 7 }
 0xff6   :  { %4977 = vtanh.f32 %v1276_v9  ;;  %v1401_v11 = vrot.slane %v1276_v9, 7 }
 0xff8   :  { %v5864_v13 = vsel %vm799_vm3, %v1400_v10, %v1401_v11 }
0x1002   :  { %v4976_v14 = vpop.eup %4975 }
0x1003   :  { %v4978_v15 = vpop.eup %4977  ;;  %1281 = vrot.lane.b32.xlu0 %v4976_v14, %s5466_s2 }
0x1004   :  { %1283 = vrot.lane.b32.xlu1 %v4978_v15, %s5466_s2 }
0x1075   :  { %v1282_v16 = vpop.permute.xlu0 %1281 }
0x1076   :  { %v1284_v17 = vpop.permute.xlu1 %1283  ;;  %v5868_v18 = vmul.f32 %v4972_v60, %v1282_v16 }
0x1077   :  { %v5870_v19 = vmul.f32 %v4974_v62, %v1284_v17 }
0x1078   :  { %v1302_v20 = vrot.slane %v5868_v18, 5 }
0x1079   :  { %v1303_v21 = vrot.slane %v5870_v19, 5 }
0x107b   :  { %v1304_v23 = vsel %vm1301_vm8, %v1302_v20, %v1303_v21 }
0x107c   :  { %1305 = vrot.lane.b32.xlu0 %v1304_v23, %s5467_s4 }
0x10ee   :  { %v1306_v28 = vpop.permute.xlu0 %1305 }
0x10ef   :  { %4599 = vmatmul.mubr.msk.f32.vlgmr.msra.gmra.mxu0 %vm286_vm1, %v1306_v28 }
0x10f0   :  { %4613 = vmatpush3.msra.mxu0 %v5876_v27  ;;  %4620 = vmatprep.mubr.msk.f32.mxu0 %vm5465_vm2, %v5464_v12 }
0x10f1   :  { %4614 = vmatprep.subr.mxu0 %v5464_v12 }
0x10f2   :  { %4615 = vmatpush3.msra.mxu0 %v5879_v33 }
0x10f3   :  { %4616 = vmatprep.subr.mxu0 %v5464_v12 }
0x10f4   :  { %4617 = vmatpush3.msra.mxu0 %v5885_v34 }
0x10f5   :  { %4618 = vmatprep.subr.mxu0 %v5464_v12 }
0x10f6   :  { %4619 = vmatpush3.msra.mxu0 %v5889_v35 }
0x10f7   :  { %4621 = vmatmul.mubr.f32.vlgmr.msra.gmra.mxu0 %v5464_v12  ;;  %4634 = vmatprep.subr.mxu0 %v5464_v12 }
0x10f8   :  { %4635 = vmatpush3.msra.mxu0 %v5876_v27  ;;  %4642 = vmatprep.mubr.msk.f32.mxu0 %vm5465_vm2, %v5464_v12 }
0x10f9   :  { %4636 = vmatprep.subr.mxu0 %v5464_v12 }
0x10fa   :  { %4637 = vmatpush3.msra.mxu0 %v5879_v33 }
0x10fb   :  { %4638 = vmatprep.subr.mxu0 %v5464_v12 }
0x10fc   :  { %4639 = vmatpush3.msra.mxu0 %v5885_v34 }
0x10fd   :  { %4640 = vmatprep.subr.mxu0 %v5464_v12 }
0x10fe   :  { %4641 = vmatpush3.msra.mxu0 %v5889_v35 }
0x10ff   :  { %4656 = vmatprep.subr.mxu0 %v5464_v12 }
0x11af   :  { %v1375_v36 = vpop.f32.mrf.mxu0 }
0x11b0   :  { %v1380_v37 = vrot.slane %v1375_v36, 2 }
0x11b1   :  { %v4600_v38 = vpop.f32.mrf.mxu0 }
0x11b2   :  { %v1382_v39 = vadd.f32 %v1380_v37, %v5699_v31  ;;  %v1383_v40 = vadd.f32 %v1380_v37, %v5697_v29 }
0x11b4   :  { %4979 = vtanh.f32 %v1382_v39  ;;  %v4260_v54 = vmul.f32 -1.442695, %v1382_v39  ;;  %v4261_v25 = vmul.f32 -1.442695, %v1383_v40 }
0x11b5   :  { %4981 = vtanh.f32 %v1383_v40 }
0x11b7   :  { %v1671_v44 = vpop.f32.mrf.mxu0 }
0x11b8   :  { %v1676_v47 = vrot.slane %v1671_v44, 1 }
0x11b9   :  { %v4622_v48 = vpop.f32.mrf.mxu0 }
0x11ba   :  { %v1678_v22 = vadd.f32 %v1676_v47, %v5915_v46  ;;  %v1679_v49 = vadd.f32 %v1676_v47, %v5912_v45 }
0x11bc   :  { %4983 = vtanh.f32 %v1678_v22  ;;  %v4265_v52 = vmul.f32 -1.442695, %v1678_v22  ;;  %v4266_v26 = vmul.f32 -1.442695, %v1679_v49 }
0x11bd   :  { %4985 = vtanh.f32 %v1679_v49 }
0x11be   :  { %4987 = vpow2.f32 %v4260_v54 }
0x11bf   :  { %4989 = vpow2.f32 %v4261_v25 }
0x11c0   :  { %4991 = vpow2.f32 %v4265_v52 }
0x11c1   :  { %v4980_v50 = vpop.eup %4979  ;;  %4993 = vpow2.f32 %v4266_v26 }
0x11c2   :  { %v4982_v24 = vpop.eup %4981  ;;  %1409 = vrot.lane.b32.xlu1 %v4980_v50, %s5466_s2 }
0x11c3   :  { %1411 = vrot.lane.b32.xlu0 %v4982_v24, %s5466_s2 }
0x11c9   :  { %v4984_v51 = vpop.eup %4983 }
0x11ca   :  { %v4986_v53 = vpop.eup %4985  ;;  %1698 = vrot.lane.b32.xlu1 %v4984_v51, %s5466_s2 }
0x11cb   :  { %1700 = vrot.lane.b32.xlu0 %v4986_v53, %s5466_s2  ;;  %v4988_v55 = vpop.eup %4987 }
0x11cc   :  { %v4990_v58 = vpop.eup %4989  ;;  %v1390_v59 = vadd.f32 1.0, %v4988_v55 }
0x11cd   :  { %v1391_v60 = vadd.f32 1.0, %v4990_v58  ;;  %v4992_v61 = vpop.eup %4991 }
0x11ce   :  { %4995 = vrcp.f32 %v1390_v59  ;;  %v4994_v62 = vpop.eup %4993  ;;  %v1686_v63 = vadd.f32 1.0, %v4992_v61 }
0x11cf   :  { %4997 = vrcp.f32 %v1391_v60  ;;  %v1687_v0 = vadd.f32 1.0, %v4994_v62 }
0x11d0   :  { %4999 = vrcp.f32 %v1686_v63 }
0x11d1   :  { %5001 = vrcp.f32 %v1687_v0 }
0x11db   :  { %v4996_v1 = vpop.eup %4995 }
0x11dc   :  { %v4998_v3 = vpop.eup %4997  ;;  %v1405_v21 = vmul.f32 %v4996_v1, %v1400_v10 }
0x11dd   :  { %v5000_v11 = vpop.eup %4999  ;;  %v1406_v23 = vmul.f32 %v4998_v3, %v5864_v13 }
0x11de   :  { %v5002_v15 = vpop.eup %5001  ;;  %v1694_v39 = vmul.f32 0.0, %v5000_v11 }
0x11df   :  { %v1695_v40 = vmul.f32 0.0, %v5002_v15 }
0x1234   :  { %v1410_v2 = vpop.permute.xlu1 %1409 }
0x1235   :  { %v1412_v4 = vpop.permute.xlu0 %1411  ;;  %v1415_v5 = vmul.f32 %v4996_v1, %v1410_v2 }
0x1236   :  { %v1416_v9 = vmul.f32 %v4998_v3, %v1412_v4 }
0x1237   :  { %1419 = vrot.lane.b32.xlu1 %v1415_v5, %s5467_s4 }
0x1238   :  { %1421 = vrot.lane.b32.xlu0 %v1416_v9, %s5467_s4 }
0x123c   :  { %v1699_v14 = vpop.permute.xlu1 %1698 }
0x123d   :  { %v1701_v16 = vpop.permute.xlu0 %1700  ;;  %v1704_v17 = vmul.f32 %v5000_v11, %v1699_v14 }
0x123e   :  { %v1705_v20 = vmul.f32 %v5002_v15, %v1701_v16 }
0x123f   :  { %1708 = vrot.lane.b32.xlu1 %v1704_v17, %s5467_s4 }
0x1240   :  { %1710 = vrot.lane.b32.xlu0 %v1705_v20, %s5467_s4 }
0x12a9   :  { %v1420_v28 = vpop.permute.xlu1 %1419 }
0x12aa   :  { %v1422_v36 = vpop.permute.xlu0 %1421  ;;  %v5930_v37 = vadd.f32 %v1420_v28, %v1405_v21 }
0x12ab   :  { %v5932_v38 = vadd.f32 %v1422_v36, %v1406_v23 }
0x12ac   :  { %5003 = vtanh.f32 %v5930_v37 }
0x12ad   :  { %5005 = vtanh.f32 %v5932_v38 }
0x12b1   :  { %v1709_v43 = vpop.permute.xlu1 %1708 }
0x12b2   :  { %v1711_v44 = vpop.permute.xlu0 %1710  ;;  %v1714_v47 = vadd.f32 %v1709_v43, %v1694_v39 }
0x12b3   :  { %v5936_v48 = vadd.f32 %v1711_v44, %v1695_v40 }
0x12b4   :  { %5007 = vtanh.f32 %v1714_v47  ;;  %v1836_v6 = vrot.slane %v1714_v47, 1 }
0x12b5   :  { %5009 = vtanh.f32 %v5936_v48  ;;  %v1837_v10 = vrot.slane %v5936_v48, 1 }
0x12b7   :  { %v5943_v13 = vsel %vm700_vm4, %v1836_v6, %v1837_v10 }
0x12b9   :  { %v5004_v22 = vpop.eup %5003 }
0x12ba   :  { %v5006_v49 = vpop.eup %5005  ;;  %1431 = vrot.lane.b32.xlu1 %v5004_v22, %s5466_s2 }
0x12bb   :  { %1433 = vrot.lane.b32.xlu0 %v5006_v49, %s5466_s2 }
0x12c1   :  { %v5008_v50 = vpop.eup %5007 }
0x12c2   :  { %v5010_v24 = vpop.eup %5009  ;;  %1720 = vrot.lane.b32.xlu1 %v5008_v50, %s5466_s2 }
0x12c3   :  { %1722 = vrot.lane.b32.xlu0 %v5010_v24, %s5466_s2 }
0x132c   :  { %v1432_v51 = vpop.permute.xlu1 %1431 }
0x132d   :  { %v1434_v53 = vpop.permute.xlu0 %1433  ;;  %v5949_v54 = vmul.f32 %v4996_v1, %v1432_v51 }
0x132e   :  { %v5951_v25 = vmul.f32 %v4998_v3, %v1434_v53 }
0x132f   :  { %v1452_v52 = vrot.slane %v5949_v54, 6 }
0x1330   :  { %v1453_v26 = vrot.slane %v5951_v25, 6 }
0x1332   :  { %v1454_v55 = vsel %vm1451_vm9, %v1452_v52, %v1453_v26 }
0x1333   :  { %1455 = vrot.lane.b32.xlu1 %v1454_v55, %s5467_s4 }
0x1334   :  { %v1721_v58 = vpop.permute.xlu1 %1720 }
0x1335   :  { %v1723_v59 = vpop.permute.xlu0 %1722  ;;  %v5957_v60 = vmul.f32 %v5000_v11, %v1721_v58 }
0x1336   :  { %v5959_v61 = vmul.f32 %v5002_v15, %v1723_v59 }
0x1337   :  { %v1738_v62 = vrot.slane %v5957_v60, 7 }
0x1338   :  { %v1739_v63 = vrot.slane %v5959_v61, 7 }
0x133a   :  { %v1740_v0 = vsel %vm799_vm3, %v1738_v62, %v1739_v63 }
0x133b   :  { %1741 = vrot.lane.b32.xlu0 %v1740_v0, %s5467_s4 }
0x13a5   :  { %v1456_v1 = vpop.permute.xlu1 %1455 }
0x13a6   :  { %4610 = vmatmul.mubr.msk.f32.vlgmr.msra.gmra.mxu1 %vm286_vm1, %v1456_v1 }
0x13a7   :  { %4624 = vmatpush3.msra.mxu1 %v5876_v27  ;;  %4631 = vmatprep.mubr.msk.f32.mxu1 %vm5465_vm2, %v5464_v12 }
0x13a8   :  { %4625 = vmatprep.subr.mxu1 %v5464_v12 }
0x13a9   :  { %4626 = vmatpush3.msra.mxu1 %v5879_v33 }
0x13aa   :  { %4627 = vmatprep.subr.mxu1 %v5464_v12 }
0x13ab   :  { %4628 = vmatpush3.msra.mxu1 %v5885_v34 }
0x13ac   :  { %4629 = vmatprep.subr.mxu1 %v5464_v12 }
0x13ad   :  { %v5974_v2 = vpop.permute.xlu0 %1741  ;;  %4630 = vmatpush3.msra.mxu1 %v5889_v35 }
0x13ae   :  { %4632 = vmatmul.mubr.msk.f32.vlgmr.msra.gmra.mxu1 %vm286_vm1, %v5974_v2  ;;  %4645 = vmatprep.subr.mxu1 %v5464_v12 }
0x13af   :  { %4646 = vmatpush3.msra.mxu1 %v5876_v27  ;;  %4653 = vmatprep.mubr.msk.f32.mxu1 %vm5465_vm2, %v5464_v12 }
0x13b0   :  { %4647 = vmatprep.subr.mxu1 %v5464_v12 }
0x13b1   :  { %4648 = vmatpush3.msra.mxu1 %v5879_v33 }
0x13b2   :  { %4649 = vmatprep.subr.mxu1 %v5464_v12 }
0x13b3   :  { %4650 = vmatpush3.msra.mxu1 %v5885_v34 }
0x13b4   :  { %4651 = vmatprep.subr.mxu1 %v5464_v12 }
0x13b5   :  { %4652 = vmatpush3.msra.mxu1 %v5889_v35 }
0x13b6   :  { %4667 = vmatprep.subr.mxu1 %v5464_v12 }
0x1466   :  { %v5990_v3 = vpop.f32.mrf.mxu1 }
0x1468   :  { %v4611_v4 = vpop.f32.mrf.mxu1 }
0x146e   :  { %v1811_v5 = vpop.f32.mrf.mxu1 }
0x146f   :  { %v1816_v9 = vrot.slane %v1811_v5, 2 }
0x1470   :  { %v4633_v11 = vpop.f32.mrf.mxu1 }
0x1471   :  { %v1818_v14 = vadd.f32 %v1816_v9, %v5915_v46  ;;  %v1819_v15 = vadd.f32 %v1816_v9, %v5912_v45 }
0x1473   :  { %5011 = vtanh.f32 %v1818_v14  ;;  %v4268_v20 = vmul.f32 -1.442695, %v1818_v14  ;;  %v4269_v21 = vmul.f32 -1.442695, %v1819_v15 }
0x1474   :  { %5013 = vtanh.f32 %v1819_v15 }
0x1475   :  { %5015 = vpow2.f32 %v4268_v20 }
0x1476   :  { %5017 = vpow2.f32 %v4269_v21 }
0x1480   :  { %v5012_v16 = vpop.eup %5011 }
0x1481   :  { %v5014_v17 = vpop.eup %5013  ;;  %1845 = vrot.lane.b32.xlu1 %v5012_v16, %s5466_s2 }
0x1482   :  { %1847 = vrot.lane.b32.xlu0 %v5014_v17, %s5466_s2  ;;  %v5016_v23 = vpop.eup %5015 }
0x1483   :  { %v5018_v28 = vpop.eup %5017  ;;  %v1826_v36 = vadd.f32 1.0, %v5016_v23 }
0x1484   :  { %v1827_v39 = vadd.f32 1.0, %v5018_v28 }
0x1485   :  { %5019 = vrcp.f32 %v1826_v36 }
0x1486   :  { %5021 = vrcp.f32 %v1827_v39 }
0x1492   :  { %v5020_v40 = vpop.eup %5019 }
0x1493   :  { %v5022_v44 = vpop.eup %5021  ;;  %v1841_v49 = vmul.f32 %v5020_v40, %v5943_v13 }
0x1494   :  { %v1842_v50 = vmul.f32 %v5022_v44, %v1837_v10 }
0x14f3   :  { %v1846_v43 = vpop.permute.xlu1 %1845 }
0x14f4   :  { %v1848_v47 = vpop.permute.xlu0 %1847  ;;  %v1851_v6 = vmul.f32 %v5020_v40, %v1846_v43 }
0x14f5   :  { %v1852_v22 = vmul.f32 %v5022_v44, %v1848_v47 }
0x14f6   :  { %1855 = vrot.lane.b32.xlu1 %v1851_v6, %s5467_s4 }
0x14f7   :  { %1857 = vrot.lane.b32.xlu0 %v1852_v22, %s5467_s4 }
0x1568   :  { %v1856_v24 = vpop.permute.xlu1 %1855 }
0x1569   :  { %v1858_v51 = vpop.permute.xlu0 %1857  ;;  %v1861_v53 = vadd.f32 %v1856_v24, %v1841_v49 }
0x156a   :  { %v1862_v52 = vadd.f32 %v1858_v51, %v1842_v50 }
0x156b   :  { %5023 = vtanh.f32 %v1861_v53  ;;  %v1983_v26 = vrot.slane %v1861_v53, 1 }
0x156c   :  { %5025 = vtanh.f32 %v1862_v52  ;;  %v1984_v55 = vrot.slane %v1862_v52, 1 }
0x156e   :  { %v1985_v58 = vsel %vm700_vm4, %v1983_v26, %v1984_v55 }
0x1578   :  { %v5024_v59 = vpop.eup %5023 }
0x1579   :  { %v5026_v62 = vpop.eup %5025  ;;  %1867 = vrot.lane.b32.xlu1 %v5024_v59, %s5466_s2 }
0x157a   :  { %1869 = vrot.lane.b32.xlu0 %v5026_v62, %s5466_s2 }
0x15eb   :  { %v1868_v13 = vpop.permute.xlu1 %1867 }
0x15ec   :  { %v1870_v63 = vpop.permute.xlu0 %1869  ;;  %v6004_v48 = vmul.f32 %v5020_v40, %v1868_v13 }
0x15ed   :  { %v6006_v10 = vmul.f32 %v5022_v44, %v1870_v63 }
0x15ee   :  { %v1885_v0 = vrot.slane %v6004_v48, 6 }
0x15ef   :  { %v1886_v1 = vrot.slane %v6006_v10, 6 }
0x15f1   :  { %v1887_v4 = vsel %vm1451_vm9, %v1885_v0, %v1886_v1  ;;  %vm1449_vm9 = vcmask 259072  }
0x15f2   :  { %1888 = vrot.lane.b32.xlu1 %v1887_v4, %s5467_s4 }
0x1664   :  { %v1889_v5 = vpop.permute.xlu1 %1888 }
0x1665   :  { %4643 = vmatmul.mubr.msk.f32.vlgmr.msra.gmra.mxu0 %vm286_vm1, %v1889_v5 }
0x1666   :  { %4657 = vmatpush3.msra.mxu0 %v5876_v27  ;;  %4664 = vmatprep.mubr.msk.f32.mxu0 %vm5465_vm2, %v5464_v12 }
0x1667   :  { %4658 = vmatprep.subr.mxu0 %v5464_v12 }
0x1668   :  { %4659 = vmatpush3.msra.mxu0 %v5879_v33 }
0x1669   :  { %4660 = vmatprep.subr.mxu0 %v5464_v12 }
0x166a   :  { %4661 = vmatpush3.msra.mxu0 %v5885_v34 }
0x166b   :  { %4662 = vmatprep.subr.mxu0 %v5464_v12 }
0x166c   :  { %4663 = vmatpush3.msra.mxu0 %v5889_v35 }
0x166d   :  { %4678 = vmatprep.subr.mxu0 %v5464_v12 }
0x1725   :  { %v1958_v9 = vpop.f32.mrf.mxu0 }
0x1726   :  { %v1963_v11 = vrot.slane %v1958_v9, 3 }
0x1727   :  { %v4644_v14 = vpop.f32.mrf.mxu0 }
0x1728   :  { %v1965_v15 = vadd.f32 %v1963_v11, %v5915_v46  ;;  %v1966_v16 = vadd.f32 %v1963_v11, %v5912_v45 }
0x172a   :  { %5027 = vtanh.f32 %v1965_v15  ;;  %v4271_v21 = vmul.f32 -1.442695, %v1965_v15  ;;  %v4272_v23 = vmul.f32 -1.442695, %v1966_v16 }
0x172b   :  { %5029 = vtanh.f32 %v1966_v16 }
0x172c   :  { %5031 = vpow2.f32 %v4271_v21 }
0x172d   :  { %5033 = vpow2.f32 %v4272_v23 }
0x1737   :  { %v5028_v17 = vpop.eup %5027 }
0x1738   :  { %v5030_v20 = vpop.eup %5029  ;;  %1992 = vrot.lane.b32.xlu0 %v5028_v17, %s5466_s2 }
0x1739   :  { %1994 = vrot.lane.b32.xlu1 %v5030_v20, %s5466_s2  ;;  %v5032_v28 = vpop.eup %5031 }
0x173a   :  { %v5034_v36 = vpop.eup %5033  ;;  %v1973_v39 = vadd.f32 1.0, %v5032_v28 }
0x173b   :  { %v1974_v40 = vadd.f32 1.0, %v5034_v36 }
0x173c   :  { %5035 = vrcp.f32 %v1973_v39 }
0x173d   :  { %5037 = vrcp.f32 %v1974_v40 }
0x1749   :  { %v5036_v43 = vpop.eup %5035 }
0x174a   :  { %v5038_v47 = vpop.eup %5037  ;;  %v1988_v50 = vmul.f32 %v5036_v43, %v1985_v58 }
0x174b   :  { %v1989_v24 = vmul.f32 %v5038_v47, %v1984_v55 }
0x17aa   :  { %v1993_v44 = vpop.permute.xlu0 %1992 }
0x17ab   :  { %v1995_v6 = vpop.permute.xlu1 %1994  ;;  %v1998_v22 = vmul.f32 %v5036_v43, %v1993_v44 }
0x17ac   :  { %v1999_v49 = vmul.f32 %v5038_v47, %v1995_v6 }
0x17ad   :  { %2002 = vrot.lane.b32.xlu0 %v1998_v22, %s5467_s4 }
0x17ae   :  { %2004 = vrot.lane.b32.xlu1 %v1999_v49, %s5467_s4 }
0x181f   :  { %v2003_v51 = vpop.permute.xlu0 %2002 }
0x1820   :  { %v2005_v53 = vpop.permute.xlu1 %2004  ;;  %v2008_v52 = vadd.f32 %v2003_v51, %v1988_v50 }
0x1821   :  { %v2009_v26 = vadd.f32 %v2005_v53, %v1989_v24 }
0x1822   :  { %5039 = vtanh.f32 %v2008_v52  ;;  %v2130_v59 = vrot.slane %v2008_v52, 1 }
0x1823   :  { %5041 = vtanh.f32 %v2009_v26  ;;  %v2131_v62 = vrot.slane %v2009_v26, 1 }
0x1825   :  { %v2132_v13 = vsel %vm700_vm4, %v2130_v59, %v2131_v62 }
0x182f   :  { %v5040_v63 = vpop.eup %5039 }
0x1830   :  { %v5042_v0 = vpop.eup %5041  ;;  %2014 = vrot.lane.b32.xlu0 %v5040_v63, %s5466_s2 }
0x1831   :  { %2016 = vrot.lane.b32.xlu1 %v5042_v0, %s5466_s2 }
0x18a2   :  { %v2015_v1 = vpop.permute.xlu0 %2014 }
0x18a3   :  { %v2017_v4 = vpop.permute.xlu1 %2016  ;;  %v6032_v58 = vmul.f32 %v5036_v43, %v2015_v1 }
0x18a4   :  { %v6034_v55 = vmul.f32 %v5038_v47, %v2017_v4 }
0x18a5   :  { %v2032_v5 = vrot.slane %v6032_v58, 5 }
0x18a6   :  { %v2033_v9 = vrot.slane %v6034_v55, 5 }
0x18a8   :  { %v2034_v11 = vsel %vm1301_vm8, %v2032_v5, %v2033_v9  ;;  %vm1299_vm8 = vcmask 258048  }
0x18a9   :  { %2035 = vrot.lane.b32.xlu0 %v2034_v11, %s5467_s4 }
0x191b   :  { %v2036_v14 = vpop.permute.xlu0 %2035 }
0x191c   :  { %4654 = vmatmul.mubr.msk.f32.vlgmr.msra.gmra.mxu1 %vm286_vm1, %v2036_v14 }
0x191d   :  { %4668 = vmatpush3.msra.mxu1 %v5876_v27  ;;  %4675 = vmatprep.mubr.msk.f32.mxu1 %vm5465_vm2, %v5464_v12 }
0x191e   :  { %4669 = vmatprep.subr.mxu1 %v5464_v12 }
0x191f   :  { %4670 = vmatpush3.msra.mxu1 %v5879_v33 }
0x1920   :  { %4671 = vmatprep.subr.mxu1 %v5464_v12 }
0x1921   :  { %4672 = vmatpush3.msra.mxu1 %v5885_v34 }
0x1922   :  { %4673 = vmatprep.subr.mxu1 %v5464_v12 }
0x1923   :  { %4674 = vmatpush3.msra.mxu1 %v5889_v35 }
0x1924   :  { %4689 = vmatprep.subr.mxu1 %v5464_v12 }
0x19dc   :  { %v2105_v15 = vpop.f32.mrf.mxu1 }
0x19dd   :  { %v2110_v16 = vrot.slane %v2105_v15, 4 }
0x19de   :  { %v4655_v17 = vpop.f32.mrf.mxu1 }
0x19df   :  { %v2112_v20 = vadd.f32 %v2110_v16, %v5915_v46  ;;  %v2113_v21 = vadd.f32 %v2110_v16, %v5912_v45 }
0x19e1   :  { %5043 = vtanh.f32 %v2112_v20  ;;  %v4274_v36 = vmul.f32 -1.442695, %v2112_v20  ;;  %v4275_v39 = vmul.f32 -1.442695, %v2113_v21 }
0x19e2   :  { %5045 = vtanh.f32 %v2113_v21 }
0x19e3   :  { %5047 = vpow2.f32 %v4274_v36 }
0x19e4   :  { %5049 = vpow2.f32 %v4275_v39 }
0x19ee   :  { %v5044_v23 = vpop.eup %5043 }
0x19ef   :  { %v5046_v28 = vpop.eup %5045  ;;  %2139 = vrot.lane.b32.xlu1 %v5044_v23, %s5466_s2 }
0x19f0   :  { %2141 = vrot.lane.b32.xlu0 %v5046_v28, %s5466_s2  ;;  %v5048_v40 = vpop.eup %5047 }
0x19f1   :  { %v5050_v43 = vpop.eup %5049  ;;  %v2120_v44 = vadd.f32 1.0, %v5048_v40 }
0x19f2   :  { %v2121_v47 = vadd.f32 1.0, %v5050_v43 }
0x19f3   :  { %5051 = vrcp.f32 %v2120_v44 }
0x19f4   :  { %5053 = vrcp.f32 %v2121_v47 }
0x1a00   :  { %v5052_v6 = vpop.eup %5051 }
0x1a01   :  { %v5054_v49 = vpop.eup %5053  ;;  %v2135_v53 = vmul.f32 %v5052_v6, %v2132_v13 }
0x1a02   :  { %v2136_v52 = vmul.f32 %v5054_v49, %v2131_v62 }
0x1a61   :  { %v2140_v22 = vpop.permute.xlu1 %2139 }
0x1a62   :  { %v2142_v50 = vpop.permute.xlu0 %2141  ;;  %v2145_v24 = vmul.f32 %v5052_v6, %v2140_v22 }
0x1a63   :  { %v2146_v51 = vmul.f32 %v5054_v49, %v2142_v50 }
0x1a64   :  { %2149 = vrot.lane.b32.xlu1 %v2145_v24, %s5467_s4 }
0x1a65   :  { %2151 = vrot.lane.b32.xlu0 %v2146_v51, %s5467_s4 }
0x1ad6   :  { %v2150_v26 = vpop.permute.xlu1 %2149 }
0x1ad7   :  { %v2152_v59 = vpop.permute.xlu0 %2151  ;;  %v2155_v63 = vadd.f32 %v2150_v26, %v2135_v53 }
0x1ad8   :  { %v2156_v0 = vadd.f32 %v2152_v59, %v2136_v52 }
0x1ad9   :  { %5055 = vtanh.f32 %v2155_v63  ;;  %v2277_v1 = vrot.slane %v2155_v63, 1 }
0x1ada   :  { %5057 = vtanh.f32 %v2156_v0  ;;  %v2278_v4 = vrot.slane %v2156_v0, 1 }
0x1adc   :  { %v2279_v5 = vsel %vm700_vm4, %v2277_v1, %v2278_v4 }
0x1ae6   :  { %v5056_v9 = vpop.eup %5055 }
0x1ae7   :  { %v5058_v11 = vpop.eup %5057  ;;  %2161 = vrot.lane.b32.xlu1 %v5056_v9, %s5466_s2 }
0x1ae8   :  { %2163 = vrot.lane.b32.xlu0 %v5058_v11, %s5466_s2 }
0x1b59   :  { %v2162_v14 = vpop.permute.xlu1 %2161 }
0x1b5a   :  { %v2164_v15 = vpop.permute.xlu0 %2163  ;;  %v6060_v13 = vmul.f32 %v5052_v6, %v2162_v14 }
0x1b5b   :  { %v6062_v62 = vmul.f32 %v5054_v49, %v2164_v15 }
0x1b5c   :  { %v2179_v16 = vrot.slane %v6060_v13, 4 }
0x1b5d   :  { %v2180_v17 = vrot.slane %v6062_v62, 4 }
0x1b5f   :  { %v2181_v20 = vsel %vm1151_vm7, %v2179_v16, %v2180_v17  ;;  %vm1597_vm7 = vcmask 261127  }
0x1b60   :  { %2182 = vrot.lane.b32.xlu1 %v2181_v20, %s5467_s4 }
0x1bd2   :  { %v2183_v21 = vpop.permute.xlu1 %2182 }
0x1bd3   :  { %4665 = vmatmul.mubr.msk.f32.vlgmr.msra.gmra.mxu0 %vm286_vm1, %v2183_v21 }
0x1bd4   :  { %4679 = vmatpush3.msra.mxu0 %v5876_v27  ;;  %4686 = vmatprep.mubr.msk.f32.mxu0 %vm5465_vm2, %v5464_v12 }
0x1bd5   :  { %4680 = vmatprep.subr.mxu0 %v5464_v12 }
0x1bd6   :  { %4681 = vmatpush3.msra.mxu0 %v5879_v33 }
0x1bd7   :  { %4682 = vmatprep.subr.mxu0 %v5464_v12 }
0x1bd8   :  { %4683 = vmatpush3.msra.mxu0 %v5885_v34 }
0x1bd9   :  { %4684 = vmatprep.subr.mxu0 %v5464_v12 }
0x1bda   :  { %4685 = vmatpush3.msra.mxu0 %v5889_v35 }
0x1c93   :  { %v2252_v23 = vpop.f32.mrf.mxu0 }
0x1c94   :  { %v2257_v28 = vrot.slane %v2252_v23, 5 }
0x1c95   :  { %v4666_v36 = vpop.f32.mrf.mxu0 }
0x1c96   :  { %v2259_v39 = vadd.f32 %v2257_v28, %v5915_v46  ;;  %v2260_v40 = vadd.f32 %v2257_v28, %v5912_v45 }
0x1c98   :  { %5059 = vtanh.f32 %v2259_v39  ;;  %v4277_v47 = vmul.f32 -1.442695, %v2259_v39  ;;  %v4278_v6 = vmul.f32 -1.442695, %v2260_v40 }
0x1c99   :  { %5061 = vtanh.f32 %v2260_v40 }
0x1c9a   :  { %5063 = vpow2.f32 %v4277_v47 }
0x1c9b   :  { %5065 = vpow2.f32 %v4278_v6 }
0x1ca5   :  { %v5060_v43 = vpop.eup %5059 }
0x1ca6   :  { %v5062_v44 = vpop.eup %5061  ;;  %2286 = vrot.lane.b32.xlu0 %v5060_v43, %s5466_s2 }
0x1ca7   :  { %2288 = vrot.lane.b32.xlu1 %v5062_v44, %s5466_s2  ;;  %v5064_v22 = vpop.eup %5063 }
0x1ca8   :  { %v5066_v49 = vpop.eup %5065  ;;  %v2267_v50 = vadd.f32 1.0, %v5064_v22 }
0x1ca9   :  { %v2268_v24 = vadd.f32 1.0, %v5066_v49 }
0x1caa   :  { %5067 = vrcp.f32 %v2267_v50 }
0x1cab   :  { %5069 = vrcp.f32 %v2268_v24 }
0x1cb7   :  { %v5068_v51 = vpop.eup %5067 }
0x1cb8   :  { %v5070_v52 = vpop.eup %5069  ;;  %v2282_v0 = vmul.f32 %v5068_v51, %v2279_v5 }
0x1cb9   :  { %v2283_v1 = vmul.f32 %v5070_v52, %v2278_v4 }
0x1d18   :  { %v2287_v53 = vpop.permute.xlu0 %2286 }
0x1d19   :  { %v2289_v26 = vpop.permute.xlu1 %2288  ;;  %v2292_v59 = vmul.f32 %v5068_v51, %v2287_v53 }
0x1d1a   :  { %v2293_v63 = vmul.f32 %v5070_v52, %v2289_v26 }
0x1d1b   :  { %2296 = vrot.lane.b32.xlu0 %v2292_v59, %s5467_s4 }
0x1d1c   :  { %2298 = vrot.lane.b32.xlu1 %v2293_v63, %s5467_s4 }
0x1d8d   :  { %v2297_v9 = vpop.permute.xlu0 %2296 }
0x1d8e   :  { %v2299_v11 = vpop.permute.xlu1 %2298  ;;  %v2302_v14 = vadd.f32 %v2297_v9, %v2282_v0 }
0x1d8f   :  { %v2303_v15 = vadd.f32 %v2299_v11, %v2283_v1 }
0x1d90   :  { %5071 = vtanh.f32 %v2302_v14  ;;  %v2424_v16 = vrot.slane %v2302_v14, 1 }
0x1d91   :  { %5073 = vtanh.f32 %v2303_v15  ;;  %v2425_v17 = vrot.slane %v2303_v15, 1 }
0x1d93   :  { %v2426_v20 = vsel %vm700_vm4, %v2424_v16, %v2425_v17 }
0x1d9d   :  { %v5072_v21 = vpop.eup %5071 }
0x1d9e   :  { %v5074_v23 = vpop.eup %5073  ;;  %2308 = vrot.lane.b32.xlu0 %v5072_v21, %s5466_s2 }
0x1d9f   :  { %2310 = vrot.lane.b32.xlu1 %v5074_v23, %s5466_s2 }
0x1e10   :  { %v2309_v28 = vpop.permute.xlu0 %2308 }
0x1e11   :  { %v2311_v36 = vpop.permute.xlu1 %2310  ;;  %v6087_v5 = vmul.f32 %v5068_v51, %v2309_v28 }
0x1e12   :  { %v6089_v4 = vmul.f32 %v5070_v52, %v2311_v36 }
0x1e13   :  { %v2326_v39 = vrot.slane %v6087_v5, 3 }
0x1e14   :  { %v2327_v40 = vrot.slane %v6089_v4, 3 }
0x1e16   :  { %v2328_v43 = vsel %vm1001_vm6, %v2326_v39, %v2327_v40  ;;  %vm1447_vm6 = vcmask 261126  }
0x1e17   :  { %2329 = vrot.lane.b32.xlu0 %v2328_v43, %s5467_s4 }
0x1e89   :  { %v2330_v44 = vpop.permute.xlu0 %2329 }
0x1e8a   :  { %4676 = vmatmul.mubr.msk.f32.vlgmr.msra.gmra.mxu1 %vm286_vm1, %v2330_v44 }
0x1e8b   :  { %4690 = vmatpush3.msra.mxu1 %v5876_v27  ;;  %4697 = vmatprep.mubr.msk.f32.mxu1 %vm5465_vm2, %v5464_v12 }
0x1e8c   :  { %4691 = vmatprep.subr.mxu1 %v5464_v12 }
0x1e8d   :  { %4692 = vmatpush3.msra.mxu1 %v5879_v33 }
0x1e8e   :  { %4693 = vmatprep.subr.mxu1 %v5464_v12 }
0x1e8f   :  { %4694 = vmatpush3.msra.mxu1 %v5885_v34 }
0x1e90   :  { %4695 = vmatprep.subr.mxu1 %v5464_v12 }
0x1e91   :  { %4696 = vmatpush3.msra.mxu1 %v5889_v35 }
0x1f4a   :  { %v2399_v47 = vpop.f32.mrf.mxu1 }
0x1f4b   :  { %v2404_v6 = vrot.slane %v2399_v47, 6 }
0x1f4c   :  { %v4677_v22 = vpop.f32.mrf.mxu1 }
0x1f4d   :  { %v2406_v27 = vadd.f32 %v2404_v6, %v5915_v46  ;;  %v2407_v49 = vadd.f32 %v2404_v6, %v5912_v45 }
0x1f4f   :  { %5075 = vtanh.f32 %v2406_v27  ;;  %v4280_v33 = vmul.f32 -1.442695, %v2406_v27  ;;  %v4281_v34 = vmul.f32 -1.442695, %v2407_v49 }
0x1f50   :  { %5077 = vtanh.f32 %v2407_v49 }
0x1f51   :  { %5079 = vpow2.f32 %v4280_v33 }
0x1f52   :  { %5081 = vpow2.f32 %v4281_v34 }
0x1f5c   :  { %v5076_v50 = vpop.eup %5075 }
0x1f5d   :  { %v5078_v24 = vpop.eup %5077  ;;  %2433 = vrot.lane.b32.xlu1 %v5076_v50, %s5466_s2 }
0x1f5e   :  { %2435 = vrot.lane.b32.xlu0 %v5078_v24, %s5466_s2  ;;  %v5080_v35 = vpop.eup %5079 }
0x1f5f   :  { %v5082_v51 = vpop.eup %5081  ;;  %v2414_v53 = vadd.f32 1.0, %v5080_v35 }
0x1f60   :  { %v2415_v52 = vadd.f32 1.0, %v5082_v51 }
0x1f61   :  { %5083 = vrcp.f32 %v2414_v53 }
0x1f62   :  { %5085 = vrcp.f32 %v2415_v52 }
0x1f6e   :  { %v5084_v26 = vpop.eup %5083 }
0x1f6f   :  { %v5086_v63 = vpop.eup %5085  ;;  %v2429_v11 = vmul.f32 %v5084_v26, %v2426_v20 }
0x1f70   :  { %v2430_v14 = vmul.f32 %v5086_v63, %v2425_v17 }
0x1fcf   :  { %v2434_v59 = vpop.permute.xlu1 %2433 }
0x1fd0   :  { %v2436_v0 = vpop.permute.xlu0 %2435  ;;  %v2439_v1 = vmul.f32 %v5084_v26, %v2434_v59 }
0x1fd1   :  { %v2440_v9 = vmul.f32 %v5086_v63, %v2436_v0 }
0x1fd2   :  { %2443 = vrot.lane.b32.xlu1 %v2439_v1, %s5467_s4 }
0x1fd3   :  { %2445 = vrot.lane.b32.xlu0 %v2440_v9, %s5467_s4 }
0x2044   :  { %v2444_v15 = vpop.permute.xlu1 %2443 }
0x2045   :  { %v2446_v16 = vpop.permute.xlu0 %2445  ;;  %v2449_v21 = vadd.f32 %v2444_v15, %v2429_v11 }
0x2046   :  { %v2450_v23 = vadd.f32 %v2446_v16, %v2430_v14 }
0x2047   :  { %5087 = vtanh.f32 %v2449_v21  ;;  %v2571_v28 = vrot.slane %v2449_v21, 1 }
0x2048   :  { %5089 = vtanh.f32 %v2450_v23  ;;  %v2572_v36 = vrot.slane %v2450_v23, 1 }
0x204a   :  { %v2573_v39 = vsel %vm700_vm4, %v2571_v28, %v2572_v36 }
0x2054   :  { %v5088_v40 = vpop.eup %5087 }
0x2055   :  { %v5090_v43 = vpop.eup %5089  ;;  %2455 = vrot.lane.b32.xlu1 %v5088_v40, %s5466_s2 }
0x2056   :  { %2457 = vrot.lane.b32.xlu0 %v5090_v43, %s5466_s2 }
0x20c7   :  { %v2456_v44 = vpop.permute.xlu1 %2455 }
0x20c8   :  { %v2458_v47 = vpop.permute.xlu0 %2457  ;;  %v6114_v20 = vmul.f32 %v5084_v26, %v2456_v44 }
0x20c9   :  { %v6116_v17 = vmul.f32 %v5086_v63, %v2458_v47 }
0x20ca   :  { %v2473_v6 = vrot.slane %v6114_v20, 2 }
0x20cb   :  { %v2474_v22 = vrot.slane %v6116_v17, 2 }
0x20cd   :  { %v2475_v27 = vsel %vm851_vm5, %v2473_v6, %v2474_v22  ;;  %vm1297_vm5 = vcmask 261125  }
0x20ce   :  { %2476 = vrot.lane.b32.xlu1 %v2475_v27, %s5467_s4 }
0x2140   :  { %v2477_v49 = vpop.permute.xlu1 %2476 }
0x2141   :  { %4687 = vmatmul.mubr.msk.f32.vlgmr.msra.gmra.mxu0 %vm286_vm1, %v2477_v49 }
0x2201   :  { %v2546_v50 = vpop.f32.mrf.mxu0 }
0x2202   :  { %v2551_v24 = vrot.slane %v2546_v50, 7 }
0x2203   :  { %v4688_v33 = vpop.f32.mrf.mxu0 }
0x2204   :  { %v2553_v34 = vadd.f32 %v2551_v24, %v5915_v46  ;;  %v2554_v35 = vadd.f32 %v2551_v24, %v5912_v45 }
0x2206   :  { %5091 = vtanh.f32 %v2553_v34  ;;  %v4283_v52 = vmul.f32 -1.442695, %v2553_v34  ;;  %v4284_v26 = vmul.f32 -1.442695, %v2554_v35 }
0x2207   :  { %5093 = vtanh.f32 %v2554_v35 }
0x2208   :  { %5095 = vpow2.f32 %v4283_v52 }
0x2209   :  { %5097 = vpow2.f32 %v4284_v26 }
0x2213   :  { %v5092_v51 = vpop.eup %5091 }
0x2214   :  { %v5094_v53 = vpop.eup %5093  ;;  %2580 = vrot.lane.b32.xlu0 %v5092_v51, %s5466_s2 }
0x2215   :  { %2582 = vrot.lane.b32.xlu1 %v5094_v53, %s5466_s2  ;;  %v5096_v59 = vpop.eup %5095  ;;  %v2733_v53 = vld [vmem:[#allocation3] sm:$0xff] }
0x2216   :  { %v5098_v63 = vpop.eup %5097  ;;  %v2561_v0 = vadd.f32 1.0, %v5096_v59 }
0x2217   :  { %v2562_v1 = vadd.f32 1.0, %v5098_v63 }
0x2218   :  { %5099 = vrcp.f32 %v2561_v0 }
0x2219   :  { %5101 = vrcp.f32 %v2562_v1 }
0x2225   :  { %v5100_v9 = vpop.eup %5099 }
0x2226   :  { %v5102_v11 = vpop.eup %5101  ;;  %v2576_v21 = vmul.f32 %v5100_v9, %v2573_v39 }
0x2227   :  { %v2577_v23 = vmul.f32 %v5102_v11, %v2572_v36 }
0x2286   :  { %v2581_v45 = vpop.permute.xlu0 %2580 }
0x2287   :  { %v2583_v14 = vpop.permute.xlu1 %2582  ;;  %v2586_v15 = vmul.f32 %v5100_v9, %v2581_v45 }
0x2288   :  { %v2587_v16 = vmul.f32 %v5102_v11, %v2583_v14 }
0x2289   :  { %2590 = vrot.lane.b32.xlu0 %v2586_v15, %s5467_s4 }
0x228a   :  { %2592 = vrot.lane.b32.xlu1 %v2587_v16, %s5467_s4 }
0x22fb   :  { %v2591_v28 = vpop.permute.xlu0 %2590 }
0x22fc   :  { %v2593_v40 = vpop.permute.xlu1 %2592  ;;  %v2596_v43 = vadd.f32 %v2591_v28, %v2576_v21 }
0x22fd   :  { %v2597_v44 = vadd.f32 %v2593_v40, %v2577_v23 }
0x22fe   :  { %5103 = vtanh.f32 %v2596_v43  ;;  %v2707_v47 = vrot.slane %v2596_v43, 1 }
0x22ff   :  { %5105 = vtanh.f32 %v2597_v44  ;;  %v2708_v6 = vrot.slane %v2597_v44, 1  ;;  %v2750_v44 = vld [vmem:[#allocation16 + $0x8] sm:$0xff] }
0x2301   :  { %v2709_v22 = vsel %vm700_vm4, %v2707_v47, %v2708_v6  ;;  %v2749_v47 = vld [vmem:[#allocation16] sm:$0xff] }
0x230b   :  { %v5104_v27 = vpop.eup %5103 }
0x230c   :  { %v5106_v49 = vpop.eup %5105  ;;  %2602 = vrot.lane.b32.xlu0 %v5104_v27, %s5466_s2 }
0x230d   :  { %2604 = vrot.lane.b32.xlu1 %v5106_v49, %s5466_s2 }
0x237e   :  { %v2603_v50 = vpop.permute.xlu0 %2602 }
0x237f   :  { %v2605_v24 = vpop.permute.xlu1 %2604  ;;  %v2608_v39 = vmul.f32 %v5100_v9, %v2603_v50 }
0x2380   :  { %v2609_v36 = vmul.f32 %v5102_v11, %v2605_v24 }
0x2381   :  { %v2620_v33 = vrot.slane %v2608_v39, 1 }
0x2382   :  { %v2621_v34 = vrot.slane %v2609_v36, 1 }
0x2384   :  { %v2622_v35 = vsel %vm700_vm4, %v2620_v33, %v2621_v34  ;;  %vm1147_vm4 = vcmask 261124  }
0x2385   :  { %2623 = vrot.lane.b32.xlu0 %v2622_v35, %s5467_s4 }
0x23f7   :  { %v2624_v51 = vpop.permute.xlu0 %2623 }
0x23f8   :  { %4698 = vmatmul.mubr.msk.f32.vlgmr.msra.gmra.mxu1 %vm286_vm1, %v2624_v51 }
0x23f9   :  { %4728 = vmatprep.mubr.msk.f32.mxu1 %vm286_vm1, %v2733_v53 }
0x24b8   :  { %v2693_v52 = vpop.f32.mrf.mxu1 }
0x24b9   :  { %v2697_v26 = vadd.f32 %v2693_v52, %v5915_v46 }
0x24ba   :  { %v4699_v59 = vpop.f32.mrf.mxu1 }
0x24bb   :  { %5107 = vtanh.f32 %v2697_v26  ;;  %v4286_v0 = vmul.f32 -1.442695, %v2697_v26  ;;  %v6199_v26 = vld [vmem:[#allocation18 + $0x18] sm:$0xff] }
0x24bd   :  { %5109 = vpow2.f32 %v4286_v0  ;;  %v6204_v0 = vld [vmem:[#allocation18 + $0x10] sm:$0xff] }
0x24c8   :  { %v5108_v63 = vpop.eup %5107 }
0x24c9   :  { %2713 = vrot.lane.b32.xlu1 %v5108_v63, %s5466_s2 }
0x24ca   :  { %v5110_v1 = vpop.eup %5109 }
0x24cb   :  { %v2701_v9 = vadd.f32 1.0, %v5110_v1 }
0x24cd   :  { %5111 = vrcp.f32 %v2701_v9  ;;  %v6209_v9 = vld [vmem:[#allocation18 + $0x8] sm:$0xff] }
0x24da   :  { %v5112_v45 = vpop.eup %5111 }
0x24db   :  { %v2711_v46 = vmul.f32 %v5112_v45, %v2709_v22 }
0x253b   :  { %v2714_v11 = vpop.permute.xlu1 %2713 }
0x253c   :  { %v2716_v14 = vmul.f32 %v5112_v45, %v2714_v11 }
0x253e   :  { %2718 = vrot.lane.b32.xlu0 %v2716_v14, %s5467_s4  ;;  %v6215_v14 = vld [vmem:[#allocation18] sm:$0xff] }
0x2542   :  { %2614 = vrot.lane.b32.xlu0 %v2609_v36, %s5467_s4 }
0x2546   :  { %2467 = vrot.lane.b32.xlu0 %v6116_v17, %s5467_s4 }
0x254a   :  { %2320 = vrot.lane.b32.xlu0 %v6089_v4, %s5467_s4 }
0x254e   :  { %2173 = vrot.lane.b32.xlu0 %v6062_v62, %s5467_s4  ;;  %v1530_v62 = vrot.slane %v5990_v3, 1  ;;  %v2756_v3 = vld [vmem:[#allocation16 + $0x38] sm:$0xff] }
0x254f   :  { %4700 = vmatprep.subr.mxu0 %v2756_v3 }
0x2550   :  { %v1532_v40 = vadd.f32 %v1530_v62, %v5699_v31  ;;  %4701 = vmatpush3.msra.mxu0 %v2756_v3  ;;  %v2754_v31 = vld [vmem:[#allocation16 + $0x28] sm:$0xff]  ;;  %v6172_v22 = vadd.f32 %v1530_v62, %v5697_v29 }
0x25b0   :  { %v2719_v15 = vpop.permute.xlu0 %2718 }
0x25b1   :  { %v2721_v16 = vadd.f32 %v2719_v15, %v2711_v46 }
0x25b3   :  { %5113 = vtanh.f32 %v2721_v16 }
0x25b4   :  { %v2615_v21 = vpop.permute.xlu0 %2614  ;;  %5115 = vtanh.f32 %v1532_v40 }
0x25b5   :  { %2619 = vst.msk [vmem:[#allocation4 + $0xf] sm:$0x1] %vm196_vm0, %v2615_v21 }
0x25b8   :  { %v2468_v23 = vpop.permute.xlu0 %2467 }
0x25b9   :  { %2472 = vst.msk [vmem:[#allocation4 + $0x16] sm:$0x3] %vm849_vm10, %v2468_v23 }
0x25bc   :  { %v2321_v28 = vpop.permute.xlu0 %2320 }
0x25bd   :  { %2325 = vst.msk [vmem:[#allocation4 + $0x1d] sm:$0x7] %vm999_vm11, %v2321_v28  ;;  %v4264_v28 = vmul.f32 -1.442695, %v6172_v22 }
0x25c0   :  { %v5114_v4 = vpop.eup %5113  ;;  %v2174_v17 = vpop.permute.xlu0 %2173 }
0x25c1   :  { %2178 = vst.msk [vmem:[#allocation4 + $0x24] sm:$0xf] %vm1149_vm12, %v2174_v17  ;;  %2724 = vrot.lane.b32.xlu1 %v5114_v4, %s5466_s2 }
0x25c5   :  { %2612 = vrot.lane.b32.xlu1 %v2608_v39, %s5467_s4 }
0x25c9   :  { %2465 = vrot.lane.b32.xlu1 %v6114_v20, %s5467_s4 }
0x25cd   :  { %2318 = vrot.lane.b32.xlu1 %v6087_v5, %s5467_s4  ;;  %v5116_v5 = vpop.eup %5115 }
0x25d1   :  { %2171 = vrot.lane.b32.xlu1 %v6060_v13, %s5467_s4  ;;  %v2755_v13 = vld [vmem:[#allocation16 + $0x30] sm:$0xff] }
0x25d2   :  { %4702 = vmatprep.subr.mxu0 %v2755_v13 }
0x25d3   :  { %4703 = vmatpush3.msra.mxu0 %v2755_v13 }
0x25d4   :  { %4704 = vmatprep.subr.mxu0 %v2754_v31 }
0x25d5   :  { %2024 = vrot.lane.b32.xlu1 %v6032_v58, %s5467_s4  ;;  %v2753_v58 = vld [vmem:[#allocation16 + $0x20] sm:$0xff]  ;;  %4705 = vmatpush3.msra.mxu0 %v2754_v31 }
0x25d6   :  { %4706 = vmatprep.subr.mxu0 %v2753_v58 }
0x25d7   :  { %4707 = vmatpush3.msra.mxu0 %v2753_v58 }
0x25d8   :  { %4740 = vmatprep.subr.mxu0 %v5464_v12 }
0x25d9   :  { %691 = vrot.lane.b32.xlu1 %v5748_v30, %s5467_s4  ;;  %v2752_v30 = vld [vmem:[#allocation16 + $0x18] sm:$0xff] }
0x25da   :  { %4720 = vmatprep.subr.mxu1 %v2752_v30 }
0x25db   :  { %4721 = vmatpush3.msra.mxu1 %v2752_v30 }
0x25dd   :  { %1877 = vrot.lane.b32.xlu1 %v6004_v48, %s5467_s4  ;;  %v4263_v48 = vmul.f32 -1.442695, %v1532_v40 }
0x25df   :  { %5117 = vpow2.f32 %v4263_v48 }
0x25e0   :  { %5119 = vtanh.f32 %v6172_v22 }
0x25e1   :  { %1730 = vrot.lane.b32.xlu1 %v5957_v60, %s5467_s4  ;;  %v2751_v60 = vld [vmem:[#allocation16 + $0x10] sm:$0xff] }
0x25e2   :  { %4722 = vmatprep.subr.mxu1 %v2751_v60 }
0x25e3   :  { %4723 = vmatpush3.msra.mxu1 %v2751_v60 }
0x25e4   :  { %4724 = vmatprep.subr.mxu1 %v2750_v44 }
0x25e5   :  { %1559 = vrot.lane.b32.xlu1 %v5116_v5, %s5466_s2  ;;  %4725 = vmatpush3.msra.mxu1 %v2750_v44 }
0x25e6   :  { %4726 = vmatprep.subr.mxu1 %v2749_v47 }
0x25e7   :  { %4727 = vmatpush3.msra.mxu1 %v2749_v47 }
0x25e8   :  { %4751 = vmatprep.subr.mxu1 %v5464_v12 }
0x25ec   :  { %v5118_v49 = vpop.eup %5117 }
0x2633   :  { %v2725_v20 = vpop.permute.xlu1 %2724 }
0x2634   :  { %v2727_v43 = vmul.f32 %v5112_v45, %v2725_v20 }
0x2636   :  { %2729 = vrot.lane.b32.xlu0 %v2727_v43, %s5467_s4  ;;  %v6266_v43 = vld [vmem:[%s6508_s5] ss:$0 sm:$0xff] }
0x2637   :  { %v2613_v6 = vpop.permute.xlu1 %2612 }
0x2638   :  { %2618 = vst.msk [vmem:[#allocation4 + $0x7] sm:$0xfe] %vm697_vm13, %v2613_v6 }
0x263a   :  { %2026 = vrot.lane.b32.xlu0 %v6034_v55, %s5467_s4  ;;  %v1540_v55 = vadd.f32 1.0, %v5118_v49  ;;  %v1550_v49 = vrot.slane %v5930_v37, 7 }
0x263b   :  { %v2466_v27 = vpop.permute.xlu1 %2465 }
0x263c   :  { %2471 = vst.msk [vmem:[#allocation4 + $0xe] sm:$0xfc] %vm847_vm14, %v2466_v27  ;;  %5121 = vrcp.f32 %v1540_v55 }
0x263d   :  { %5123 = vpow2.f32 %v4264_v28 }
0x263e   :  { %693 = vrot.lane.b32.xlu0 %v5750_v32, %s5467_s4  ;;  %v5120_v32 = vpop.eup %5119 }
0x263f   :  { %v2319_v29 = vpop.permute.xlu1 %2318  ;;  %v2742_v59 = vld [vmem:[#allocation4 + $0x8] sm:$0xff] }
0x2640   :  { %2324 = vst.msk [vmem:[#allocation4 + $0x15] sm:$0xf8] %vm997_vm15, %v2319_v29 }
0x2642   :  { %1879 = vrot.lane.b32.xlu0 %v6006_v10, %s5467_s4 }
0x2643   :  { %v2172_v50 = vpop.permute.xlu1 %2171  ;;  %v2743_v63 = vld [vmem:[#allocation4 + $0x10] sm:$0xff] }
0x2644   :  { %2177 = vst.msk [vmem:[#allocation4 + $0x1c] sm:$0xf0] %vm1147_vm4, %v2172_v50 }
0x2646   :  { %1732 = vrot.lane.b32.xlu0 %v5959_v61, %s5467_s4 }
0x2647   :  { %v2025_v24 = vpop.permute.xlu1 %2024  ;;  %v2744_v45 = vld [vmem:[#allocation4 + $0x18] sm:$0xff] }
0x2648   :  { %2030 = vst.msk [vmem:[#allocation4 + $0x23] sm:$0xe0] %vm1297_vm5, %v2025_v24 }
0x2649   :  { %v6193_v33 = vpop.eup %5121 }
0x264a   :  { %1561 = vrot.lane.b32.xlu0 %v5120_v32, %s5466_s2  ;;  %v5124_v60 = vpop.eup %5123  ;;  %v1555_v55 = vmul.f32 %v6193_v33, %v1550_v49 }
0x264b   :  { %v692_v39 = vpop.permute.xlu1 %691  ;;  %v2745_v11 = vld [vmem:[#allocation4 + $0x20] sm:$0xff]  ;;  %v1541_v22 = vadd.f32 1.0, %v5124_v60 }
0x264c   :  { %698 = vst.msk [vmem:[#allocation3 + $0x7] sm:$0xfe] %vm697_vm13, %v692_v39 }
0x264f   :  { %v1878_v10 = vpop.permute.xlu1 %1877 }
0x2650   :  { %1883 = vst.msk [vmem:[#allocation4 + $0x2a] sm:$0xc0] %vm1447_vm6, %v1878_v10 }
0x2653   :  { %v1731_v36 = vpop.permute.xlu1 %1730 }
0x2654   :  { %1736 = vst.msk [vmem:[#allocation4 + $0x31] sm:$0x80] %vm1597_vm7, %v1731_v36 }
0x2657   :  { %v1560_v61 = vpop.permute.xlu1 %1559 }
0x2658   :  { %v1565_v34 = vmul.f32 %v6193_v33, %v1560_v61 }
0x265a   :  { %1569 = vrot.lane.b32.xlu0 %v1565_v34, %s5467_s4 }
0x26a8   :  { %v2730_v35 = vpop.permute.xlu0 %2729 }
0x26a9   :  { %2732 = vst.msk [vmem:[#allocation4] sm:$0xff] %vm286_vm1, %v2730_v35  ;;  %v1551_v35 = vrot.slane %v5932_v38, 7 }
0x26ac   :  { %v2027_v51 = vpop.permute.xlu0 %2026 }
0x26ad   :  { %2031 = vst.msk [vmem:[#allocation4 + $0x2b] sm:$0x1f] %vm1299_vm8, %v2027_v51 }
0x26b0   :  { %v694_v53 = vpop.permute.xlu0 %693  ;;  %v2741_v52 = vld [vmem:[#allocation4] sm:$0xff] }
0x26b1   :  { %699 = vst.msk [vmem:[#allocation3 + $0xf] sm:$0x1] %vm196_vm0, %v694_v53  ;;  %4708 = vmatprep.mubr.msk.f32.mxu0 %vm286_vm1, %v2741_v52  ;;  %vm1599_vm0 = vcmask 260096  }
0x26b2   :  { %4709 = vmatmul.mubr.msk.f32.vlgmr.msra.gmra.mxu0 %vm286_vm1, %v2742_v59  ;;  %v1552_v59 = vsel %vm799_vm3, %v1550_v49, %v1551_v35 }
0x26b3   :  { %4711 = vmatprep.mubr.msk.f32.mxu0 %vm286_vm1, %v2743_v63  ;;  %4741 = vmatpush3.msra.mxu0 %v6199_v26 }
0x26b4   :  { %v1880_v1 = vpop.permute.xlu0 %1879  ;;  %4742 = vmatprep.subr.mxu0 %v5464_v12  ;;  %v2746_v16 = vld [vmem:[#allocation4 + $0x28] sm:$0xff] }
0x26b5   :  { %1884 = vst.msk [vmem:[#allocation4 + $0x32] sm:$0x3f] %vm1449_vm9, %v1880_v1  ;;  %4743 = vmatpush3.msra.mxu0 %v6204_v0 }
0x26b6   :  { %4712 = vmatmul.mubr.msk.f32.gmra.mxu0 %vm286_vm1, %v2744_v45  ;;  %4744 = vmatprep.subr.mxu0 %v5464_v12 }
0x26b7   :  { %4714 = vmatprep.mubr.msk.f32.mxu0 %vm286_vm1, %v2745_v11  ;;  %4745 = vmatpush3.msra.mxu0 %v6209_v9 }
0x26b8   :  { %v1733_v46 = vpop.permute.xlu0 %1732  ;;  %v2734_v15 = vld [vmem:[#allocation3 + $0x8] sm:$0xff]  ;;  %4746 = vmatprep.subr.mxu0 %v5464_v12 }
0x26b9   :  { %1737 = vst.msk [vmem:[#allocation4 + $0x39] sm:$0x7f] %vm1599_vm0, %v1733_v46  ;;  %4729 = vmatmul.mubr.msk.f32.vlgmr.msra.gmra.mxu1 %vm286_vm1, %v2734_v15  ;;  %4747 = vmatpush3.msra.mxu0 %v6215_v14 }
0x26ba   :  { %4715 = vmatmul.mubr.msk.f32.gmra.mxu0 %vm286_vm1, %v2746_v16  ;;  %4752 = vmatpush3.msra.mxu1 %v6199_v26 }
0x26bb   :  { %4753 = vmatprep.subr.mxu1 %v5464_v12  ;;  %4762 = vmatprep.subr.mxu0 %v5464_v12 }
0x26bc   :  { %v2747_v21 = vld [vmem:[#allocation4 + $0x30] sm:$0xff]  ;;  %4754 = vmatpush3.msra.mxu1 %v6204_v0  ;;  %v1562_v47 = vpop.permute.xlu0 %1561 }
0x26bd   :  { %4717 = vmatprep.mubr.msk.f32.mxu0 %vm286_vm1, %v2747_v21  ;;  %4755 = vmatprep.subr.mxu1 %v5464_v12 }
0x26be   :  { %4756 = vmatpush3.msra.mxu1 %v6209_v9 }
0x26bf   :  { %4757 = vmatprep.subr.mxu1 %v5464_v12 }
0x26c0   :  { %v2748_v23 = vld [vmem:[#allocation4 + $0x38] sm:$0xff]  ;;  %4758 = vmatpush3.msra.mxu1 %v6215_v14 }
0x26c1   :  { %4718 = vmatmul.mubr.msk.f32.gmra.mxu0 %vm286_vm1, %v2748_v23  ;;  %4773 = vmatprep.subr.mxu1 %v5464_v12 }
0x26c2   :  { %4748 = vmatprep.mubr.msk.f32.mxu0 %vm5465_vm2, %v5464_v12 }
0x26c5   :  { %4749 = vmatmul.mubr.f32.vlgmr.msra.gmra.mxu0 %v5464_v12 }
0x26c6   :  { %4763 = vmatpush3.msra.mxu0 %v6199_v26  ;;  %4770 = vmatprep.mubr.msk.f32.mxu0 %vm5465_vm2, %v5464_v12 }
0x26c7   :  { %4764 = vmatprep.subr.mxu0 %v5464_v12 }
0x26c8   :  { %4765 = vmatpush3.msra.mxu0 %v6204_v0 }
0x26c9   :  { %4766 = vmatprep.subr.mxu0 %v5464_v12 }
0x26ca   :  { %4767 = vmatpush3.msra.mxu0 %v6209_v9 }
0x26cb   :  { %4768 = vmatprep.subr.mxu0 %v5464_v12 }
0x26cc   :  { %4769 = vmatpush3.msra.mxu0 %v6215_v14  ;;  %v1570_v50 = vpop.permute.xlu0 %1569 }
0x26cd   :  { %4784 = vmatprep.subr.mxu0 %v5464_v12  ;;  %v1575_v24 = vadd.f32 %v1570_v50, %v1555_v55 }
0x2772   :  { %v4710_v4 = vpop.f32.mrf.mxu0 }
0x2774   :  { %v2847_v17 = vpop.f32.mrf.mxu0 }
0x2776   :  { %v6249_v62 = vpop.f32.mrf.mxu0 }
0x2778   :  { %v6251_v40 = vpop.f32.mrf.mxu0 }
0x2779   :  { %v4730_v5 = vpop.f32.mrf.mxu1 }
0x277a   :  { %v6253_v3 = vadd.f32 %v4730_v5, %v4710_v4  ;;  %v6255_v13 = vpop.f32.mrf.mxu0 }
0x277b   :  { %v2976_v31 = vpop.f32.mrf.mxu1 }
0x277c   :  { %v6257_v58 = vpop.f32.mrf.mxu0  ;;  %v2977_v30 = vadd.f32 %v2976_v31, %v2847_v17 }
0x277e   :  { %v3022_v44 = vadd.f32 %v6266_v43, %v2977_v30 }
0x2781   :  { %v6259_v48 = vpop.f32.mrf.mxu0 }
0x2783   :  { %v6261_v20 = vpop.f32.mrf.mxu0 }
0x2785   :  { %v3100_v6 = vpop.f32.mrf.mxu0 }
0x2786   :  { %v3104_v27 = vadd.f32 %v3100_v6, %v3022_v44 }
0x2787   :  { %v4750_v29 = vpop.f32.mrf.mxu0 }
0x2788   :  { %5125 = vtanh.f32 %v3104_v27  ;;  %v4304_v61 = vmul.f32 -1.442695, %v3104_v27 }
0x2789   :  { %5127 = vrcp.f32 %v1541_v22 }
0x278a   :  { %5129 = vtanh.f32 %v1575_v24 }
0x278b   :  { %5131 = vpow2.f32 %v4304_v61  ;;  %v3023_v61 = vadd.f32 %v6266_v43, %v6253_v3 }
0x2795   :  { %v5126_v32 = vpop.eup %5125 }
0x2796   :  { %3114 = vrot.lane.b32.xlu1 %v5126_v32, %s5466_s2  ;;  %v5128_v39 = vpop.eup %5127 }
0x2797   :  { %v1566_v10 = vmul.f32 %v5128_v39, %v1562_v47  ;;  %v5130_v36 = vpop.eup %5129  ;;  %v1556_v63 = vmul.f32 %v5128_v39, %v1552_v59 }
0x2798   :  { %v5132_v37 = vpop.eup %5131 }
0x2799   :  { %v3108_v34 = vadd.f32 1.0, %v5132_v37 }
0x279a   :  { %1571 = vrot.lane.b32.xlu1 %v1566_v10, %s5467_s4 }
0x279b   :  { %5133 = vrcp.f32 %v3108_v34 }
0x279e   :  { %1581 = vrot.lane.b32.xlu1 %v5130_v36, %s5466_s2 }
0x27a8   :  { %v5134_v51 = vpop.eup %5133 }
0x27a9   :  { %v3112_v15 = vmul.f32 0.0, %v5134_v51 }
0x2808   :  { %v3115_v53 = vpop.permute.xlu1 %3114 }
0x2809   :  { %v3117_v52 = vmul.f32 %v5134_v51, %v3115_v53 }
0x280b   :  { %3119 = vrot.lane.b32.xlu0 %v3117_v52, %s5467_s4 }
0x280c   :  { %v1572_v1 = vpop.permute.xlu1 %1571 }
0x280d   :  { %v1576_v45 = vadd.f32 %v1572_v1, %v1556_v63 }
0x280f   :  { %5135 = vtanh.f32 %v1576_v45 }
0x2810   :  { %v1582_v38 = vpop.permute.xlu1 %1581 }
0x2811   :  { %v1587_v46 = vmul.f32 %v6193_v33, %v1582_v38 }
0x281c   :  { %v5136_v11 = vpop.eup %5135 }
0x281d   :  { %1583 = vrot.lane.b32.xlu0 %v5136_v11, %s5466_s2 }
0x2821   :  { %841 = vrot.lane.b32.xlu0 %v5776_v7, %s5467_s4 }
0x2825   :  { %991 = vrot.lane.b32.xlu0 %v5804_v56, %s5467_s4 }
0x2829   :  { %1141 = vrot.lane.b32.xlu0 %v5832_v41, %s5467_s4 }
0x282d   :  { %1291 = vrot.lane.b32.xlu0 %v5868_v18, %s5467_s4  ;;  %v3907_v18 = vrot.slane %v1587_v46, 7 }
0x2831   :  { %1441 = vrot.lane.b32.xlu0 %v5949_v54, %s5467_s4 }
0x2835   :  { %1591 = vrot.lane.b32.xlu0 %v1587_v46, %s5467_s4 }
0x287d   :  { %v3120_v16 = vpop.permute.xlu0 %3119 }
0x287e   :  { %v6290_v7 = vadd.f32 %v3120_v16, %v3112_v15 }
0x2880   :  { %5137 = vtanh.f32 %v6290_v7 }
0x288d   :  { %v5138_v56 = vpop.eup %5137 }
0x288e   :  { %3125 = vrot.lane.b32.xlu1 %v5138_v56, %s5466_s2 }
0x288f   :  { %v1584_v41 = vpop.permute.xlu0 %1583 }
0x2890   :  { %v1588_v21 = vmul.f32 %v5128_v39, %v1584_v41 }
0x2892   :  { %v3908_v23 = vrot.slane %v1588_v21, 7  ;;  %843 = vrot.lane.b32.xlu1 %v5778_v8, %s5467_s4 }
0x2893   :  { %v842_v54 = vpop.permute.xlu0 %841 }
0x2894   :  { %848 = vst.msk [vmem:[#allocation3 + $0xe] sm:$0xfc] %vm847_vm14, %v842_v54  ;;  %v6298_v33 = vsel %vm799_vm3, %v3907_v18, %v3908_v23 }
0x2896   :  { %993 = vrot.lane.b32.xlu1 %v5806_v57, %s5467_s4 }
0x2897   :  { %v992_v28 = vpop.permute.xlu0 %991 }
0x2898   :  { %998 = vst.msk [vmem:[#allocation3 + $0x15] sm:$0xf8] %vm997_vm15, %v992_v28 }
0x289a   :  { %1143 = vrot.lane.b32.xlu1 %v5834_v42, %s5467_s4 }
0x289b   :  { %v1142_v4 = vpop.permute.xlu0 %1141 }
0x289c   :  { %1148 = vst.msk [vmem:[#allocation3 + $0x1c] sm:$0xf0] %vm1147_vm4, %v1142_v4 }
0x289e   :  { %1293 = vrot.lane.b32.xlu1 %v5870_v19, %s5467_s4 }
0x289f   :  { %v1292_v8 = vpop.permute.xlu0 %1291 }
0x28a0   :  { %1298 = vst.msk [vmem:[#allocation3 + $0x23] sm:$0xe0] %vm1297_vm5, %v1292_v8 }
0x28a2   :  { %1443 = vrot.lane.b32.xlu1 %v5951_v25, %s5467_s4 }
0x28a3   :  { %v1442_v17 = vpop.permute.xlu0 %1441 }
0x28a4   :  { %1448 = vst.msk [vmem:[#allocation3 + $0x2a] sm:$0xc0] %vm1447_vm6, %v1442_v17 }
0x28a6   :  { %1593 = vrot.lane.b32.xlu1 %v1588_v21, %s5467_s4 }
0x28a7   :  { %v1592_v57 = vpop.permute.xlu0 %1591 }
0x28a8   :  { %1598 = vst.msk [vmem:[#allocation3 + $0x31] sm:$0x80] %vm1597_vm7, %v1592_v57 }
0x2900   :  { %v3126_v42 = vpop.permute.xlu1 %3125 }
0x2901   :  { %v3128_v5 = vmul.f32 %v5134_v51, %v3126_v42 }
0x2903   :  { %3130 = vrot.lane.b32.xlu0 %v3128_v5, %s5467_s4 }
0x2904   :  { %v844_v31 = vpop.permute.xlu1 %843 }
0x2905   :  { %850 = vst.msk [vmem:[#allocation3 + $0x16] sm:$0x3] %vm849_vm10, %v844_v31 }
0x2908   :  { %v994_v19 = vpop.permute.xlu1 %993 }
0x2909   :  { %1000 = vst.msk [vmem:[#allocation3 + $0x1d] sm:$0x7] %vm999_vm11, %v994_v19 }
0x290c   :  { %v1144_v30 = vpop.permute.xlu1 %1143  ;;  %v2735_v25 = vld [vmem:[#allocation3 + $0x10] sm:$0xff] }
0x290d   :  { %1150 = vst.msk [vmem:[#allocation3 + $0x24] sm:$0xf] %vm1149_vm12, %v1144_v30  ;;  %4731 = vmatprep.mubr.msk.f32.mxu1 %vm286_vm1, %v2735_v25 }
0x2910   :  { %v1294_v60 = vpop.permute.xlu1 %1293  ;;  %v2736_v44 = vld [vmem:[#allocation3 + $0x18] sm:$0xff] }
0x2911   :  { %1300 = vst.msk [vmem:[#allocation3 + $0x2b] sm:$0x1f] %vm1299_vm8, %v1294_v60  ;;  %4732 = vmatmul.mubr.msk.f32.gmra.mxu1 %vm286_vm1, %v2736_v44 }
0x2914   :  { %v1444_v47 = vpop.permute.xlu1 %1443  ;;  %v2737_v6 = vld [vmem:[#allocation3 + $0x20] sm:$0xff] }
0x2915   :  { %1450 = vst.msk [vmem:[#allocation3 + $0x32] sm:$0x3f] %vm1449_vm9, %v1444_v47  ;;  %4734 = vmatprep.mubr.msk.f32.mxu1 %vm286_vm1, %v2737_v6 }
0x2918   :  { %v1594_v22 = vpop.permute.xlu1 %1593  ;;  %v2738_v27 = vld [vmem:[#allocation3 + $0x28] sm:$0xff] }
0x2919   :  { %1600 = vst.msk [vmem:[#allocation3 + $0x39] sm:$0x7f] %vm1599_vm0, %v1594_v22  ;;  %4735 = vmatmul.mubr.msk.f32.gmra.mxu1 %vm286_vm1, %v2738_v27 }
0x291c   :  { %v2739_v29 = vld [vmem:[#allocation3 + $0x30] sm:$0xff] }
0x291d   :  { %4737 = vmatprep.mubr.msk.f32.mxu1 %vm286_vm1, %v2739_v29 }
0x2920   :  { %v2740_v49 = vld [vmem:[#allocation3 + $0x38] sm:$0xff] }
0x2921   :  { %4738 = vmatmul.mubr.msk.f32.gmra.mxu1 %vm286_vm1, %v2740_v49 }
0x2922   :  { %4759 = vmatprep.mubr.msk.f32.mxu1 %vm5465_vm2, %v5464_v12 }
0x2975   :  { %v3131_v50 = vpop.permute.xlu0 %3130 }
0x2976   :  { %4760 = vmatmul.mubr.msk.f32.vlgmr.msra.gmra.mxu1 %vm286_vm1, %v3131_v50 }
0x2977   :  { %4774 = vmatpush3.msra.mxu1 %v6199_v26  ;;  %4781 = vmatprep.mubr.msk.f32.mxu1 %vm5465_vm2, %v5464_v12 }
0x2978   :  { %4775 = vmatprep.subr.mxu1 %v5464_v12 }
0x2979   :  { %4776 = vmatpush3.msra.mxu1 %v6204_v0 }
0x297a   :  { %4777 = vmatprep.subr.mxu1 %v5464_v12 }
0x297b   :  { %4778 = vmatpush3.msra.mxu1 %v6209_v9 }
0x297c   :  { %4779 = vmatprep.subr.mxu1 %v5464_v12 }
0x297d   :  { %4780 = vmatpush3.msra.mxu1 %v6215_v14 }
0x297e   :  { %4795 = vmatprep.subr.mxu1 %v5464_v12 }
0x29d1   :  { %v6340_v55 = vpop.f32.mrf.mxu1 }
0x29d2   :  { %v2992_v44 = vadd.f32 %v6340_v55, %v6249_v62 }
0x29d3   :  { %v2986_v24 = vpop.f32.mrf.mxu1 }
0x29d4   :  { %v3025_v47 = vadd.f32 %v6266_v43, %v2992_v44  ;;  %v3836_v44 = vld [vmem:[#allocation19 + $0x38] sm:$0xff] }
0x29d9   :  { %v6342_v32 = vpop.f32.mrf.mxu1 }
0x29db   :  { %v6344_v39 = vpop.f32.mrf.mxu1 }
0x29e1   :  { %v6346_v10 = vpop.f32.mrf.mxu1 }
0x29e3   :  { %v6348_v36 = vpop.f32.mrf.mxu1 }
0x2a36   :  { %v3200_v37 = vpop.f32.mrf.mxu1 }
0x2a37   :  { %v3204_v34 = vadd.f32 %v3200_v37, %v3023_v61 }
0x2a38   :  { %v4761_v35 = vpop.f32.mrf.mxu1 }
0x2a39   :  { %5139 = vtanh.f32 %v3204_v34  ;;  %v4306_v53 = vmul.f32 -1.442695, %v3204_v34 }
0x2a3b   :  { %5141 = vpow2.f32 %v4306_v53 }
0x2a46   :  { %v5140_v51 = vpop.eup %5139 }
0x2a47   :  { %3214 = vrot.lane.b32.xlu1 %v5140_v51, %s5466_s2 }
0x2a48   :  { %v5142_v52 = vpop.eup %5141 }
0x2a49   :  { %v3208_v59 = vadd.f32 1.0, %v5142_v52 }
0x2a4b   :  { %5143 = vrcp.f32 %v3208_v59 }
0x2a58   :  { %v5144_v63 = vpop.eup %5143 }
0x2a59   :  { %v3212_v11 = vmul.f32 %v5144_v63, %v6290_v7  ;;  %v2987_v7 = vadd.f32 %v2986_v24, %v6251_v40 }
0x2a5b   :  { %v3024_v41 = vadd.f32 %v6266_v43, %v2987_v7 }
0x2ab9   :  { %v3215_v1 = vpop.permute.xlu1 %3214 }
0x2aba   :  { %v3217_v45 = vmul.f32 %v5144_v63, %v3215_v1 }
0x2abc   :  { %3219 = vrot.lane.b32.xlu0 %v3217_v45, %s5467_s4 }
0x2b2e   :  { %v3220_v3 = vpop.permute.xlu0 %3219 }
0x2b2f   :  { %v3222_v38 = vadd.f32 %v3220_v3, %v3212_v11 }
0x2b31   :  { %5145 = vtanh.f32 %v3222_v38 }
0x2b3e   :  { %v5146_v46 = vpop.eup %5145 }
0x2b3f   :  { %3225 = vrot.lane.b32.xlu1 %v5146_v46, %s5466_s2 }
0x2bb1   :  { %v3226_v15 = vpop.permute.xlu1 %3225 }
0x2bb2   :  { %v3228_v16 = vmul.f32 %v5144_v63, %v3226_v15  ;;  %v2997_v63 = vadd.f32 %v6344_v39, %v6257_v58 }
0x2bb4   :  { %3230 = vrot.lane.b32.xlu0 %v3228_v16, %s5467_s4  ;;  %v3026_v1 = vadd.f32 %v6266_v43, %v2997_v63 }
0x2c26   :  { %v3231_v56 = vpop.permute.xlu0 %3230 }
0x2c27   :  { %4771 = vmatmul.mubr.msk.f32.vlgmr.msra.gmra.mxu0 %vm286_vm1, %v3231_v56 }
0x2c28   :  { %4785 = vmatpush3.msra.mxu0 %v6199_v26  ;;  %4792 = vmatprep.mubr.msk.f32.mxu0 %vm5465_vm2, %v5464_v12 }
0x2c29   :  { %4786 = vmatprep.subr.mxu0 %v5464_v12 }
0x2c2a   :  { %4787 = vmatpush3.msra.mxu0 %v6204_v0 }
0x2c2b   :  { %4788 = vmatprep.subr.mxu0 %v5464_v12 }
0x2c2c   :  { %4789 = vmatpush3.msra.mxu0 %v6209_v9 }
0x2c2d   :  { %4790 = vmatprep.subr.mxu0 %v5464_v12 }
0x2c2e   :  { %4791 = vmatpush3.msra.mxu0 %v6215_v14 }
0x2c2f   :  { %4806 = vmatprep.subr.mxu0 %v5464_v12 }
0x2ce7   :  { %v3300_v21 = vpop.f32.mrf.mxu0 }
0x2ce8   :  { %v3304_v18 = vadd.f32 %v3300_v21, %v3024_v41 }
0x2ce9   :  { %v4772_v23 = vpop.f32.mrf.mxu0 }
0x2cea   :  { %5147 = vtanh.f32 %v3304_v18  ;;  %v4308_v28 = vmul.f32 -1.442695, %v3304_v18 }
0x2cec   :  { %5149 = vpow2.f32 %v4308_v28 }
0x2cf7   :  { %v5148_v54 = vpop.eup %5147 }
0x2cf8   :  { %3314 = vrot.lane.b32.xlu1 %v5148_v54, %s5466_s2 }
0x2cf9   :  { %v5150_v4 = vpop.eup %5149 }
0x2cfa   :  { %v3308_v8 = vadd.f32 1.0, %v5150_v4 }
0x2cfc   :  { %5151 = vrcp.f32 %v3308_v8 }
0x2d09   :  { %v5152_v17 = vpop.eup %5151 }
0x2d0a   :  { %v3312_v40 = vmul.f32 %v5152_v17, %v3222_v38 }
0x2d6a   :  { %v3315_v57 = vpop.permute.xlu1 %3314 }
0x2d6b   :  { %v3317_v42 = vmul.f32 %v5152_v17, %v3315_v57 }
0x2d6d   :  { %3319 = vrot.lane.b32.xlu0 %v3317_v42, %s5467_s4 }
0x2ddf   :  { %v3320_v5 = vpop.permute.xlu0 %3319 }
0x2de0   :  { %v3322_v31 = vadd.f32 %v3320_v5, %v3312_v40 }
0x2de2   :  { %5153 = vtanh.f32 %v3322_v31 }
0x2def   :  { %v5154_v19 = vpop.eup %5153 }
0x2df0   :  { %3325 = vrot.lane.b32.xlu1 %v5154_v19, %s5466_s2 }
0x2e62   :  { %v3326_v30 = vpop.permute.xlu1 %3325 }
0x2e63   :  { %v3328_v25 = vmul.f32 %v5152_v17, %v3326_v30 }
0x2e65   :  { %3330 = vrot.lane.b32.xlu0 %v3328_v25, %s5467_s4 }
0x2ed7   :  { %v3331_v60 = vpop.permute.xlu0 %3330 }
0x2ed8   :  { %4782 = vmatmul.mubr.msk.f32.vlgmr.msra.gmra.mxu1 %vm286_vm1, %v3331_v60 }
0x2ed9   :  { %4796 = vmatpush3.msra.mxu1 %v6199_v26  ;;  %4803 = vmatprep.mubr.msk.f32.mxu1 %vm5465_vm2, %v5464_v12 }
0x2eda   :  { %4797 = vmatprep.subr.mxu1 %v5464_v12 }
0x2edb   :  { %4798 = vmatpush3.msra.mxu1 %v6204_v0 }
0x2edc   :  { %4799 = vmatprep.subr.mxu1 %v5464_v12 }
0x2edd   :  { %4800 = vmatpush3.msra.mxu1 %v6209_v9 }
0x2ede   :  { %4801 = vmatprep.subr.mxu1 %v5464_v12 }
0x2edf   :  { %4802 = vmatpush3.msra.mxu1 %v6215_v14 }
0x2ee0   :  { %4817 = vmatprep.subr.mxu1 %v5464_v12 }
0x2f98   :  { %v3400_v6 = vpop.f32.mrf.mxu1 }
0x2f99   :  { %v3404_v22 = vadd.f32 %v3400_v6, %v3025_v47  ;;  %v3835_v6 = vld [vmem:[#allocation19 + $0x30] sm:$0xff] }
0x2f9a   :  { %v4783_v27 = vpop.f32.mrf.mxu1 }
0x2f9b   :  { %5155 = vtanh.f32 %v3404_v22  ;;  %v4310_v49 = vmul.f32 -1.442695, %v3404_v22  ;;  %v3834_v22 = vld [vmem:[#allocation19 + $0x28] sm:$0xff]  ;;  %v3833_v27 = vld [vmem:[#allocation19 + $0x20] sm:$0xff] }
0x2f9d   :  { %5157 = vpow2.f32 %v4310_v49 }
0x2fa8   :  { %v5156_v29 = vpop.eup %5155 }
0x2fa9   :  { %3414 = vrot.lane.b32.xlu1 %v5156_v29, %s5466_s2  ;;  %v3007_v29 = vadd.f32 %v6348_v36, %v6261_v20 }
0x2faa   :  { %v5158_v50 = vpop.eup %5157 }
0x2fab   :  { %v3408_v24 = vadd.f32 1.0, %v5158_v50  ;;  %v3028_v49 = vadd.f32 %v6266_v43, %v3007_v29 }
0x2fad   :  { %5159 = vrcp.f32 %v3408_v24 }
0x2fba   :  { %v5160_v61 = vpop.eup %5159 }
0x2fbb   :  { %v3412_v62 = vmul.f32 %v5160_v61, %v3322_v31 }
0x301b   :  { %v3415_v37 = vpop.permute.xlu1 %3414 }
0x301c   :  { %v3417_v34 = vmul.f32 %v5160_v61, %v3415_v37 }
0x301e   :  { %3419 = vrot.lane.b32.xlu0 %v3417_v34, %s5467_s4 }
0x3090   :  { %v3420_v55 = vpop.permute.xlu0 %3419 }
0x3091   :  { %v3422_v35 = vadd.f32 %v3420_v55, %v3412_v62 }
0x3093   :  { %5161 = vtanh.f32 %v3422_v35 }
0x30a0   :  { %v5162_v51 = vpop.eup %5161 }
0x30a1   :  { %3425 = vrot.lane.b32.xlu1 %v5162_v51, %s5466_s2 }
0x3113   :  { %v3426_v53 = vpop.permute.xlu1 %3425 }
0x3114   :  { %v3428_v52 = vmul.f32 %v5160_v61, %v3426_v53 }
0x3116   :  { %3430 = vrot.lane.b32.xlu0 %v3428_v52, %s5467_s4 }
0x3188   :  { %v3431_v59 = vpop.permute.xlu0 %3430 }
0x3189   :  { %4793 = vmatmul.mubr.msk.f32.vlgmr.msra.gmra.mxu0 %vm286_vm1, %v3431_v59 }
0x318a   :  { %4807 = vmatpush3.msra.mxu0 %v6199_v26  ;;  %4814 = vmatprep.mubr.msk.f32.mxu0 %vm5465_vm2, %v5464_v12 }
0x318b   :  { %4808 = vmatprep.subr.mxu0 %v5464_v12 }
0x318c   :  { %4809 = vmatpush3.msra.mxu0 %v6204_v0 }
0x318d   :  { %4810 = vmatprep.subr.mxu0 %v5464_v12 }
0x318e   :  { %4811 = vmatpush3.msra.mxu0 %v6209_v9 }
0x318f   :  { %4812 = vmatprep.subr.mxu0 %v5464_v12 }
0x3190   :  { %4813 = vmatpush3.msra.mxu0 %v6215_v14 }
0x3191   :  { %4828 = vmatprep.subr.mxu0 %v5464_v12 }
0x3249   :  { %v3500_v45 = vpop.f32.mrf.mxu0 }
0x324a   :  { %v3504_v11 = vadd.f32 %v3500_v45, %v3026_v1 }
0x324b   :  { %v4794_v3 = vpop.f32.mrf.mxu0 }
0x324c   :  { %5163 = vtanh.f32 %v3504_v11  ;;  %v4312_v46 = vmul.f32 -1.442695, %v3504_v11  ;;  %v3832_v11 = vld [vmem:[#allocation19 + $0x18] sm:$0xff] }
0x324e   :  { %5165 = vpow2.f32 %v4312_v46  ;;  %v3830_v46 = vld [vmem:[#allocation19 + $0x8] sm:$0xff] }
0x3259   :  { %v5164_v38 = vpop.eup %5163 }
0x325a   :  { %3514 = vrot.lane.b32.xlu1 %v5164_v38, %s5466_s2  ;;  %v3831_v38 = vld [vmem:[#allocation19 + $0x10] sm:$0xff] }
0x325b   :  { %v5166_v15 = vpop.eup %5165 }
0x325c   :  { %v3508_v16 = vadd.f32 1.0, %v5166_v15 }
0x325e   :  { %5167 = vrcp.f32 %v3508_v16  ;;  %v3012_v16 = vadd.f32 %v6346_v10, %v6259_v48 }
0x326b   :  { %v5168_v56 = vpop.eup %5167 }
0x326c   :  { %v3512_v58 = vmul.f32 %v5168_v56, %v3422_v35 }
0x32cc   :  { %v3515_v7 = vpop.permute.xlu1 %3514 }
0x32cd   :  { %v3517_v41 = vmul.f32 %v5168_v56, %v3515_v7 }
0x32cf   :  { %3519 = vrot.lane.b32.xlu0 %v3517_v41, %s5467_s4 }
0x3341   :  { %v3520_v39 = vpop.permute.xlu0 %3519 }
0x3342   :  { %v3522_v21 = vadd.f32 %v3520_v39, %v3512_v58 }
0x3344   :  { %5169 = vtanh.f32 %v3522_v21 }
0x3351   :  { %v5170_v18 = vpop.eup %5169 }
0x3352   :  { %3525 = vrot.lane.b32.xlu1 %v5170_v18, %s5466_s2 }
0x33c4   :  { %v3526_v23 = vpop.permute.xlu1 %3525 }
0x33c5   :  { %v3528_v54 = vmul.f32 %v5168_v56, %v3526_v23  ;;  %v3029_v56 = vadd.f32 %v6266_v43, %v3012_v16 }
0x33c7   :  { %3530 = vrot.lane.b32.xlu0 %v3528_v54, %s5467_s4 }
0x3439   :  { %v3531_v28 = vpop.permute.xlu0 %3530 }
0x343a   :  { %4804 = vmatmul.mubr.msk.f32.vlgmr.msra.gmra.mxu1 %vm286_vm1, %v3531_v28 }
0x343b   :  { %4818 = vmatpush3.msra.mxu1 %v6199_v26  ;;  %4825 = vmatprep.mubr.msk.f32.mxu1 %vm5465_vm2, %v5464_v12  ;;  %v3002_v26 = vadd.f32 %v6342_v32, %v6255_v13 }
0x343c   :  { %4819 = vmatprep.subr.mxu1 %v5464_v12 }
0x343d   :  { %4820 = vmatpush3.msra.mxu1 %v6204_v0  ;;  %v3027_v4 = vadd.f32 %v6266_v43, %v3002_v26 }
0x343e   :  { %4821 = vmatprep.subr.mxu1 %v5464_v12 }
0x343f   :  { %4822 = vmatpush3.msra.mxu1 %v6209_v9 }
0x3440   :  { %4823 = vmatprep.subr.mxu1 %v5464_v12 }
0x3441   :  { %4824 = vmatpush3.msra.mxu1 %v6215_v14 }
0x3442   :  { %4839 = vmatprep.subr.mxu1 %v5464_v12 }
0x34fa   :  { %v3600_v8 = vpop.f32.mrf.mxu1 }
0x34fb   :  { %v3604_v17 = vadd.f32 %v3600_v8, %v3027_v4 }
0x34fc   :  { %v4805_v57 = vpop.f32.mrf.mxu1 }
0x34fd   :  { %5171 = vtanh.f32 %v3604_v17  ;;  %v4314_v42 = vmul.f32 -1.442695, %v3604_v17 }
0x34ff   :  { %5173 = vpow2.f32 %v4314_v42 }
0x350a   :  { %v5172_v0 = vpop.eup %5171 }
0x350b   :  { %3614 = vrot.lane.b32.xlu1 %v5172_v0, %s5466_s2 }
0x350c   :  { %v5174_v9 = vpop.eup %5173 }
0x350d   :  { %v3608_v40 = vadd.f32 1.0, %v5174_v9 }
0x350f   :  { %5175 = vrcp.f32 %v3608_v40 }
0x351c   :  { %v5176_v14 = vpop.eup %5175 }
0x351d   :  { %v3612_v13 = vmul.f32 %v5176_v14, %v3522_v21  ;;  %v4321_v21 = vld [vmem:[%s6501_s13] ss:$0 sm:$0xff]  ;;  %s5468_s13 = smov 96  }
0x357d   :  { %v3615_v5 = vpop.permute.xlu1 %3614 }
0x357e   :  { %v3617_v31 = vmul.f32 %v5176_v14, %v3615_v5 }
0x3580   :  { %3619 = vrot.lane.b32.xlu0 %v3617_v31, %s5467_s4 }
0x35f2   :  { %v3620_v32 = vpop.permute.xlu0 %3619 }
0x35f3   :  { %v3622_v19 = vadd.f32 %v3620_v32, %v3612_v13 }
0x35f5   :  { %5177 = vtanh.f32 %v3622_v19 }
0x3602   :  { %v5178_v30 = vpop.eup %5177 }
0x3603   :  { %3625 = vrot.lane.b32.xlu1 %v5178_v30, %s5466_s2  ;;  %v4016_v30 = vld [vmem:[#allocation22 + $0x30] sm:$0xff] }
0x3675   :  { %v3626_v25 = vpop.permute.xlu1 %3625 }
0x3676   :  { %v3628_v60 = vmul.f32 %v5176_v14, %v3626_v25  ;;  %v4015_v25 = vld [vmem:[#allocation22 + $0x28] sm:$0xff] }
0x3678   :  { %3630 = vrot.lane.b32.xlu0 %v3628_v60, %s5467_s4  ;;  %v4014_v60 = vld [vmem:[#allocation22 + $0x20] sm:$0xff] }
0x36ea   :  { %v3631_v47 = vpop.permute.xlu0 %3630 }
0x36eb   :  { %4815 = vmatmul.mubr.msk.f32.vlgmr.msra.gmra.mxu0 %vm286_vm1, %v3631_v47  ;;  %v4012_v47 = vld [vmem:[#allocation22 + $0x10] sm:$0xff] }
0x36ec   :  { %4829 = vmatpush3.msra.mxu0 %v3836_v44  ;;  %4836 = vmatprep.mubr.msk.f32.mxu0 %vm5465_vm2, %v5464_v12  ;;  %v4013_v44 = vld [vmem:[#allocation22 + $0x18] sm:$0xff] }
0x36ed   :  { %4830 = vmatprep.subr.mxu0 %v5464_v12 }
0x36ee   :  { %4831 = vmatpush3.msra.mxu0 %v3835_v6 }
0x36ef   :  { %4832 = vmatprep.subr.mxu0 %v5464_v12 }
0x36f0   :  { %4833 = vmatpush3.msra.mxu0 %v3834_v22  ;;  %v4011_v22 = vld [vmem:[#allocation22 + $0x8] sm:$0xff] }
0x36f1   :  { %4834 = vmatprep.subr.mxu0 %v5464_v12 }
0x36f2   :  { %4835 = vmatpush3.msra.mxu0 %v3833_v27  ;;  %v4010_v27 = vld [vmem:[#allocation22] sm:$0xff] }
0x36f3   :  { %4837 = vmatmul.mubr.msk.f32.vlgmr.msra.gmra.mxu0 %vm286_vm1, %v5974_v2  ;;  %4850 = vmatprep.subr.mxu0 %v5464_v12 }
0x36f4   :  { %4858 = vmatprep.mubr.msk.f32.mxu0 %vm5465_vm2, %v5464_v12 }
0x37ab   :  { %v3700_v50 = vpop.f32.mrf.mxu0 }
0x37ac   :  { %v3704_v24 = vadd.f32 %v3700_v50, %v3028_v49 }
0x37ad   :  { %v4816_v61 = vpop.f32.mrf.mxu0 }
0x37ae   :  { %5179 = vtanh.f32 %v3704_v24  ;;  %v4316_v2 = vmul.f32 -1.442695, %v3704_v24 }
0x37b0   :  { %5181 = vpow2.f32 %v4316_v2 }
0x37b3   :  { %v3903_v37 = vpop.f32.mrf.mxu0 }
0x37b5   :  { %v4838_v34 = vpop.f32.mrf.mxu0 }
0x37bb   :  { %v5180_v62 = vpop.eup %5179 }
0x37bc   :  { %3714 = vrot.lane.b32.xlu1 %v5180_v62, %s5466_s2 }
0x37bd   :  { %v5182_v55 = vpop.eup %5181 }
0x37be   :  { %v3708_v35 = vadd.f32 1.0, %v5182_v55 }
0x37c0   :  { %5183 = vrcp.f32 %v3708_v35 }
0x37cd   :  { %v5184_v51 = vpop.eup %5183 }
0x37ce   :  { %v3712_v20 = vmul.f32 %v5184_v51, %v3622_v19  ;;  %v4017_v19 = vld [vmem:[#allocation22 + $0x38] sm:$0xff] }
0x37cf   :  { %4851 = vmatpush3.msra.mxu0 %v4017_v19 }
0x37d0   :  { %4852 = vmatprep.subr.mxu0 %v5464_v12 }
0x37d1   :  { %4853 = vmatpush3.msra.mxu0 %v4016_v30 }
0x37d2   :  { %4854 = vmatprep.subr.mxu0 %v5464_v12 }
0x37d3   :  { %4855 = vmatpush3.msra.mxu0 %v4015_v25 }
0x37d4   :  { %4856 = vmatprep.subr.mxu0 %v5464_v12 }
0x37d5   :  { %4857 = vmatpush3.msra.mxu0 %v4014_v60 }
0x382e   :  { %v3715_v53 = vpop.permute.xlu1 %3714 }
0x382f   :  { %v3717_v52 = vmul.f32 %v5184_v51, %v3715_v53 }
0x3831   :  { %3719 = vrot.lane.b32.xlu0 %v3717_v52, %s5467_s4 }
0x38a3   :  { %v3720_v36 = vpop.permute.xlu0 %3719 }
0x38a4   :  { %v6444_v59 = vadd.f32 %v3720_v36, %v3712_v20 }
0x38a6   :  { %5185 = vtanh.f32 %v6444_v59 }
0x38b3   :  { %v5186_v63 = vpop.eup %5185 }
0x38b4   :  { %3725 = vrot.lane.b32.xlu1 %v5186_v63, %s5466_s2 }
0x38b8   :  { %3910 = vrot.lane.b32.xlu1 %v6298_v33, %s5467_s4  ;;  %v3829_v33 = vld [vmem:[#allocation19] sm:$0xff] }
0x3926   :  { %v3726_v1 = vpop.permute.xlu1 %3725 }
0x3927   :  { %v3728_v45 = vmul.f32 %v5184_v51, %v3726_v1 }
0x3929   :  { %3730 = vrot.lane.b32.xlu0 %v3728_v45, %s5467_s4 }
0x392a   :  { %v3911_v15 = vpop.permute.xlu1 %3910 }
0x399b   :  { %v3731_v3 = vpop.permute.xlu0 %3730 }
0x399c   :  { %4826 = vmatmul.mubr.msk.f32.vlgmr.msra.gmra.mxu1 %vm286_vm1, %v3731_v3 }
0x399d   :  { %4840 = vmatpush3.msra.mxu1 %v3832_v11  ;;  %4847 = vmatprep.mubr.msk.f32.mxu1 %vm5465_vm2, %v5464_v12 }
0x399e   :  { %4841 = vmatprep.subr.mxu1 %v5464_v12 }
0x399f   :  { %4842 = vmatpush3.msra.mxu1 %v3831_v38 }
0x39a0   :  { %4843 = vmatprep.subr.mxu1 %v5464_v12 }
0x39a1   :  { %4844 = vmatpush3.msra.mxu1 %v3830_v46 }
0x39a2   :  { %4845 = vmatprep.subr.mxu1 %v5464_v12 }
0x39a3   :  { %4846 = vmatpush3.msra.mxu1 %v3829_v33 }
0x39a4   :  { %4848 = vmatmul.mubr.msk.f32.vlgmr.msra.gmra.mxu1 %vm286_vm1, %v3911_v15  ;;  %4861 = vmatprep.subr.mxu1 %v5464_v12 }
0x39a5   :  { %4869 = vmatprep.mubr.msk.f32.mxu1 %vm5465_vm2, %v5464_v12  ;;  %4862 = vmatpush3.msra.mxu1 %v4013_v44 }
0x39a6   :  { %4863 = vmatprep.subr.mxu1 %v5464_v12 }
0x39a7   :  { %4864 = vmatpush3.msra.mxu1 %v4012_v47 }
0x39a8   :  { %4865 = vmatprep.subr.mxu1 %v5464_v12 }
0x39a9   :  { %4866 = vmatpush3.msra.mxu1 %v4011_v22 }
0x39aa   :  { %4867 = vmatprep.subr.mxu1 %v5464_v12  ;;  %v4325_v12 = vld [vmem:[%s6503_s15] ss:$0 sm:$0xff] }
0x39ab   :  { %4868 = vmatpush3.msra.mxu1 %v4010_v27 }
0x3a5c   :  { %v3800_v7 = vpop.f32.mrf.mxu1 }
0x3a5d   :  { %v3804_v41 = vadd.f32 %v3800_v7, %v3029_v56 }
0x3a5e   :  { %v4827_v58 = vpop.f32.mrf.mxu1 }
0x3a5f   :  { %5187 = vtanh.f32 %v3804_v41  ;;  %v4318_v48 = vmul.f32 -1.442695, %v3804_v41 }
0x3a64   :  { %v3980_v39 = vpop.f32.mrf.mxu1 }
0x3a65   :  { %v3981_v18 = vadd.f32 %v3980_v39, %v3903_v37 }
0x3a66   :  { %v4849_v23 = vpop.f32.mrf.mxu1 }
0x3a67   :  { %v3991_v54 = vadd.f32 %v4321_v21, %v3981_v18 }
0x3a69   :  { %5189 = vtanh.f32 %v3991_v54  ;;  %v4322_v43 = vmul.f32 -1.442695, %v3991_v54 }
0x3a6a   :  { %5191 = vpow2.f32 %v4318_v48 }
0x3a6b   :  { %5193 = vpow2.f32 %v4322_v43 }
0x3a6c   :  { %v5188_v28 = vpop.eup %5187 }
0x3a6d   :  { %3814 = vrot.lane.b32.xlu0 %v5188_v28, %s5466_s2 }
0x3a76   :  { %v5190_v26 = vpop.eup %5189 }
0x3a77   :  { %4000 = vrot.lane.b32.xlu0 %v5190_v26, %s5466_s2  ;;  %v5192_v10 = vpop.eup %5191 }
0x3a78   :  { %v3808_v4 = vadd.f32 1.0, %v5192_v10  ;;  %v5194_v8 = vpop.eup %5193 }
0x3a79   :  { %v3995_v17 = vadd.f32 1.0, %v5194_v8 }
0x3a7a   :  { %5195 = vrcp.f32 %v3808_v4 }
0x3a7b   :  { %5197 = vrcp.f32 %v3995_v17 }
0x3a87   :  { %v5196_v57 = vpop.eup %5195 }
0x3a88   :  { %v5198_v9 = vpop.eup %5197  ;;  %v3812_v31 = vmul.f32 %v5196_v57, %v6444_v59 }
0x3adf   :  { %v3815_v0 = vpop.permute.xlu0 %3814 }
0x3ae0   :  { %v3817_v42 = vmul.f32 %v5196_v57, %v3815_v0 }
0x3ae2   :  { %3819 = vrot.lane.b32.xlu1 %v3817_v42, %s5467_s4 }
0x3ae9   :  { %v4001_v40 = vpop.permute.xlu0 %4000 }
0x3aea   :  { %v4003_v14 = vmul.f32 %v5198_v9, %v4001_v40 }
0x3aec   :  { %5199 = vtanh.f32 %v4003_v14 }
0x3af9   :  { %v5200_v5 = vpop.eup %5199 }
0x3afa   :  { %4006 = vrot.lane.b32.xlu0 %v5200_v5, %s5468_s13 }
0x3b54   :  { %v3820_v13 = vpop.permute.xlu1 %3819 }
0x3b55   :  { %v3822_v32 = vadd.f32 %v3820_v13, %v3812_v31 }
0x3b57   :  { %5201 = vtanh.f32 %v3822_v32 }
0x3b64   :  { %v5202_v6 = vpop.eup %5201 }
0x3b65   :  { %3825 = vrot.lane.b32.xlu1 %v5202_v6, %s5466_s2 }
0x3b6c   :  { %v4007_v29 = vpop.permute.xlu0 %4006 }
0x3b6d   :  { %v4009_v49 = vmul.f32 %v5198_v9, %v4007_v29 }
0x3b6f   :  { %4019 = vrot.lane.b32.xlu1 %v4009_v49, %s5467_s4 }
0x3bd7   :  { %v3826_v50 = vpop.permute.xlu1 %3825 }
0x3bd8   :  { %v3828_v24 = vmul.f32 %v5196_v57, %v3826_v50 }
0x3bda   :  { %4094 = vrot.lane.b32.xlu0 %v3828_v24, %s5467_s4 }
0x3be1   :  { %v4020_v61 = vpop.permute.xlu1 %4019 }
0x3be2   :  { %4859 = vmatmul.mubr.msk.f32.vlgmr.msra.gmra.mxu0 %vm286_vm1, %v4020_v61 }
0x3c4c   :  { %v4095_v37 = vpop.permute.xlu0 %4094 }
0x3c4d   :  { %4870 = vmatmul.mubr.msk.f32.vlgmr.msra.gmra.mxu1 %vm286_vm1, %v4095_v37 }
0x3ca2   :  { %v4089_v34 = vpop.f32.mrf.mxu0 }
0x3ca4   :  { %v4860_v62 = vpop.f32.mrf.mxu0 }
0x3d0d   :  { %v4164_v2 = vpop.f32.mrf.mxu1 }
0x3d0e   :  { %v4165_v55 = vadd.f32 %v4164_v2, %v4089_v34 }
0x3d0f   :  { %v4871_v35 = vpop.f32.mrf.mxu1 }
0x3d10   :  { %v4175_v51 = vadd.f32 %v4325_v12, %v4165_v55 }
0x3d12   :  { %4176 = vmax.xlane.f32.xlu1 %v4175_v51 }
0x3d9b   :  { %v4177_v53 = vpop.xlane.xlu1 %4176 }
0x3d9c   :  { %v4178_v52 = vsub.f32 %v4175_v51, %v4177_v53 }
0x3d9e   :  { %v4179_v20 = vmul.f32 1.442695, %v4178_v52 }
0x3da0   :  { %5203 = vpow2.f32 %v4179_v20 }
0x3dad   :  { %v5204_v36 = vpop.eup %5203 }
0x3dae   :  { %4181 = vadd.xlane.f32.xlu0 %v5204_v36 }
0x3e37   :  { %v4182_v59 = vpop.xlane.xlu0 %4181 }
0x3e38   :  { %5205 = vrcp.f32 %v4182_v59 }
0x3e45   :  { %v5206_v63 = vpop.eup %5205 }
0x3e46   :  { %v4184_v1 = vmul.f32 %v5206_v63, %v5204_v36 }
0x3e48   :  { %4185 = vst [vmem:[#allocation24] sm:$0xff] %v4184_v1 }
0x3e49   :  { %5426 = shalt.err (!%p5423_p12)
}
0x3e4a   :  { %4195 = dma.vmem_to_hbm [thread:$0]  %s4193_s0, 128, %s6504_s16, [#allocation9]  }
0x3e4b   :  { %5449 = dma.done.wait [#allocation9], 128  }
0x3e4c   :  { %5450 = vsyncadd [#allocation9], 4294967168 }
0x3e4d   :  { %4199 = vsyncpa [#allocation8], 1 }
0x3e4e   :  { %4200 = vsyncpa [#allocation11], 1 }
0x3e4f   :  { %4201 = vsyncpa [#allocation14], 1 }
0x3e50   :  { %4202 = vsyncpa [#allocation17], 1 }
0x3e51   :  { %4203 = vsyncpa [#allocation20], 1 }
0x3e52   :  { %4204 = vsyncpa [#allocation23], 1 }
0x3e53   :  { %4205 = vsyncpa [#allocation9], 1 }

</bundles_post_ra>
